<compile_context>
chip_gen: v6e
topology: v6e:2x2x1
jax: 0.10.0
libtpu: 0.0.40
codegen_flags: <defaults>
</compile_context>

<pallas_src>
import functools

import jax
import jax.numpy as jnp
from jax.experimental import pallas as pl
from jax.experimental.pallas import tpu as pltpu

TILE_E = 512          # edges per grid step
LANE = 128            # lane-padded feature width


# ---------------------------------------------------------------------------
# Fused Pallas kernel
# ---------------------------------------------------------------------------
def _gcn_encoder_kernel(slab0_ref, idx_col_ref, dst_row_ref, batch_row_ref,
                        hd_ref, w_ref, v_ref, wr_ref, vr_ref,
                        out_ref, feat_ref, acc_ref):
    layer = pl.program_id(0)
    tile = pl.program_id(1)
    n_tiles = pl.num_programs(1)
    n_pad = feat_ref.shape[0]
    tile_e = dst_row_ref.shape[1]

    @pl.when((layer == 0) & (tile == 0))
    def _init():
        feat_ref[...] = slab0_ref[...]               # bf16 node features, resident in VMEM
        acc_ref[...] = jnp.zeros_like(acc_ref)
        out_ref[...] = jnp.zeros_like(out_ref)

    # per-layer packed (pre-folded) weights: zero padded to [128,128] bf16 / [1,128] f32
    wp1, wa, wb, wc, wm2 = w_ref[0], w_ref[1], w_ref[2], w_ref[3], w_ref[4]
    vv = v_ref[...]                                   # [8, 128] f32
    bp1, b_fold, bm2 = vv[0:1], vv[1:2], vv[2:3]

    # gather / scatter one-hots built in-kernel from int32 edge indices (VPU work);
    # 0/1 values are exact in bf16 and feed the MXU at bf16 rate.
    idx_col = idx_col_ref[...]                        # [2*tE, 1]: dst rows then src rows
    iota_en = jax.lax.broadcasted_iota(jnp.int32, (2 * tile_e, n_pad), 1)
    g_ij = (iota_en == idx_col).astype(jnp.bfloat16)            # [2*tE, N] gather one-hot
    iota_ne = jax.lax.broadcasted_iota(jnp.int32, (n_pad, tile_e), 0)
    scat = (iota_ne == dst_row_ref[...]).astype(jnp.bfloat16)   # [N, tE] scatter one-hot

    feat = feat_ref[...]                                         # bf16 [N, 128]
    # gather x_i (first half, dst) and x_j (second half, src) in one stacked MXU pass
    f_ij = jnp.dot(g_ij, feat, preferred_element_type=jnp.float32)        # [2*tE, 128]

    # first pixel-embedding layer (shared weights): one stacked [2*tE,128]x[128,128] pass
    pe1_ij = jnp.maximum(
        jnp.dot(f_ij.astype(jnp.bfloat16), wp1, preferred_element_type=jnp.float32) + bp1,
        0.0).astype(jnp.bfloat16)
    pe1_i, pe1_j = pe1_ij[:tile_e], pe1_ij[tile_e:]

    # message MLP with folded weights:
    #   h = relu(pe1_i @ (wp2@wm1a) + pe1_j @ (wp2@wm1b) + hd @ (wd2@wm1c) + b_fold)
    # hd = relu(||pos_i-pos_j|| @ wd1 + bd1) is loop-invariant and streamed per tile.
    h = (jnp.dot(pe1_i, wa, preferred_element_type=jnp.float32)
         + jnp.dot(pe1_j, wb, preferred_element_type=jnp.float32)
         + jnp.dot(hd_ref[0], wc, preferred_element_type=jnp.float32)
         + b_fold)
    h = jnp.maximum(h, 0.0).astype(jnp.bfloat16)
    msg = (jnp.dot(h, wm2, preferred_element_type=jnp.float32) + bm2).astype(jnp.bfloat16)

    # 'add' aggregation: scatter-add to target nodes via incidence matmul (MXU, f32 acc).
    # Padded edges carry the sentinel index n_pad -> all-zero scatter columns -> dropped.
    acc_ref[...] += jnp.dot(scat, msg, preferred_element_type=jnp.float32)

    @pl.when((tile == n_tiles - 1) & (layer == 0))
    def _handoff():
        # x = conv1(...).relu(); new node slab for conv2 (positions are not needed in-slab)
        feat_ref[...] = jnp.maximum(acc_ref[...], 0.0).astype(jnp.bfloat16)
        acc_ref[...] = jnp.zeros_like(acc_ref)

    @pl.when((tile == n_tiles - 1) & (layer == 1))
    def _readout():
        h_nodes = jnp.maximum(acc_ref[...], 0.0)                 # x = conv2(...).relu()
        n_graphs = out_ref.shape[0]
        iota_gn = jax.lax.broadcasted_iota(jnp.int32, (n_graphs, n_pad), 0)
        pool = (iota_gn == batch_row_ref[...]).astype(jnp.float32)           # [G, N]
        pooled = jnp.dot(pool, h_nodes, preferred_element_type=jnp.float32)  # global_add_pool
        vr = vr_ref[...]
        hr = jnp.dot(pooled, wr_ref[0], preferred_element_type=jnp.float32)  # Linear(16,8,no bias)
        # TODO(synk): BatchNorm evaluated with eval-mode running stats (mean=0, var=1)
        # folded into scale/bias; training-mode batch statistics are not computed in-kernel.
        hr = jnp.maximum(hr * vr[0:1] + vr[1:2], 0.0)
        out_ref[...] = jnp.dot(hr, wr_ref[1], preferred_element_type=jnp.float32) + vr[2:3]


# ---------------------------------------------------------------------------
# Wrapper: padding, weight folding/packing, pallas_call setup
# ---------------------------------------------------------------------------
def _pad2(a, rows, cols):
    return jnp.pad(a, ((0, rows - a.shape[0]), (0, cols - a.shape[1])))


def _pack_conv(p):
    """Fold the back-to-back linears and pack one conv layer's weights.

    W slab (bf16): [wp1, wp2@wm1a, wp2@wm1b, wd2@wm1c, wm2]          -> [5,128,128]
    V slab (f32):  [bp1, bm1 + bp2@wm1a + bp2@wm1b + bd2@wm1c, bm2]  -> [8,128] (zero rows pad)
    """
    hp = "highest"
    wa = jnp.dot(p["wp2"], p["wm1a"], precision=hp)
    wb = jnp.dot(p["wp2"], p["wm1b"], precision=hp)
    wc = jnp.dot(p["wd2"], p["wm1c"], precision=hp)
    b_fold = (p["bm1"]
              + jnp.dot(p["bp2"], p["wm1a"], precision=hp)
              + jnp.dot(p["bp2"], p["wm1b"], precision=hp)
              + jnp.dot(p["bd2"], p["wm1c"], precision=hp))
    w = jnp.stack([_pad2(m, LANE, LANE) for m in (p["wp1"], wa, wb, wc, p["wm2"])])
    w = w.astype(jnp.bfloat16)                                            # [5,128,128]
    v = jnp.zeros((8, LANE), jnp.float32)
    v = v.at[0:1, : p["bp1"].shape[1]].set(p["bp1"])
    v = v.at[1:2, : b_fold.shape[1]].set(b_fold)
    v = v.at[2:3, : p["bm2"].shape[1]].set(p["bm2"])                      # [8,128]
    return w, v


def gcn_encoder_forward(x, pos, edge_index, batch, num_graphs, params):
    n = x.shape[0]
    n_pad = max(int(pl.cdiv(n, LANE)) * LANE, LANE)
    src, dst = edge_index[0].astype(jnp.int32), edge_index[1].astype(jnp.int32)
    e = src.shape[0]
    n_tiles = int(pl.cdiv(e, TILE_E))
    e_pad = n_tiles * TILE_E

    # node feature slab (bf16): features in the low lanes; positions are NOT stored.
    slab0 = jnp.zeros((n_pad, LANE), jnp.float32).at[:n, : x.shape[1]].set(
        x.astype(jnp.float32)).astype(jnp.bfloat16)

    # int32 edge indices; padded edges get sentinel n_pad -> all-zero one-hot rows/cols
    dst_p = jnp.full((e_pad,), n_pad, jnp.int32).at[:e].set(dst)
    src_p = jnp.full((e_pad,), n_pad, jnp.int32).at[:e].set(src)
    idx_col = jnp.concatenate(
        [dst_p.reshape(n_tiles, TILE_E), src_p.reshape(n_tiles, TILE_E)], axis=1
    ).reshape(n_tiles * 2 * TILE_E, 1)
    dst_row = dst_p.reshape(1, e_pad)
    batch_row = jnp.full((1, n_pad), num_graphs, jnp.int32).at[0, :n].set(
        batch.astype(jnp.int32))

    # loop-invariant distance path, exact f32: ||pos_i - pos_j|| and the per-layer
    # Linear(1,8)+ReLU of the dist embedding; streamed per (layer, edge tile) in bf16.
    d = jnp.sqrt(jnp.sum((pos[dst] - pos[src]).astype(jnp.float32) ** 2,
                         axis=-1, keepdims=True))                        # [e, 1]
    hd = jnp.stack([jnp.maximum(jnp.dot(d, params[c]["wd1"], precision="highest")
                                + params[c]["bd1"], 0.0)
                    for c in ("conv1", "conv2")])                        # [2, e, 8]
    hd_all = jnp.zeros((2, e_pad, LANE), jnp.bfloat16).at[:, :e, : hd.shape[-1]].set(
        hd.astype(jnp.bfloat16))

    w1, v1 = _pack_conv(params["conv1"])
    w2, v2 = _pack_conv(params["conv2"])
    w_stk = jnp.concatenate([w1, w2], axis=0)       # [10,128,128] bf16
    v_stk = jnp.concatenate([v1, v2], axis=0)       # [16,128]    f32

    rp = params["readout"]
    wr = jnp.stack([_pad2(rp["w1"], LANE, LANE), _pad2(rp["w2"], LANE, LANE)])   # [2,128,128]
    vr = jnp.concatenate([_pad2(rp["bn_scale"], 1, LANE),
                          _pad2(rp["bn_bias"], 1, LANE),
                          _pad2(rp["b2"], 1, LANE)], axis=0)                      # [3,128]

    # VMEM limit: ~75% of physical (96 MiB on 128 MiB v5e/v6e, 48 MiB on 64 MiB v7x).
    try:
        vmem_cap = int(pltpu.get_tpu_info().vmem_capacity_bytes)
    except Exception:
        vmem_cap = 64 * 1024 * 1024
    vmem_limit = min(int(vmem_cap * 3 // 4), 100 * 1024 * 1024)

    out = pl.pallas_call(
        _gcn_encoder_kernel,
        out_shape=jax.ShapeDtypeStruct((num_graphs, LANE), jnp.float32),
        grid=(2, n_tiles),
        in_specs=[
            pl.BlockSpec((n_pad, LANE), lambda l, t: (0, 0)),             # slab0 (resident)
            pl.BlockSpec((2 * TILE_E, 1), lambda l, t: (t, 0)),           # stacked dst/src col
            pl.BlockSpec((1, TILE_E), lambda l, t: (0, t)),               # dst (lane-dense row)
            pl.BlockSpec((1, n_pad), lambda l, t: (0, 0)),                # batch (resident)
            pl.BlockSpec((1, TILE_E, LANE), lambda l, t: (l, t, 0)),      # hd per layer/tile
            pl.BlockSpec((5, LANE, LANE), lambda l, t: (l, 0, 0)),        # conv weights / layer
            pl.BlockSpec((8, LANE), lambda l, t: (l, 0)),                 # conv biases  / layer
            pl.BlockSpec((2, LANE, LANE), lambda l, t: (0, 0, 0)),        # readout weights
            pl.BlockSpec((3, LANE), lambda l, t: (0, 0)),                 # readout biases
        ],
        out_specs=pl.BlockSpec((num_graphs, LANE), lambda l, t: (0, 0)),
        scratch_shapes=[pltpu.VMEM((n_pad, LANE), jnp.bfloat16),          # feat (node slab)
                        pltpu.VMEM((n_pad, LANE), jnp.float32)],          # acc  (aggregation)
        compiler_params=pltpu.CompilerParams(
            dimension_semantics=("arbitrary", "arbitrary"),
            vmem_limit_bytes=vmem_limit),
    )(slab0, idx_col, dst_row, batch_row, hd_all, w_stk, v_stk, wr, vr)
    return out[:, : rp["w2"].shape[1]]


# ---------------------------------------------------------------------------
# Deterministic parameter init (PyTorch nn.Linear-style)
# ---------------------------------------------------------------------------
def _linear_init(key, fan_in, fan_out, bias=True):
    k1, k2 = jax.random.split(key)
    bound = 1.0 / (fan_in ** 0.5)
    w = jax.random.uniform(k1, (fan_in, fan_out), jnp.float32, -bound, bound)
    if not bias:
        return w, None
    b = jax.random.uniform(k2, (1, fan_out), jnp.float32, -bound, bound)
    return w, b


def init_conv_params(key, x_dim, pix_dim, mlp_out):
    ks = jax.random.split(key, 6)
    wp1, bp1 = _linear_init(ks[0], x_dim, pix_dim)
    wp2, bp2 = _linear_init(ks[1], pix_dim, pix_dim)
    wd1, bd1 = _linear_init(ks[2], 1, 8)
    wd2, bd2 = _linear_init(ks[3], 8, 8)
    cat_dim = 2 * pix_dim + 8
    wm1, bm1 = _linear_init(ks[4], cat_dim, mlp_out)
    wm2, bm2 = _linear_init(ks[5], mlp_out, mlp_out)
    return dict(wp1=wp1, bp1=bp1, wp2=wp2, bp2=bp2,
                wd1=wd1, bd1=bd1, wd2=wd2, bd2=bd2,
                wm1a=wm1[:pix_dim], wm1b=wm1[pix_dim:2 * pix_dim],
                wm1c=wm1[2 * pix_dim:], bm1=bm1,
                wm2=wm2, bm2=bm2)


def init_readout_params(key, in_dim=16, hid=8, out=8):
    k1, k2 = jax.random.split(key)
    w1, _ = _linear_init(k1, in_dim, hid, bias=False)
    w2, b2 = _linear_init(k2, hid, out, bias=True)
    eps = 1e-5
    gamma = jnp.ones((1, hid), jnp.float32)
    beta = jnp.zeros((1, hid), jnp.float32)
    run_mean = jnp.zeros((1, hid), jnp.float32)
    run_var = jnp.ones((1, hid), jnp.float32)
    bn_scale = gamma / jnp.sqrt(run_var + eps)
    bn_bias = beta - run_mean * bn_scale
    return dict(w1=w1, bn_scale=bn_scale, bn_bias=bn_bias, w2=w2, b2=b2)


def init_params(key):
    k1, k2, k3 = jax.random.split(key, 3)
    return dict(
        conv1=init_conv_params(k1, x_dim=1, pix_dim=4, mlp_out=8),
        conv2=init_conv_params(k2, x_dim=8, pix_dim=8, mlp_out=16),
        readout=init_readout_params(k3),
    )


# ---------------------------------------------------------------------------
# Pure-JAX f32 reference (unfused, original Custom_GCN math) for correctness
# ---------------------------------------------------------------------------
def _conv_ref(x, pos, src, dst, p):
    hp = "highest"

    def pe(v):
        h = jnp.maximum(jnp.dot(v, p["wp1"], precision=hp) + p["bp1"], 0.0)
        return jnp.dot(h, p["wp2"], precision=hp) + p["bp2"]

    pe_i, pe_j = pe(x[dst]), pe(x[src])
    d = jnp.sqrt(jnp.sum((pos[dst] - pos[src]) ** 2, axis=-1, keepdims=True))
    hd = jnp.maximum(jnp.dot(d, p["wd1"], precision=hp) + p["bd1"], 0.0)
    de = jnp.dot(hd, p["wd2"], precision=hp) + p["bd2"]
    h = jnp.maximum(jnp.dot(pe_i, p["wm1a"], precision=hp)
                    + jnp.dot(pe_j, p["wm1b"], precision=hp)
                    + jnp.dot(de, p["wm1c"], precision=hp) + p["bm1"], 0.0)
    msg = jnp.dot(h, p["wm2"], precision=hp) + p["bm2"]
    return jnp.zeros((x.shape[0], msg.shape[1]), jnp.float32).at[dst].add(msg)


def gcn_encoder_reference(x, pos, edge_index, batch, num_graphs, params):
    src, dst = edge_index[0], edge_index[1]
    h = jnp.maximum(_conv_ref(x, pos, src, dst, params["conv1"]), 0.0)
    h = jnp.maximum(_conv_ref(h, pos, src, dst, params["conv2"]), 0.0)
    pooled = jnp.zeros((num_graphs, h.shape[1]), jnp.float32).at[batch].add(h)
    rp = params["readout"]
    hr = jnp.dot(pooled, rp["w1"], precision="highest")
    hr = jnp.maximum(hr * rp["bn_scale"] + rp["bn_bias"], 0.0)
    return jnp.dot(hr, rp["w2"], precision="highest") + rp["b2"]


# ---------------------------------------------------------------------------
# Example
# ---------------------------------------------------------------------------
if __name__ == "__main__":
    key = jax.random.PRNGKey(0)
    kx, kp, kw = jax.random.split(key, 3)

    num_graphs = 2
    nodes_per_graph = 6
    N = num_graphs * nodes_per_graph

    # node features (pixel intensity) and 2-D positions
    x = jax.random.uniform(kx, (N, 1), jnp.float32)
    pos = jax.random.uniform(kp, (N, 2), jnp.float32) * 10.0

    # fully-connected (no self-loop) edges within each graph
    src_list, dst_list = [], []
    for g in range(num_graphs):
        for a in range(nodes_per_graph):
            for b in range(nodes_per_graph):
                if a != b:
                    src_list.append(g * nodes_per_graph + a)
                    dst_list.append(g * nodes_per_graph + b)
    edge_index = jnp.array([src_list, dst_list], dtype=jnp.int32)     # [2, 60]
    batch = jnp.array([g for g in range(num_graphs)
                       for _ in range(nodes_per_graph)], dtype=jnp.int32)

    params = init_params(kw)

    fwd = jax.jit(functools.partial(gcn_encoder_forward, num_graphs=num_graphs))
    out = fwd(x, pos, edge_index, batch, params=params)
    jax.block_until_ready(out)

    ref = gcn_encoder_reference(x, pos, edge_index, batch, num_graphs, params)
    err = float(jnp.max(jnp.abs(out - ref)))
    scale = float(jnp.max(jnp.abs(ref))) + 1e-6
    assert out.shape == (num_graphs, 8) and out.dtype == jnp.float32
    # bf16 MXU operands on the per-edge path (f32 accumulation, exact f32 distance path):
    # allow a few-percent max-norm deviation from the all-f32 'highest' reference.
    assert err <= 5e-2 * scale, f"mismatch: max|diff|={err}, scale={scale}"
    print("KERNEL_OK")
</pallas_src>

<mosaic_0001>
module attributes {stable_mosaic.version = 11 : i64} {
  func.func @_gcn_encoder_kernel(%arg0: i32, %arg1: i32, %arg2: memref<128x128xbf16, #tpu.memory_space<vmem>>, %arg3: memref<1024x1xi32, #tpu.memory_space<vmem>>, %arg4: memref<1x512xi32, #tpu.memory_space<vmem>>, %arg5: memref<1x128xi32, #tpu.memory_space<vmem>>, %arg6: memref<1x512x128xbf16, #tpu.memory_space<vmem>>, %arg7: memref<5x128x128xbf16, #tpu.memory_space<vmem>>, %arg8: memref<8x128xf32, #tpu.memory_space<vmem>>, %arg9: memref<2x128x128xf32, #tpu.memory_space<vmem>>, %arg10: memref<3x128xf32, #tpu.memory_space<vmem>>, %arg11: memref<2x128xf32, #tpu.memory_space<vmem>>, %arg12: memref<128x128xbf16, #tpu.memory_space<vmem>>, %arg13: memref<128x128xf32, #tpu.memory_space<vmem>>) attributes {dimension_semantics = [#tpu.dimension_semantics<arbitrary>, #tpu.dimension_semantics<arbitrary>], iteration_bounds = array<i64: 2, 1>, scalar_prefetch = 0 : i64, scratch_operands = 2 : i64, tpu.core_type = #tpu.core_type<tc>, window_params = [{pipeline_mode = #tpu.pipeline_mode<synchronous>, transform_indices = @transform_0, window_bounds = array<i64: 128, 128>}, {transform_indices = @transform_1, window_bounds = array<i64: 1024, 1>}, {transform_indices = @transform_2, window_bounds = array<i64: 1, 512>}, {pipeline_mode = #tpu.pipeline_mode<synchronous>, transform_indices = @transform_3, window_bounds = array<i64: 1, 128>}, {transform_indices = @transform_4, window_bounds = array<i64: 1, 512, 128>}, {transform_indices = @transform_5, window_bounds = array<i64: 5, 128, 128>}, {transform_indices = @transform_6, window_bounds = array<i64: 8, 128>}, {pipeline_mode = #tpu.pipeline_mode<synchronous>, transform_indices = @transform_7, window_bounds = array<i64: 2, 128, 128>}, {pipeline_mode = #tpu.pipeline_mode<synchronous>, transform_indices = @transform_8, window_bounds = array<i64: 3, 128>}, {pipeline_mode = #tpu.pipeline_mode<synchronous>, transform_indices = @transform_9, window_bounds = array<i64: 2, 128>}]} {
    %c0_i32 = arith.constant 0 : i32
    %0 = arith.cmpi eq, %arg0, %c0_i32 : i32
    %c0_i32_0 = arith.constant 0 : i32
    %1 = arith.cmpi eq, %arg1, %c0_i32_0 : i32
    %2 = arith.andi %0, %1 : i1
    %3 = arith.extui %2 : i1 to i32
    %c0_i32_1 = arith.constant 0 : i32
    %4 = arith.cmpi ne, %3, %c0_i32_1 : i32
    scf.if %4 {
      %c0_40 = arith.constant 0 : index
      %c0_41 = arith.constant 0 : index
      %74 = vector.load %arg2[%c0_40, %c0_41] : memref<128x128xbf16, #tpu.memory_space<vmem>>, vector<128x128xbf16>
      %c0_42 = arith.constant 0 : index
      %c0_43 = arith.constant 0 : index
      %75 = vector.load %arg12[%c0_42, %c0_43] : memref<128x128xbf16, #tpu.memory_space<vmem>>, vector<128x128xbf16>
      tpu.vector_store %arg12[%c0_42, %c0_43], %74 {strides = array<i32>} : memref<128x128xbf16, #tpu.memory_space<vmem>>, vector<128x128xbf16>,
      %cst_44 = arith.constant 0.000000e+00 : f32
      %76 = vector.broadcast %cst_44 : f32 to vector<128x128xf32>
      %c0_45 = arith.constant 0 : index
      %c0_46 = arith.constant 0 : index
      %77 = vector.load %arg13[%c0_45, %c0_46] : memref<128x128xf32, #tpu.memory_space<vmem>>, vector<128x128xf32>
      tpu.vector_store %arg13[%c0_45, %c0_46], %76 {strides = array<i32>} : memref<128x128xf32, #tpu.memory_space<vmem>>, vector<128x128xf32>,
      %cst_47 = arith.constant 0.000000e+00 : f32
      %78 = vector.broadcast %cst_47 : f32 to vector<2x128xf32>
      %c0_48 = arith.constant 0 : index
      %c0_49 = arith.constant 0 : index
      %79 = vector.load %arg11[%c0_48, %c0_49] : memref<2x128xf32, #tpu.memory_space<vmem>>, vector<2x128xf32>
      tpu.vector_store %arg11[%c0_48, %c0_49], %78 {strides = array<i32>} : memref<2x128xf32, #tpu.memory_space<vmem>>, vector<2x128xf32>,
    } else {
    }
    %c0 = arith.constant 0 : index
    %c0_2 = arith.constant 0 : index
    %c0_3 = arith.constant 0 : index
    %5 = vector.load %arg7[%c0, %c0_2, %c0_3] : memref<5x128x128xbf16, #tpu.memory_space<vmem>>, vector<1x128x128xbf16>
    %6 = vector.shape_cast %5 : vector<1x128x128xbf16> to vector<128x128xbf16>
    %c1 = arith.constant 1 : index
    %c0_4 = arith.constant 0 : index
    %c0_5 = arith.constant 0 : index
    %7 = vector.load %arg7[%c1, %c0_4, %c0_5] : memref<5x128x128xbf16, #tpu.memory_space<vmem>>, vector<1x128x128xbf16>
    %8 = vector.shape_cast %7 : vector<1x128x128xbf16> to vector<128x128xbf16>
    %c2 = arith.constant 2 : index
    %c0_6 = arith.constant 0 : index
    %c0_7 = arith.constant 0 : index
    %9 = vector.load %arg7[%c2, %c0_6, %c0_7] : memref<5x128x128xbf16, #tpu.memory_space<vmem>>, vector<1x128x128xbf16>
    %10 = vector.shape_cast %9 : vector<1x128x128xbf16> to vector<128x128xbf16>
    %c3 = arith.constant 3 : index
    %c0_8 = arith.constant 0 : index
    %c0_9 = arith.constant 0 : index
    %11 = vector.load %arg7[%c3, %c0_8, %c0_9] : memref<5x128x128xbf16, #tpu.memory_space<vmem>>, vector<1x128x128xbf16>
    %12 = vector.shape_cast %11 : vector<1x128x128xbf16> to vector<128x128xbf16>
    %c4 = arith.constant 4 : index
    %c0_10 = arith.constant 0 : index
    %c0_11 = arith.constant 0 : index
    %13 = vector.load %arg7[%c4, %c0_10, %c0_11] : memref<5x128x128xbf16, #tpu.memory_space<vmem>>, vector<1x128x128xbf16>
    %14 = vector.shape_cast %13 : vector<1x128x128xbf16> to vector<128x128xbf16>
    %c0_12 = arith.constant 0 : index
    %c0_13 = arith.constant 0 : index
    %15 = vector.load %arg8[%c0_12, %c0_13] : memref<8x128xf32, #tpu.memory_space<vmem>>, vector<8x128xf32>
    %16 = vector.extract_strided_slice %15 {offsets = [0, 0], sizes = [1, 128], strides = [1, 1]} : vector<8x128xf32> to vector<1x128xf32>
    %17 = vector.extract_strided_slice %15 {offsets = [1, 0], sizes = [1, 128], strides = [1, 1]} : vector<8x128xf32> to vector<1x128xf32>
    %18 = vector.extract_strided_slice %15 {offsets = [2, 0], sizes = [1, 128], strides = [1, 1]} : vector<8x128xf32> to vector<1x128xf32>
    %c0_14 = arith.constant 0 : index
    %c0_15 = arith.constant 0 : index
    %19 = vector.load %arg3[%c0_14, %c0_15] : memref<1024x1xi32, #tpu.memory_space<vmem>>, vector<1024x1xi32>
    %20 = tpu.iota {dimensions = array<i32: 1>} : vector<1024x128xi32>
    %21 = vector.broadcast %19 : vector<1024x1xi32> to vector<1024x128xi32>
    %22 = arith.cmpi eq, %20, %21 : vector<1024x128xi32>
    %23 = arith.extui %22 : vector<1024x128xi1> to vector<1024x128xi32>
    %24 = arith.sitofp %23 : vector<1024x128xi32> to vector<1024x128xf32>
    %25 = arith.truncf %24 : vector<1024x128xf32> to vector<1024x128xbf16>
    %26 = tpu.iota {dimensions = array<i32: 0>} : vector<128x512xi32>
    %c0_16 = arith.constant 0 : index
    %c0_17 = arith.constant 0 : index
    %27 = vector.load %arg4[%c0_16, %c0_17] : memref<1x512xi32, #tpu.memory_space<vmem>>, vector<1x512xi32>
    %28 = vector.broadcast %27 : vector<1x512xi32> to vector<128x512xi32>
    %29 = arith.cmpi eq, %26, %28 : vector<128x512xi32>
    %30 = arith.extui %29 : vector<128x512xi1> to vector<128x512xi32>
    %31 = arith.sitofp %30 : vector<128x512xi32> to vector<128x512xf32>
    %32 = arith.truncf %31 : vector<128x512xf32> to vector<128x512xbf16>
    %c0_18 = arith.constant 0 : index
    %c0_19 = arith.constant 0 : index
    %33 = vector.load %arg12[%c0_18, %c0_19] : memref<128x128xbf16, #tpu.memory_space<vmem>>, vector<128x128xbf16>
    %cst = arith.constant dense<0.000000e+00> : vector<1024x128xf32>
    %34 = tpu.matmul %25, %33, %cst {dimension_numbers = #tpu.dot_dimension_numbers<[1], [0], [0], [1], [0, 0, 1, 1], [], []>} : vector<1024x128xbf16>, vector<128x128xbf16>, vector<1024x128xf32> -> vector<1024x128xf32>
    %35 = arith.truncf %34 : vector<1024x128xf32> to vector<1024x128xbf16>
    %cst_20 = arith.constant dense<0.000000e+00> : vector<1024x128xf32>
    %36 = tpu.matmul %35, %6, %cst_20 {dimension_numbers = #tpu.dot_dimension_numbers<[1], [0], [0], [1], [0, 0, 1, 1], [], []>} : vector<1024x128xbf16>, vector<128x128xbf16>, vector<1024x128xf32> -> vector<1024x128xf32>
    %37 = vector.broadcast %16 : vector<1x128xf32> to vector<1024x128xf32>
    %38 = arith.addf %36, %37 : vector<1024x128xf32>
    %cst_21 = arith.constant 0.000000e+00 : f32
    %39 = vector.broadcast %cst_21 : f32 to vector<1024x128xf32>
    %40 = arith.maximumf %38, %39 : vector<1024x128xf32>
    %41 = arith.truncf %40 : vector<1024x128xf32> to vector<1024x128xbf16>
    %42 = vector.extract_strided_slice %41 {offsets = [0, 0], sizes = [512, 128], strides = [1, 1]} : vector<1024x128xbf16> to vector<512x128xbf16>
    %43 = vector.extract_strided_slice %41 {offsets = [512, 0], sizes = [512, 128], strides = [1, 1]} : vector<1024x128xbf16> to vector<512x128xbf16>
    %cst_22 = arith.constant dense<0.000000e+00> : vector<512x128xf32>
    %44 = tpu.matmul %42, %8, %cst_22 {dimension_numbers = #tpu.dot_dimension_numbers<[1], [0], [0], [1], [0, 0, 1, 1], [], []>} : vector<512x128xbf16>, vector<128x128xbf16>, vector<512x128xf32> -> vector<512x128xf32>
    %cst_23 = arith.constant dense<0.000000e+00> : vector<512x128xf32>
    %45 = tpu.matmul %43, %10, %cst_23 {dimension_numbers = #tpu.dot_dimension_numbers<[1], [0], [0], [1], [0, 0, 1, 1], [], []>} : vector<512x128xbf16>, vector<128x128xbf16>, vector<512x128xf32> -> vector<512x128xf32>
    %46 = arith.addf %44, %45 : vector<512x128xf32>
    %c0_24 = arith.constant 0 : index
    %c0_25 = arith.constant 0 : index
    %c0_26 = arith.constant 0 : index
    %47 = vector.load %arg6[%c0_24, %c0_25, %c0_26] : memref<1x512x128xbf16, #tpu.memory_space<vmem>>, vector<1x512x128xbf16>
    %48 = vector.shape_cast %47 : vector<1x512x128xbf16> to vector<512x128xbf16>
    %cst_27 = arith.constant dense<0.000000e+00> : vector<512x128xf32>
    %49 = tpu.matmul %48, %12, %cst_27 {dimension_numbers = #tpu.dot_dimension_numbers<[1], [0], [0], [1], [0, 0, 1, 1], [], []>} : vector<512x128xbf16>, vector<128x128xbf16>, vector<512x128xf32> -> vector<512x128xf32>
    %50 = arith.addf %46, %49 : vector<512x128xf32>
    %51 = vector.broadcast %17 : vector<1x128xf32> to vector<512x128xf32>
    %52 = arith.addf %50, %51 : vector<512x128xf32>
    %cst_28 = arith.constant 0.000000e+00 : f32
    %53 = vector.broadcast %cst_28 : f32 to vector<512x128xf32>
    %54 = arith.maximumf %52, %53 : vector<512x128xf32>
    %55 = arith.truncf %54 : vector<512x128xf32> to vector<512x128xbf16>
    %cst_29 = arith.constant dense<0.000000e+00> : vector<512x128xf32>
    %56 = tpu.matmul %55, %14, %cst_29 {dimension_numbers = #tpu.dot_dimension_numbers<[1], [0], [0], [1], [0, 0, 1, 1], [], []>} : vector<512x128xbf16>, vector<128x128xbf16>, vector<512x128xf32> -> vector<512x128xf32>
    %57 = vector.broadcast %18 : vector<1x128xf32> to vector<512x128xf32>
    %58 = arith.addf %56, %57 : vector<512x128xf32>
    %59 = arith.truncf %58 : vector<512x128xf32> to vector<512x128xbf16>
    %c0_30 = arith.constant 0 : index
    %c0_31 = arith.constant 0 : index
    %60 = vector.load %arg13[%c0_30, %c0_31] : memref<128x128xf32, #tpu.memory_space<vmem>>, vector<128x128xf32>
    %cst_32 = arith.constant dense<0.000000e+00> : vector<128x128xf32>
    %61 = tpu.matmul %32, %59, %cst_32 {dimension_numbers = #tpu.dot_dimension_numbers<[1], [0], [0], [1], [0, 0, 1, 1], [], []>} : vector<128x512xbf16>, vector<512x128xbf16>, vector<128x128xf32> -> vector<128x128xf32>
    %62 = arith.addf %60, %61 : vector<128x128xf32>
    %c0_33 = arith.constant 0 : index
    %c0_34 = arith.constant 0 : index
    %63 = vector.load %arg13[%c0_33, %c0_34] : memref<128x128xf32, #tpu.memory_space<vmem>>, vector<128x128xf32>
    tpu.vector_store %arg13[%c0_33, %c0_34], %62 {strides = array<i32>} : memref<128x128xf32, #tpu.memory_space<vmem>>, vector<128x128xf32>,
    %c0_i32_35 = arith.constant 0 : i32
    %64 = arith.cmpi eq, %arg1, %c0_i32_35 : i32
    %c0_i32_36 = arith.constant 0 : i32
    %65 = arith.cmpi eq, %arg0, %c0_i32_36 : i32
    %66 = arith.andi %64, %65 : i1
    %67 = arith.extui %66 : i1 to i32
    %c0_i32_37 = arith.constant 0 : i32
    %68 = arith.cmpi ne, %67, %c0_i32_37 : i32
    scf.if %68 {
      %c0_40 = arith.constant 0 : index
      %c0_41 = arith.constant 0 : index
      %74 = vector.load %arg13[%c0_40, %c0_41] : memref<128x128xf32, #tpu.memory_space<vmem>>, vector<128x128xf32>
      %cst_42 = arith.constant 0.000000e+00 : f32
      %75 = vector.broadcast %cst_42 : f32 to vector<128x128xf32>
      %76 = arith.maximumf %74, %75 : vector<128x128xf32>
      %77 = arith.truncf %76 : vector<128x128xf32> to vector<128x128xbf16>
      %c0_43 = arith.constant 0 : index
      %c0_44 = arith.constant 0 : index
      %78 = vector.load %arg12[%c0_43, %c0_44] : memref<128x128xbf16, #tpu.memory_space<vmem>>, vector<128x128xbf16>
      tpu.vector_store %arg12[%c0_43, %c0_44], %77 {strides = array<i32>} : memref<128x128xbf16, #tpu.memory_space<vmem>>, vector<128x128xbf16>,
      %cst_45 = arith.constant 0.000000e+00 : f32
      %79 = vector.broadcast %cst_45 : f32 to vector<128x128xf32>
      %c0_46 = arith.constant 0 : index
      %c0_47 = arith.constant 0 : index
      %80 = vector.load %arg13[%c0_46, %c0_47] : memref<128x128xf32, #tpu.memory_space<vmem>>, vector<128x128xf32>
      tpu.vector_store %arg13[%c0_46, %c0_47], %79 {strides = array<i32>} : memref<128x128xf32, #tpu.memory_space<vmem>>, vector<128x128xf32>,
    } else {
    }
    %c0_i32_38 = arith.constant 0 : i32
    %69 = arith.cmpi eq, %arg1, %c0_i32_38 : i32
    %c1_i32 = arith.constant 1 : i32
    %70 = arith.cmpi eq, %arg0, %c1_i32 : i32
    %71 = arith.andi %69, %70 : i1
    %72 = arith.extui %71 : i1 to i32
    %c0_i32_39 = arith.constant 0 : i32
    %73 = arith.cmpi ne, %72, %c0_i32_39 : i32
    scf.if %73 {
      %c0_40 = arith.constant 0 : index
      %c0_41 = arith.constant 0 : index
      %74 = vector.load %arg13[%c0_40, %c0_41] : memref<128x128xf32, #tpu.memory_space<vmem>>, vector<128x128xf32>
      %cst_42 = arith.constant 0.000000e+00 : f32
      %75 = vector.broadcast %cst_42 : f32 to vector<128x128xf32>
      %76 = arith.maximumf %74, %75 : vector<128x128xf32>
      %77 = tpu.iota {dimensions = array<i32: 0>} : vector<2x128xi32>
      %c0_43 = arith.constant 0 : index
      %c0_44 = arith.constant 0 : index
      %78 = vector.load %arg5[%c0_43, %c0_44] : memref<1x128xi32, #tpu.memory_space<vmem>>, vector<1x128xi32>
      %79 = vector.broadcast %78 : vector<1x128xi32> to vector<2x128xi32>
      %80 = arith.cmpi eq, %77, %79 : vector<2x128xi32>
      %81 = arith.extui %80 : vector<2x128xi1> to vector<2x128xi32>
      %82 = arith.sitofp %81 : vector<2x128xi32> to vector<2x128xf32>
      %cst_45 = arith.constant dense<0.000000e+00> : vector<2x128xf32>
      %83 = tpu.matmul %82, %76, %cst_45 {dimension_numbers = #tpu.dot_dimension_numbers<[1], [0], [0], [1], [0, 0, 1, 1], [], []>} : vector<2x128xf32>, vector<128x128xf32>, vector<2x128xf32> -> vector<2x128xf32>
      %c0_46 = arith.constant 0 : index
      %c0_47 = arith.constant 0 : index
      %84 = vector.load %arg10[%c0_46, %c0_47] : memref<3x128xf32, #tpu.memory_space<vmem>>, vector<3x128xf32>
      %c0_48 = arith.constant 0 : index
      %c0_49 = arith.constant 0 : index
      %c0_50 = arith.constant 0 : index
      %85 = vector.load %arg9[%c0_48, %c0_49, %c0_50] : memref<2x128x128xf32, #tpu.memory_space<vmem>>, vector<1x128x128xf32>
      %86 = vector.shape_cast %85 : vector<1x128x128xf32> to vector<128x128xf32>
      %cst_51 = arith.constant dense<0.000000e+00> : vector<2x128xf32>
      %87 = tpu.matmul %83, %86, %cst_51 {dimension_numbers = #tpu.dot_dimension_numbers<[1], [0], [0], [1], [0, 0, 1, 1], [], []>} : vector<2x128xf32>, vector<128x128xf32>, vector<2x128xf32> -> vector<2x128xf32>
      %88 = vector.extract_strided_slice %84 {offsets = [0, 0], sizes = [1, 128], strides = [1, 1]} : vector<3x128xf32> to vector<1x128xf32>
      %89 = vector.broadcast %88 : vector<1x128xf32> to vector<2x128xf32>
      %90 = arith.mulf %87, %89 : vector<2x128xf32>
      %91 = vector.extract_strided_slice %84 {offsets = [1, 0], sizes = [1, 128], strides = [1, 1]} : vector<3x128xf32> to vector<1x128xf32>
      %92 = vector.broadcast %91 : vector<1x128xf32> to vector<2x128xf32>
      %93 = arith.addf %90, %92 : vector<2x128xf32>
      %cst_52 = arith.constant 0.000000e+00 : f32
      %94 = vector.broadcast %cst_52 : f32 to vector<2x128xf32>
      %95 = arith.maximumf %93, %94 : vector<2x128xf32>
      %c1_53 = arith.constant 1 : index
      %c0_54 = arith.constant 0 : index
      %c0_55 = arith.constant 0 : index
      %96 = vector.load %arg9[%c1_53, %c0_54, %c0_55] : memref<2x128x128xf32, #tpu.memory_space<vmem>>, vector<1x128x128xf32>
      %97 = vector.shape_cast %96 : vector<1x128x128xf32> to vector<128x128xf32>
      %cst_56 = arith.constant dense<0.000000e+00> : vector<2x128xf32>
      %98 = tpu.matmul %95, %97, %cst_56 {dimension_numbers = #tpu.dot_dimension_numbers<[1], [0], [0], [1], [0, 0, 1, 1], [], []>} : vector<2x128xf32>, vector<128x128xf32>, vector<2x128xf32> -> vector<2x128xf32>
      %99 = vector.extract_strided_slice %84 {offsets = [2, 0], sizes = [1, 128], strides = [1, 1]} : vector<3x128xf32> to vector<1x128xf32>
      %100 = vector.broadcast %99 : vector<1x128xf32> to vector<2x128xf32>
      %101 = arith.addf %98, %100 : vector<2x128xf32>
      %c0_57 = arith.constant 0 : index
      %c0_58 = arith.constant 0 : index
      %102 = vector.load %arg11[%c0_57, %c0_58] : memref<2x128xf32, #tpu.memory_space<vmem>>, vector<2x128xf32>
      tpu.vector_store %arg11[%c0_57, %c0_58], %101 {strides = array<i32>} : memref<2x128xf32, #tpu.memory_space<vmem>>, vector<2x128xf32>,
    } else {
    }
    return
  }
  func.func @transform_0(%arg0: i32, %arg1: i32) -> (i32, i32) {
    %c0_i32 = arith.constant 0 : i32
    %c0_i32_0 = arith.constant 0 : i32
    %c0_i32_1 = arith.constant 0 : i32
    return %c0_i32, %c0_i32_0 : i32, i32
  }
  func.func @transform_1(%arg0: i32, %arg1: i32) -> (i32, i32) {
    %c0_i32 = arith.constant 0 : i32
    %c0_i32_0 = arith.constant 0 : i32
    return %arg1, %c0_i32 : i32, i32
  }
  func.func @transform_2(%arg0: i32, %arg1: i32) -> (i32, i32) {
    %c0_i32 = arith.constant 0 : i32
    %c0_i32_0 = arith.constant 0 : i32
    return %c0_i32, %arg1 : i32, i32
  }
  func.func @transform_3(%arg0: i32, %arg1: i32) -> (i32, i32) {
    %c0_i32 = arith.constant 0 : i32
    %c0_i32_0 = arith.constant 0 : i32
    %c0_i32_1 = arith.constant 0 : i32
    return %c0_i32, %c0_i32_0 : i32, i32
  }
  func.func @transform_4(%arg0: i32, %arg1: i32) -> (i32, i32, i32) {
    %c0_i32 = arith.constant 0 : i32
    %c0_i32_0 = arith.constant 0 : i32
    return %arg0, %arg1, %c0_i32 : i32, i32, i32
  }
  func.func @transform_5(%arg0: i32, %arg1: i32) -> (i32, i32, i32) {
    %c0_i32 = arith.constant 0 : i32
    %c0_i32_0 = arith.constant 0 : i32
    %c0_i32_1 = arith.constant 0 : i32
    return %arg0, %c0_i32, %c0_i32_0 : i32, i32, i32
  }
  func.func @transform_6(%arg0: i32, %arg1: i32) -> (i32, i32) {
    %c0_i32 = arith.constant 0 : i32
    %c0_i32_0 = arith.constant 0 : i32
    return %arg0, %c0_i32 : i32, i32
  }
  func.func @transform_7(%arg0: i32, %arg1: i32) -> (i32, i32, i32) {
    %c0_i32 = arith.constant 0 : i32
    %c0_i32_0 = arith.constant 0 : i32
    %c0_i32_1 = arith.constant 0 : i32
    %c0_i32_2 = arith.constant 0 : i32
    return %c0_i32, %c0_i32_0, %c0_i32_1 : i32, i32, i32
  }
  func.func @transform_8(%arg0: i32, %arg1: i32) -> (i32, i32) {
    %c0_i32 = arith.constant 0 : i32
    %c0_i32_0 = arith.constant 0 : i32
    %c0_i32_1 = arith.constant 0 : i32
    return %c0_i32, %c0_i32_0 : i32, i32
  }
  func.func @transform_9(%arg0: i32, %arg1: i32) -> (i32, i32) {
    %c0_i32 = arith.constant 0 : i32
    %c0_i32_0 = arith.constant 0 : i32
    %c0_i32_1 = arith.constant 0 : i32
    return %c0_i32, %c0_i32_0 : i32, i32
  }
}

</mosaic_0001>

<bundles_post_ra>
// kernel: gcn_encoder_forward.1
= control target key start
LH: loop header
LB: loop body
LE: loop exit
PB: predicated region body
PF: predicated region fallthrough
CT: control target
= control target key end

     0   :  { %14 = vsyncpa [#allocation5], 0  ;;  %s7984_s30 = smov 0   ;;  %s7986_s10 = smov 0   ;;  %s10204_s0 = inlined_call_operand.vmem [shape: bf16[128,128], index: 0, kind: input, shape index: {}]   ;;  %s10205_s1 = inlined_call_operand.vmem [shape: s32[1024,1], index: 1, kind: input, shape index: {}]   ;;  %s10206_s2 = inlined_call_operand.vmem [shape: s32[1,512], index: 2, kind: input, shape index: {}]   ;;  %s10207_s3 = inlined_call_operand.vmem [shape: s32[1,128], index: 3, kind: input, shape index: {}]   ;;  %s10208_s4 = inlined_call_operand.vmem [shape: bf16[2,512,128], index: 4, kind: input, shape index: {}]   ;;  %s10209_s5 = inlined_call_operand.vmem [shape: bf16[10,128,128], index: 5, kind: input, shape index: {}]   ;;  %s10210_s6 = inlined_call_operand.vmem [shape: f32[16,128], index: 6, kind: input, shape index: {}]   ;;  %s10211_s7 = inlined_call_operand.vmem [shape: f32[2,128,128], index: 7, kind: input, shape index: {}]   ;;  %s10212_s8 = inlined_call_operand.vmem [shape: f32[3,128], index: 8, kind: input, shape index: {}]   ;;  %s10213_s9 = inlined_call_operand.hbm [shape: f32[2,128], index: 9, kind: output, shape index: {}]  }
   0x1   :  { %s7988_s11 = smov 0  }
   0x2 LB: > { %s5910_s12 = sadd.s32 4294967295, %s7924_s11   ;;  %s32_s13 = sadd.s32 1, %s7920_s10  ;;  %s7924_s11 = sphi %s7988_s11, %s20_s11   ;;  %s7920_s10 = sphi %s7986_s10, %s10385_s10   ;;  %s7916_s30 = sphi %s7984_s30, %s10384_s30  }
   0x3   : > { %p34_p0 = scmp.ge.s32.totalorder %s32_s13, 2  ;;  %p5915_p1 = scmp.ge.s32.totalorder %s7924_s11, 1 }
   0x4   : > { %p344_p2 = scmp.lt.s32.totalorder %s7924_s11, 3 }
   0x5   : > { %s10387_s13 = smov (%p34_p0, %s32_s13), 0 }
   0x6   : > { %p345_p3 = pnand %p5915_p1, %p344_p2 }
   0x8   : > { %348 = sbr.rel (%p345_p3) target bundleno = 2305 (0x901), region = 56 }
   0xd   : > { %p410_p4 = scmp.lt.s32.totalorder %s7916_s30, 1  ;;  %s419_s14 = smul.u32 5, %s7916_s30 }
   0xe   : > { %p431_p5 = scmp.eq.s32.totalorder %s7916_s30, 0 }
   0xf   : > { %s411_s15 = scalar_select %p410_p4, %s7916_s30, 1  ;;  %v437_v0 = vld [vmem:[%s10204_s0] sm:$0xff] (%p431_p5)   ;;  %v439_v1 = vld [vmem:[%s10204_s0 + $0x8] sm:$0xff] (%p431_p5)   ;;  %v441_v2 = vld [vmem:[%s10204_s0 + $0x10] sm:$0xff] (%p431_p5)   ;;  %v7926_v6 = vmov (%p431_p5), 0.0  }
  0x10   : > { %p420_p6 = scmp.lt.s32.totalorder %s419_s14, 9  ;;  %453 = vst [vmem:[#allocation2] sm:$0xff] (%p431_p5), %v437_v0   ;;  %455 = vst [vmem:[#allocation2 + $0x8] sm:$0xff] (%p431_p5), %v439_v1   ;;  %v443_v3 = vld [vmem:[%s10204_s0 + $0x18] sm:$0xff] (%p431_p5)   ;;  %v445_v4 = vld [vmem:[%s10204_s0 + $0x20] sm:$0xff] (%p431_p5)  }
  0x11   : > { %s6490_s16 = sshll.u32 %s411_s15, 8  ;;  %s5920_s17 = sshll.u32 %s411_s15, 3  ;;  %457 = vst [vmem:[#allocation2 + $0x10] sm:$0xff] (%p431_p5), %v441_v2   ;;  %v447_v5 = vld [vmem:[%s10204_s0 + $0x28] sm:$0xff] (%p431_p5)   ;;  %469 = vst [vmem:[#allocation3 + $0x30] sm:$0xff] (%p431_p5), %v7926_v6  ;;  %v449_v7 = vld [vmem:[%s10204_s0 + $0x30] sm:$0xff] (%p431_p5)  }
  0x12   : > { %s8012_s20 = scalar_lea.vmem %s10208_s4, %s6490_s16  ;;  %s8017_s23 = scalar_lea.vmem %s10210_s6, %s5920_s17  ;;  %470 = vst [vmem:[#allocation3] sm:$0xff] (%p431_p5), %v7926_v6  ;;  %471 = vst [vmem:[#allocation3 + $0x58] sm:$0xff] (%p431_p5), %v7926_v6  ;;  %v451_v8 = vld [vmem:[%s10204_s0 + $0x38] sm:$0xff] (%p431_p5)  }
  0x13   : > { %s10389_s14 = smov (!%p420_p6, %s419_s14), 9  ;;  %436 = sbr.rel (!%p431_p5) target bundleno = 29 (0x1d), region = 60  ;;  %472 = vst [vmem:[#allocation3 + $0x18] sm:$0xff] (%p431_p5), %v7926_v6  ;;  %473 = vst [vmem:[#allocation3 + $0x50] sm:$0xff] (%p431_p5), %v7926_v6 }
  0x14   : > { %s6491_s24 = sshll.u32 %s10389_s14, 6  ;;  %474 = vst [vmem:[#allocation3 + $0x68] sm:$0xff] (%p431_p5), %v7926_v6  ;;  %475 = vst [vmem:[#allocation3 + $0x8] sm:$0xff] (%p431_p5), %v7926_v6 }
  0x15   : > { %s8022_s27 = scalar_lea.vmem %s10209_s5, %s6491_s24  ;;  %476 = vst [vmem:[#allocation3 + $0x48] sm:$0xff] (%p431_p5), %v7926_v6  ;;  %477 = vst [vmem:[#allocation3 + $0x40] sm:$0xff] (%p431_p5), %v7926_v6 }
  0x16   : > { %478 = vst [vmem:[#allocation3 + $0x20] sm:$0xff] (%p431_p5), %v7926_v6  ;;  %479 = vst [vmem:[#allocation3 + $0x10] sm:$0xff] (%p431_p5), %v7926_v6 }
  0x17   : > { %480 = vst [vmem:[#allocation3 + $0x38] sm:$0xff] (%p431_p5), %v7926_v6  ;;  %481 = vst [vmem:[#allocation3 + $0x60] sm:$0xff] (%p431_p5), %v7926_v6 }
  0x18   : > { %482 = vst [vmem:[#allocation3 + $0x70] sm:$0xff] %v7926_v6  ;;  %483 = vst [vmem:[#allocation3 + $0x78] sm:$0xff] %v7926_v6 }
  0x19   : > { %484 = vst [vmem:[#allocation3 + $0x28] sm:$0xff] %v7926_v6  ;;  %485 = vst [vmem:[#allocation4] sm:$0x3] %v7926_v6 }
  0x1a   : > { %459 = vst [vmem:[#allocation2 + $0x18] sm:$0xff] %v443_v3   ;;  %461 = vst [vmem:[#allocation2 + $0x20] sm:$0xff] %v445_v4  }
  0x1b   : > { %463 = vst [vmem:[#allocation2 + $0x28] sm:$0xff] %v447_v5   ;;  %465 = vst [vmem:[#allocation2 + $0x30] sm:$0xff] %v449_v7  }
  0x1c   : > { %467 = vst [vmem:[#allocation2 + $0x38] sm:$0xff] %v451_v8  }
  0x1d PF: > { %v573_v9 = vld [vmem:[%s10205_s1 + $0x10] sm:$0xff]  ;;  %v571_v10 = vld [vmem:[%s10205_s1] sm:$0xff]  ;;  %v7927_v11 = vmov 0   ;;  %v574_v12 = vld [vmem:[%s10205_s1 + $0x18] sm:$0xff] }
  0x1e   : > { %7792 = vset.pattern.permute.xlu1 %v7927_v11  ;;  %7791 = vset.pattern.permute.xlu0 %v7927_v11  ;;  %v572_v13 = vld [vmem:[%s10205_s1 + $0x8] sm:$0xff]  ;;  %v575_v15 = vld [vmem:[%s10205_s1 + $0x20] sm:$0xff]  ;;  %v578_v16 = vld [vmem:[%s10205_s1 + $0x38] sm:$0xff] }
  0x1f   : > { %708 = vperm.xlu1 %7792, %v573_v9   ;;  %702 = vperm.xlu0 %7791, %v571_v10   ;;  %v576_v14 = vld [vmem:[%s10205_s1 + $0x28] sm:$0xff]  ;;  %v577_v17 = vld [vmem:[%s10205_s1 + $0x30] sm:$0xff]  ;;  %v579_v19 = vld [vmem:[%s10205_s1 + $0x40] sm:$0xff] }
  0x20   : > { %v580_v18 = vld [vmem:[%s10205_s1 + $0x48] sm:$0xff]  ;;  %v582_v21 = vld [vmem:[%s10205_s1 + $0x58] sm:$0xff]  ;;  %v581_v22 = vld [vmem:[%s10205_s1 + $0x50] sm:$0xff] }
  0x21   : > { %v584_v25 = vld [vmem:[%s10205_s1 + $0x68] sm:$0xff]  ;;  %v583_v26 = vld [vmem:[%s10205_s1 + $0x60] sm:$0xff]  ;;  %v586_v28 = vld [vmem:[%s10205_s1 + $0x78] sm:$0xff] }
  0x22   : > { %v7794_v23 = vld [vmem:[#allocation2 + $0x30] sm:$0xff]   ;;  %v7795_v24 = vld [vmem:[#allocation2 + $0x28] sm:$0xff]   ;;  %v7796_v27 = vld [vmem:[#allocation2 + $0x20] sm:$0xff]  }
  0x23   : > { %711 = vperm.xlu1 %7792, %v574_v12   ;;  %705 = vperm.xlu0 %7791, %v572_v13   ;;  %v7793_v20 = vld [vmem:[#allocation2 + $0x38] sm:$0xff]   ;;  %v585_v29 = vld [vmem:[%s10205_s1 + $0x70] sm:$0xff]  ;;  %v588_v31 = vld [vmem:[%s10205_s1 + $0x88] sm:$0xff] }
  0x24   : > { %7040 = vmatprep.subr.bf16.mxu0 %v7793_v20  ;;  %v7797_v30 = vld [vmem:[#allocation2 + $0x18] sm:$0xff]   ;;  %v587_v32 = vld [vmem:[%s10205_s1 + $0x80] sm:$0xff]  ;;  %v7798_v33 = vld [vmem:[#allocation2 + $0x10] sm:$0xff]  }
  0x25   : > { %7041 = vmatpush3.bf16.msra.mxu0 %v7793_v20  ;;  %v590_v34 = vld [vmem:[%s10205_s1 + $0x98] sm:$0xff]  ;;  %v589_v35 = vld [vmem:[%s10205_s1 + $0x90] sm:$0xff]  ;;  %v7799_v36 = vld [vmem:[#allocation2 + $0x8] sm:$0xff]  }
  0x26   : > { %7042 = vmatprep.subr.bf16.mxu0 %v7794_v23  ;;  %v592_v37 = vld [vmem:[%s10205_s1 + $0xa8] sm:$0xff]  ;;  %v591_v38 = vld [vmem:[%s10205_s1 + $0xa0] sm:$0xff]  ;;  %v594_v40 = vld [vmem:[%s10205_s1 + $0xb8] sm:$0xff] }
  0x27   : > { %717 = vperm.xlu1 %7792, %v576_v14   ;;  %714 = vperm.xlu0 %7791, %v575_v15   ;;  %v7800_v39 = vld [vmem:[#allocation2] sm:$0xff]   ;;  %v593_v41 = vld [vmem:[%s10205_s1 + $0xb0] sm:$0xff]  ;;  %v596_v42 = vld [vmem:[%s10205_s1 + $0xc8] sm:$0xff] }
  0x28   : > { %v595_v43 = vld [vmem:[%s10205_s1 + $0xc0] sm:$0xff]  ;;  %v598_v44 = vld [vmem:[%s10205_s1 + $0xd8] sm:$0xff]  ;;  %v597_v45 = vld [vmem:[%s10205_s1 + $0xd0] sm:$0xff] }
  0x29   : > { %7043 = vmatpush3.bf16.msra.mxu0 %v7794_v23  ;;  %v600_v46 = vld [vmem:[%s10205_s1 + $0xe8] sm:$0xff]  ;;  %v599_v47 = vld [vmem:[%s10205_s1 + $0xe0] sm:$0xff]  ;;  %v602_v48 = vld [vmem:[%s10205_s1 + $0xf8] sm:$0xff] }
  0x2a   : > { %7044 = vmatprep.subr.bf16.mxu0 %v7795_v24  ;;  %v601_v49 = vld [vmem:[%s10205_s1 + $0xf0] sm:$0xff]  ;;  %v604_v50 = vld [vmem:[%s10205_s1 + $0x108] sm:$0xff]  ;;  %v603_v51 = vld [vmem:[%s10205_s1 + $0x100] sm:$0xff] }
  0x2b   : > { %723 = vperm.xlu1 %7792, %v578_v16   ;;  %720 = vperm.xlu0 %7791, %v577_v17   ;;  %v606_v52 = vld [vmem:[%s10205_s1 + $0x118] sm:$0xff]  ;;  %v605_v53 = vld [vmem:[%s10205_s1 + $0x110] sm:$0xff]  ;;  %v608_v54 = vld [vmem:[%s10205_s1 + $0x128] sm:$0xff]  ;;  %v699_v16 = vlaneseq }
  0x2c   : > { %v607_v55 = vld [vmem:[%s10205_s1 + $0x120] sm:$0xff]  ;;  %v610_v56 = vld [vmem:[%s10205_s1 + $0x138] sm:$0xff]  ;;  %v609_v57 = vld [vmem:[%s10205_s1 + $0x130] sm:$0xff] }
  0x2d   : > { %7045 = vmatpush3.bf16.msra.mxu0 %v7795_v24  ;;  %v612_v58 = vld [vmem:[%s10205_s1 + $0x148] sm:$0xff]  ;;  %v611_v59 = vld [vmem:[%s10205_s1 + $0x140] sm:$0xff]  ;;  %v614_v60 = vld [vmem:[%s10205_s1 + $0x158] sm:$0xff] }
  0x2e   : > { %7046 = vmatprep.subr.bf16.mxu0 %v7796_v27  ;;  %v613_v61 = vld [vmem:[%s10205_s1 + $0x150] sm:$0xff]  ;;  %v616_v62 = vld [vmem:[%s10205_s1 + $0x168] sm:$0xff]  ;;  %v615_v63 = vld [vmem:[%s10205_s1 + $0x160] sm:$0xff] }
  0x2f   : > { %729 = vperm.xlu1 %7792, %v580_v18   ;;  %726 = vperm.xlu0 %7791, %v579_v19   ;;  %v618_v0 = vld [vmem:[%s10205_s1 + $0x178] sm:$0xff]  ;;  %v617_v1 = vld [vmem:[%s10205_s1 + $0x170] sm:$0xff]  ;;  %v620_v2 = vld [vmem:[%s10205_s1 + $0x188] sm:$0xff] }
  0x30   : > { %v619_v3 = vld [vmem:[%s10205_s1 + $0x180] sm:$0xff]  ;;  %v622_v4 = vld [vmem:[%s10205_s1 + $0x198] sm:$0xff]  ;;  %v621_v5 = vld [vmem:[%s10205_s1 + $0x190] sm:$0xff] }
  0x31   : > { %7047 = vmatpush3.bf16.msra.mxu0 %v7796_v27  ;;  %v624_v6 = vld [vmem:[%s10205_s1 + $0x1a8] sm:$0xff]  ;;  %v623_v7 = vld [vmem:[%s10205_s1 + $0x1a0] sm:$0xff]  ;;  %v626_v8 = vld [vmem:[%s10205_s1 + $0x1b8] sm:$0xff] }
  0x32   : > { %7048 = vmatprep.subr.bf16.mxu0 %v7797_v30  ;;  %v625_v9 = vld [vmem:[%s10205_s1 + $0x1b0] sm:$0xff]  ;;  %v628_v10 = vld [vmem:[%s10205_s1 + $0x1c8] sm:$0xff]  ;;  %v627_v11 = vld [vmem:[%s10205_s1 + $0x1c0] sm:$0xff] }
  0x33   : > { %735 = vperm.xlu1 %7792, %v582_v21   ;;  %732 = vperm.xlu0 %7791, %v581_v22   ;;  %v630_v12 = vld [vmem:[%s10205_s1 + $0x1d8] sm:$0xff]  ;;  %v629_v13 = vld [vmem:[%s10205_s1 + $0x1d0] sm:$0xff]  ;;  %v632_v14 = vld [vmem:[%s10205_s1 + $0x1e8] sm:$0xff]  ;;  %v8243_v21 = vand.u32 127, %v699_v16 }
  0x34   : > { %v631_v15 = vld [vmem:[%s10205_s1 + $0x1e0] sm:$0xff]  ;;  %v634_v17 = vld [vmem:[%s10205_s1 + $0x1f8] sm:$0xff]  ;;  %v633_v18 = vld [vmem:[%s10205_s1 + $0x1f0] sm:$0xff] }
  0x35   : > { %7049 = vmatpush3.bf16.msra.mxu0 %v7797_v30  ;;  %v636_v22 = vld [vmem:[%s10205_s1 + $0x208] sm:$0xff]  ;;  %v635_v23 = vld [vmem:[%s10205_s1 + $0x200] sm:$0xff]  ;;  %v637_v27 = vld [vmem:[%s10205_s1 + $0x210] sm:$0xff] }
  0x36   : > { %7050 = vmatprep.subr.bf16.mxu0 %v7798_v33 }
  0x37   : > { %741 = vperm.xlu1 %7792, %v584_v25   ;;  %738 = vperm.xlu0 %7791, %v583_v26   ;;  %v638_v26 = vld [vmem:[%s10205_s1 + $0x218] sm:$0xff] }
  0x39   : > { %7051 = vmatpush3.bf16.msra.mxu0 %v7798_v33 }
  0x3a   : > { %7052 = vmatprep.subr.bf16.mxu0 %v7799_v36 }
  0x3b   : > { %747 = vperm.xlu1 %7792, %v586_v28   ;;  %744 = vperm.xlu0 %7791, %v585_v29   ;;  %v10214_v28 = vmov 1.0|1.0  }
  0x3d   : > { %7053 = vmatpush3.bf16.msra.mxu0 %v7799_v36  ;;  %v641_v36 = vld [vmem:[%s10205_s1 + $0x230] sm:$0xff] }
  0x3e   : > { %7054 = vmatprep.subr.bf16.mxu0 %v7800_v39 }
  0x3f   : > { %753 = vperm.xlu1 %7792, %v588_v31   ;;  %750 = vperm.xlu0 %7791, %v587_v32   ;;  %v640_v31 = vld [vmem:[%s10205_s1 + $0x228] sm:$0xff]  ;;  %v639_v32 = vld [vmem:[%s10205_s1 + $0x220] sm:$0xff] }
  0x41   : > { %7055 = vmatpush3.bf16.msra.mxu0 %v7800_v39  ;;  %v644_v39 = vld [vmem:[%s10205_s1 + $0x248] sm:$0xff] }
  0x43   : > { %759 = vperm.xlu1 %7792, %v590_v34   ;;  %756 = vperm.xlu0 %7791, %v589_v35   ;;  %v642_v35 = vld [vmem:[%s10205_s1 + $0x238] sm:$0xff] }
  0x47   : > { %765 = vperm.xlu1 %7792, %v592_v37   ;;  %762 = vperm.xlu0 %7791, %v591_v38  }
  0x4b   : > { %771 = vperm.xlu1 %7792, %v594_v40   ;;  %768 = vperm.xlu0 %7791, %v593_v41   ;;  %v643_v40 = vld [vmem:[%s10205_s1 + $0x240] sm:$0xff] }
  0x4f   : > { %777 = vperm.xlu1 %7792, %v596_v42   ;;  %774 = vperm.xlu0 %7791, %v595_v43   ;;  %v646_v43 = vld [vmem:[%s10205_s1 + $0x258] sm:$0xff] }
  0x53   : > { %783 = vperm.xlu1 %7792, %v598_v44   ;;  %780 = vperm.xlu0 %7791, %v597_v45   ;;  %v645_v44 = vld [vmem:[%s10205_s1 + $0x250] sm:$0xff] }
  0x57   : > { %789 = vperm.xlu1 %7792, %v600_v46   ;;  %786 = vperm.xlu0 %7791, %v599_v47   ;;  %v648_v47 = vld [vmem:[%s10205_s1 + $0x268] sm:$0xff] }
  0x5b   : > { %795 = vperm.xlu1 %7792, %v602_v48   ;;  %792 = vperm.xlu0 %7791, %v601_v49   ;;  %v647_v48 = vld [vmem:[%s10205_s1 + $0x260] sm:$0xff] }
  0x5f   : > { %801 = vperm.xlu1 %7792, %v604_v50   ;;  %798 = vperm.xlu0 %7791, %v603_v51   ;;  %v650_v51 = vld [vmem:[%s10205_s1 + $0x278] sm:$0xff] }
  0x63   : > { %807 = vperm.xlu1 %7792, %v606_v52   ;;  %804 = vperm.xlu0 %7791, %v605_v53   ;;  %v649_v52 = vld [vmem:[%s10205_s1 + $0x270] sm:$0xff] }
  0x67   : > { %813 = vperm.xlu1 %7792, %v608_v54   ;;  %810 = vperm.xlu0 %7791, %v607_v55   ;;  %v652_v55 = vld [vmem:[%s10205_s1 + $0x288] sm:$0xff] }
  0x6b   : > { %819 = vperm.xlu1 %7792, %v610_v56   ;;  %816 = vperm.xlu0 %7791, %v609_v57   ;;  %v651_v56 = vld [vmem:[%s10205_s1 + $0x280] sm:$0xff] }
  0x6f   : > { %825 = vperm.xlu1 %7792, %v612_v58   ;;  %822 = vperm.xlu0 %7791, %v611_v59   ;;  %v654_v59 = vld [vmem:[%s10205_s1 + $0x298] sm:$0xff] }
  0x73   : > { %831 = vperm.xlu1 %7792, %v614_v60   ;;  %828 = vperm.xlu0 %7791, %v613_v61   ;;  %v653_v60 = vld [vmem:[%s10205_s1 + $0x290] sm:$0xff] }
  0x77   : > { %837 = vperm.xlu1 %7792, %v616_v62   ;;  %834 = vperm.xlu0 %7791, %v615_v63   ;;  %v656_v63 = vld [vmem:[%s10205_s1 + $0x2a8] sm:$0xff] }
  0x7b   : > { %843 = vperm.xlu1 %7792, %v618_v0   ;;  %840 = vperm.xlu0 %7791, %v617_v1   ;;  %v655_v0 = vld [vmem:[%s10205_s1 + $0x2a0] sm:$0xff] }
  0x7f   : > { %849 = vperm.xlu1 %7792, %v620_v2   ;;  %846 = vperm.xlu0 %7791, %v619_v3   ;;  %v658_v3 = vld [vmem:[%s10205_s1 + $0x2b8] sm:$0xff] }
  0x83   : > { %855 = vperm.xlu1 %7792, %v622_v4   ;;  %852 = vperm.xlu0 %7791, %v621_v5   ;;  %v657_v4 = vld [vmem:[%s10205_s1 + $0x2b0] sm:$0xff] }
  0x87   : > { %861 = vperm.xlu1 %7792, %v624_v6   ;;  %858 = vperm.xlu0 %7791, %v623_v7   ;;  %v7801_v7 = vld [vmem:[%s8022_s27 + $0x38] sm:$0xff]  }
  0x88   : > { %7184 = vmatprep.subr.bf16.mxu1 %v7801_v7 }
  0x89   : > { %7185 = vmatpush3.bf16.msra.mxu1 %v7801_v7  ;;  %v685_v7 = vld [vmem:[%s10205_s1 + $0x390] sm:$0xff] }
  0x8b   : > { %867 = vperm.xlu1 %7792, %v626_v8   ;;  %864 = vperm.xlu0 %7791, %v625_v9   ;;  %v660_v8 = vld [vmem:[%s10205_s1 + $0x2c8] sm:$0xff]  ;;  %v659_v9 = vld [vmem:[%s10205_s1 + $0x2c0] sm:$0xff] }
  0x8f   : > { %873 = vperm.xlu1 %7792, %v628_v10   ;;  %870 = vperm.xlu0 %7791, %v627_v11  }
  0x93   : > { %879 = vperm.xlu1 %7792, %v630_v12   ;;  %876 = vperm.xlu0 %7791, %v629_v13   ;;  %v7802_v12 = vld [vmem:[%s8022_s27 + $0x30] sm:$0xff]   ;;  %v662_v13 = vld [vmem:[%s10205_s1 + $0x2d8] sm:$0xff] }
  0x94   : > { %7186 = vmatprep.subr.bf16.mxu1 %v7802_v12 }
  0x95   : > { %7187 = vmatpush3.bf16.msra.mxu1 %v7802_v12 }
  0x97   : > { %885 = vperm.xlu1 %7792, %v632_v14   ;;  %882 = vperm.xlu0 %7791, %v631_v15   ;;  %v661_v14 = vld [vmem:[%s10205_s1 + $0x2d0] sm:$0xff] }
  0x9a   : > { %v709_v19 = vpop.permute.xlu1 %708  ;;  %v703_v20 = vpop.permute.xlu0 %702 }
  0x9b   : > { %891 = vperm.xlu1 %7792, %v634_v17   ;;  %888 = vperm.xlu0 %7791, %v633_v18   ;;  %vm1087_vm0 = vcmp.eq.s32.totalorder %v8243_v21, %v709_v19  ;;  %vm1085_vm4 = vcmp.eq.s32.totalorder %v8243_v21, %v703_v20  ;;  %v7803_v18 = vld [vmem:[%s8022_s27 + $0x28] sm:$0xff]   ;;  %v663_v20 = vld [vmem:[%s10205_s1 + $0x2e0] sm:$0xff] }
  0x9c   : > { %v664_v19 = vld [vmem:[%s10205_s1 + $0x2e8] sm:$0xff]  ;;  %7188 = vmatprep.subr.bf16.mxu1 %v7803_v18 }
  0x9d   : > { %7189 = vmatpush3.bf16.msra.mxu1 %v7803_v18 }
  0x9e   : > { %v712_v24 = vpop.permute.xlu1 %711  ;;  %v706_v25 = vpop.permute.xlu0 %705 }
  0x9f   : > { %vm1088_vm1 = vcmp.eq.s32.totalorder %v8243_v21, %v712_v24  ;;  %897 = vperm.xlu1 %7792, %v636_v22   ;;  %894 = vperm.xlu0 %7791, %v635_v23   ;;  %vm1086_vm2 = vcmp.eq.s32.totalorder %v8243_v21, %v706_v25  ;;  %v7804_v24 = vld [vmem:[%s8022_s27 + $0x20] sm:$0xff]   ;;  %v666_v25 = vld [vmem:[%s10205_s1 + $0x2f8] sm:$0xff] }
  0xa0   : > { %vm6188_vm3 = vmpackc.low %vm1088_vm1, %vm1087_vm0  ;;  %7190 = vmatprep.subr.bf16.mxu1 %v7804_v24 }
  0xa1   : > { %vm6186_vm5 = vmpackc.low %vm1086_vm2, %vm1085_vm4  ;;  %7191 = vmatpush3.bf16.msra.mxu1 %v7804_v24  ;;  %v694_v24 = vld [vmem:[%s10205_s1 + $0x3d8] sm:$0xff] }
  0xa2   : > { %7056 = vmatprep.mubr.msk.bf16.mxu0 %vm6186_vm5, %v10214_v28  ;;  %v718_v29 = vpop.permute.xlu1 %717  ;;  %v715_v30 = vpop.permute.xlu0 %714 }
  0xa3   : > { %vm1090_vm6 = vcmp.eq.s32.totalorder %v8243_v21, %v718_v29  ;;  %7057 = vmatmul.mubr.msk.bf16.vlgmr.msra.gmra.mxu0 %vm6188_vm3, %v10214_v28  ;;  %vm1089_vm7 = vcmp.eq.s32.totalorder %v8243_v21, %v715_v30  ;;  %903 = vperm.xlu1 %7792, %v638_v26   ;;  %v665_v26 = vld [vmem:[%s10205_s1 + $0x2f0] sm:$0xff]  ;;  %v7805_v30 = vld [vmem:[%s8022_s27 + $0x18] sm:$0xff]  }
  0xa4   : > { %vm6190_vm8 = vmpackc.low %vm1090_vm6, %vm1089_vm7  ;;  %900 = vperm.xlu0 %7791, %v637_v27   ;;  %7192 = vmatprep.subr.bf16.mxu1 %v7805_v30 }
  0xa5   : > { %7060 = vmatprep.mubr.msk.bf16.mxu0 %vm6190_vm8, %v10214_v28  ;;  %7193 = vmatpush3.bf16.msra.mxu1 %v7805_v30  ;;  %v695_v30 = vld [vmem:[%s10205_s1 + $0x3e0] sm:$0xff] }
  0xa6   : > { %v724_v33 = vpop.permute.xlu1 %723  ;;  %v721_v34 = vpop.permute.xlu0 %720 }
  0xa7   : > { %vm1092_vm9 = vcmp.eq.s32.totalorder %v8243_v21, %v724_v33  ;;  %vm1091_vm10 = vcmp.eq.s32.totalorder %v8243_v21, %v721_v34  ;;  %909 = vperm.xlu1 %7792, %v640_v31   ;;  %v668_v31 = vld [vmem:[%s10205_s1 + $0x308] sm:$0xff] }
  0xa8   : > { %vm6192_vm11 = vmpackc.low %vm1092_vm9, %vm1091_vm10  ;;  %906 = vperm.xlu0 %7791, %v639_v32   ;;  %v667_v32 = vld [vmem:[%s10205_s1 + $0x300] sm:$0xff] }
  0xaa   : > { %v730_v37 = vpop.permute.xlu1 %729  ;;  %v727_v38 = vpop.permute.xlu0 %726 }
  0xab   : > { %vm1094_vm12 = vcmp.eq.s32.totalorder %v8243_v21, %v730_v37  ;;  %7061 = vmatmul.mubr.msk.bf16.gmra.mxu0 %vm6192_vm11, %v10214_v28  ;;  %vm1093_vm13 = vcmp.eq.s32.totalorder %v8243_v21, %v727_v38  ;;  %915 = vperm.xlu1 %7792, %v642_v35   ;;  %v7806_v35 = vld [vmem:[%s8022_s27 + $0x10] sm:$0xff]  }
  0xac   : > { %vm6194_vm14 = vmpackc.low %vm1094_vm12, %vm1093_vm13  ;;  %912 = vperm.xlu0 %7791, %v641_v36   ;;  %v670_v36 = vld [vmem:[%s10205_s1 + $0x318] sm:$0xff]  ;;  %v669_v37 = vld [vmem:[%s10205_s1 + $0x310] sm:$0xff]  ;;  %7194 = vmatprep.subr.bf16.mxu1 %v7806_v35 }
  0xad   : > { %7064 = vmatprep.mubr.msk.bf16.mxu0 %vm6194_vm14, %v10214_v28  ;;  %7195 = vmatpush3.bf16.msra.mxu1 %v7806_v35 }
  0xae   : > { %v736_v41 = vpop.permute.xlu1 %735  ;;  %v733_v42 = vpop.permute.xlu0 %732 }
  0xaf   : > { %vm1096_vm15 = vcmp.eq.s32.totalorder %v8243_v21, %v736_v41  ;;  %vm1095_vm0 = vcmp.eq.s32.totalorder %v8243_v21, %v733_v42  ;;  %921 = vperm.xlu1 %7792, %v644_v39   ;;  %v672_v41 = vld [vmem:[%s10205_s1 + $0x328] sm:$0xff]  ;;  %v671_v42 = vld [vmem:[%s10205_s1 + $0x320] sm:$0xff] }
  0xb0   : > { %vm6196_vm1 = vmpackc.low %vm1096_vm15, %vm1095_vm0  ;;  %918 = vperm.xlu0 %7791, %v643_v40   ;;  %v7807_v40 = vld [vmem:[%s8022_s27 + $0x8] sm:$0xff]  }
  0xb1   : > { %7196 = vmatprep.subr.bf16.mxu1 %v7807_v40 }
  0xb2   : > { %v742_v45 = vpop.permute.xlu1 %741  ;;  %v739_v46 = vpop.permute.xlu0 %738  ;;  %7197 = vmatpush3.bf16.msra.mxu1 %v7807_v40 }
  0xb3   : > { %vm1098_vm2 = vcmp.eq.s32.totalorder %v8243_v21, %v742_v45  ;;  %7065 = vmatmul.mubr.msk.bf16.gmra.mxu0 %vm6196_vm1, %v10214_v28  ;;  %vm1097_vm3 = vcmp.eq.s32.totalorder %v8243_v21, %v739_v46  ;;  %927 = vperm.xlu1 %7792, %v646_v43   ;;  %v7808_v45 = vld [vmem:[%s8022_s27] sm:$0xff]   ;;  %v674_v46 = vld [vmem:[%s10205_s1 + $0x338] sm:$0xff] }
  0xb4   : > { %vm6198_vm4 = vmpackc.low %vm1098_vm2, %vm1097_vm3  ;;  %924 = vperm.xlu0 %7791, %v645_v44   ;;  %7198 = vmatprep.subr.bf16.mxu1 %v7808_v45 }
  0xb5   : > { %7068 = vmatprep.mubr.msk.bf16.mxu0 %vm6198_vm4, %v10214_v28 }
  0xb6   : > { %v748_v49 = vpop.permute.xlu1 %747  ;;  %v745_v50 = vpop.permute.xlu0 %744  ;;  %7199 = vmatpush3.bf16.msra.mxu1 %v7808_v45 }
  0xb7   : > { %vm1100_vm5 = vcmp.eq.s32.totalorder %v8243_v21, %v748_v49  ;;  %vm1099_vm6 = vcmp.eq.s32.totalorder %v8243_v21, %v745_v50  ;;  %933 = vperm.xlu1 %7792, %v648_v47   ;;  %v673_v47 = vld [vmem:[%s10205_s1 + $0x330] sm:$0xff]  ;;  %v676_v50 = vld [vmem:[%s10205_s1 + $0x348] sm:$0xff] }
  0xb8   : > { %vm6200_vm7 = vmpackc.low %vm1100_vm5, %vm1099_vm6  ;;  %930 = vperm.xlu0 %7791, %v647_v48  }
  0xba   : > { %v754_v53 = vpop.permute.xlu1 %753  ;;  %v751_v54 = vpop.permute.xlu0 %750 }
  0xbb   : > { %vm1102_vm8 = vcmp.eq.s32.totalorder %v8243_v21, %v754_v53  ;;  %7069 = vmatmul.mubr.msk.bf16.gmra.mxu0 %vm6200_vm7, %v10214_v28  ;;  %vm1101_vm9 = vcmp.eq.s32.totalorder %v8243_v21, %v751_v54  ;;  %939 = vperm.xlu1 %7792, %v650_v51   ;;  %v675_v51 = vld [vmem:[%s10205_s1 + $0x340] sm:$0xff]  ;;  %v678_v54 = vld [vmem:[%s10205_s1 + $0x358] sm:$0xff] }
  0xbc   : > { %vm6202_vm10 = vmpackc.low %vm1102_vm8, %vm1101_vm9  ;;  %936 = vperm.xlu0 %7791, %v649_v52  }
  0xbd   : > { %7072 = vmatprep.mubr.msk.bf16.mxu0 %vm6202_vm10, %v10214_v28 }
  0xbe   : > { %v760_v57 = vpop.permute.xlu1 %759  ;;  %v757_v58 = vpop.permute.xlu0 %756 }
  0xbf   : > { %vm1104_vm11 = vcmp.eq.s32.totalorder %v8243_v21, %v760_v57  ;;  %vm1103_vm12 = vcmp.eq.s32.totalorder %v8243_v21, %v757_v58  ;;  %945 = vperm.xlu1 %7792, %v652_v55   ;;  %v677_v55 = vld [vmem:[%s10205_s1 + $0x350] sm:$0xff]  ;;  %v680_v58 = vld [vmem:[%s10205_s1 + $0x368] sm:$0xff] }
  0xc0   : > { %vm6204_vm13 = vmpackc.low %vm1104_vm11, %vm1103_vm12  ;;  %942 = vperm.xlu0 %7791, %v651_v56  }
  0xc2   : > { %v766_v61 = vpop.permute.xlu1 %765  ;;  %v763_v62 = vpop.permute.xlu0 %762 }
  0xc3   : > { %vm1106_vm14 = vcmp.eq.s32.totalorder %v8243_v21, %v766_v61  ;;  %7073 = vmatmul.mubr.msk.bf16.gmra.mxu0 %vm6204_vm13, %v10214_v28  ;;  %vm1105_vm15 = vcmp.eq.s32.totalorder %v8243_v21, %v763_v62  ;;  %951 = vperm.xlu1 %7792, %v654_v59   ;;  %v679_v59 = vld [vmem:[%s10205_s1 + $0x360] sm:$0xff]  ;;  %v682_v62 = vld [vmem:[%s10205_s1 + $0x378] sm:$0xff] }
  0xc4   : > { %vm6206_vm0 = vmpackc.low %vm1106_vm14, %vm1105_vm15  ;;  %948 = vperm.xlu0 %7791, %v653_v60  }
  0xc5   : > { %7076 = vmatprep.mubr.msk.bf16.mxu0 %vm6206_vm0, %v10214_v28 }
  0xc6   : > { %v772_v1 = vpop.permute.xlu1 %771  ;;  %v769_v2 = vpop.permute.xlu0 %768 }
  0xc7   : > { %vm1108_vm1 = vcmp.eq.s32.totalorder %v8243_v21, %v772_v1  ;;  %vm1107_vm2 = vcmp.eq.s32.totalorder %v8243_v21, %v769_v2  ;;  %957 = vperm.xlu1 %7792, %v656_v63   ;;  %v681_v63 = vld [vmem:[%s10205_s1 + $0x370] sm:$0xff]  ;;  %v684_v2 = vld [vmem:[%s10205_s1 + $0x388] sm:$0xff] }
  0xc8   : > { %vm6208_vm3 = vmpackc.low %vm1108_vm1, %vm1107_vm2  ;;  %954 = vperm.xlu0 %7791, %v655_v0  }
  0xca   : > { %v778_v5 = vpop.permute.xlu1 %777  ;;  %v775_v6 = vpop.permute.xlu0 %774 }
  0xcb   : > { %vm1110_vm4 = vcmp.eq.s32.totalorder %v8243_v21, %v778_v5  ;;  %7077 = vmatmul.mubr.msk.bf16.gmra.mxu0 %vm6208_vm3, %v10214_v28  ;;  %vm1109_vm5 = vcmp.eq.s32.totalorder %v8243_v21, %v775_v6  ;;  %963 = vperm.xlu1 %7792, %v658_v3   ;;  %v683_v3 = vld [vmem:[%s10205_s1 + $0x380] sm:$0xff]  ;;  %v686_v6 = vld [vmem:[%s10205_s1 + $0x398] sm:$0xff] }
  0xcc   : > { %vm6210_vm6 = vmpackc.low %vm1110_vm4, %vm1109_vm5  ;;  %960 = vperm.xlu0 %7791, %v657_v4  }
  0xcd   : > { %7080 = vmatprep.mubr.msk.bf16.mxu0 %vm6210_vm6, %v10214_v28 }
  0xce   : > { %v784_v10 = vpop.permute.xlu1 %783  ;;  %v781_v11 = vpop.permute.xlu0 %780 }
  0xcf   : > { %vm1112_vm7 = vcmp.eq.s32.totalorder %v8243_v21, %v784_v10  ;;  %vm1111_vm8 = vcmp.eq.s32.totalorder %v8243_v21, %v781_v11  ;;  %969 = vperm.xlu1 %7792, %v660_v8   ;;  %v688_v10 = vld [vmem:[%s10205_s1 + $0x3a8] sm:$0xff]  ;;  %v687_v11 = vld [vmem:[%s10205_s1 + $0x3a0] sm:$0xff] }
  0xd0   : > { %vm6212_vm9 = vmpackc.low %vm1112_vm7, %vm1111_vm8  ;;  %966 = vperm.xlu0 %7791, %v659_v9  }
  0xd2   : > { %v790_v15 = vpop.permute.xlu1 %789  ;;  %v787_v17 = vpop.permute.xlu0 %786 }
  0xd3   : > { %vm1114_vm10 = vcmp.eq.s32.totalorder %v8243_v21, %v790_v15  ;;  %7081 = vmatmul.mubr.msk.bf16.gmra.mxu0 %vm6212_vm9, %v10214_v28  ;;  %vm1113_vm11 = vcmp.eq.s32.totalorder %v8243_v21, %v787_v17  ;;  %975 = vperm.xlu1 %7792, %v662_v13   ;;  %v689_v15 = vld [vmem:[%s10205_s1 + $0x3b0] sm:$0xff] }
  0xd4   : > { %vm6214_vm12 = vmpackc.low %vm1114_vm10, %vm1113_vm11  ;;  %972 = vperm.xlu0 %7791, %v661_v14   ;;  %v690_v14 = vld [vmem:[%s10205_s1 + $0x3b8] sm:$0xff] }
  0xd5   : > { %7084 = vmatprep.mubr.msk.bf16.mxu0 %vm6214_vm12, %v10214_v28 }
  0xd6   : > { %v796_v22 = vpop.permute.xlu1 %795  ;;  %v793_v23 = vpop.permute.xlu0 %792 }
  0xd7   : > { %vm1116_vm13 = vcmp.eq.s32.totalorder %v8243_v21, %v796_v22  ;;  %vm1115_vm14 = vcmp.eq.s32.totalorder %v8243_v21, %v793_v23  ;;  %981 = vperm.xlu1 %7792, %v664_v19   ;;  %v692_v19 = vld [vmem:[%s10205_s1 + $0x3c8] sm:$0xff] }
  0xd8   : > { %vm6216_vm15 = vmpackc.low %vm1116_vm13, %vm1115_vm14  ;;  %978 = vperm.xlu0 %7791, %v663_v20   ;;  %v691_v20 = vld [vmem:[%s10205_s1 + $0x3c0] sm:$0xff] }
  0xda   : > { %v802_v27 = vpop.permute.xlu1 %801  ;;  %v799_v29 = vpop.permute.xlu0 %798 }
  0xdb   : > { %vm1118_vm0 = vcmp.eq.s32.totalorder %v8243_v21, %v802_v27  ;;  %7085 = vmatmul.mubr.msk.bf16.gmra.mxu0 %vm6216_vm15, %v10214_v28  ;;  %vm1117_vm1 = vcmp.eq.s32.totalorder %v8243_v21, %v799_v29  ;;  %987 = vperm.xlu1 %7792, %v666_v25   ;;  %v693_v25 = vld [vmem:[%s10205_s1 + $0x3d0] sm:$0xff]  ;;  %v696_v29 = vld [vmem:[%s10205_s1 + $0x3e8] sm:$0xff] }
  0xdc   : > { %vm6218_vm2 = vmpackc.low %vm1118_vm0, %vm1117_vm1  ;;  %984 = vperm.xlu0 %7791, %v665_v26  }
  0xdd   : > { %7088 = vmatprep.mubr.msk.bf16.mxu0 %vm6218_vm2, %v10214_v28 }
  0xde   : > { %v808_v33 = vpop.permute.xlu1 %807  ;;  %v805_v34 = vpop.permute.xlu0 %804 }
  0xdf   : > { %vm1120_vm3 = vcmp.eq.s32.totalorder %v8243_v21, %v808_v33  ;;  %vm1119_vm4 = vcmp.eq.s32.totalorder %v8243_v21, %v805_v34  ;;  %993 = vperm.xlu1 %7792, %v668_v31   ;;  %v698_v33 = vld [vmem:[%s10205_s1 + $0x3f8] sm:$0xff]  ;;  %v697_v34 = vld [vmem:[%s10205_s1 + $0x3f0] sm:$0xff] }
  0xe0   : > { %vm6220_vm5 = vmpackc.low %vm1120_vm3, %vm1119_vm4  ;;  %990 = vperm.xlu0 %7791, %v667_v32  }
  0xe2   : > { %v814_v38 = vpop.permute.xlu1 %813  ;;  %v811_v39 = vpop.permute.xlu0 %810 }
  0xe3   : > { %vm1122_vm6 = vcmp.eq.s32.totalorder %v8243_v21, %v814_v38  ;;  %7089 = vmatmul.mubr.msk.bf16.gmra.mxu0 %vm6220_vm5, %v10214_v28  ;;  %vm1121_vm7 = vcmp.eq.s32.totalorder %v8243_v21, %v811_v39  ;;  %999 = vperm.xlu1 %7792, %v670_v36  }
  0xe4   : > { %vm6222_vm8 = vmpackc.low %vm1122_vm6, %vm1121_vm7  ;;  %996 = vperm.xlu0 %7791, %v669_v37  }
  0xe5   : > { %7092 = vmatprep.mubr.msk.bf16.mxu0 %vm6222_vm8, %v10214_v28 }
  0xe6   : > { %v820_v43 = vpop.permute.xlu1 %819  ;;  %v817_v44 = vpop.permute.xlu0 %816 }
  0xe7   : > { %vm1124_vm9 = vcmp.eq.s32.totalorder %v8243_v21, %v820_v43  ;;  %vm1123_vm10 = vcmp.eq.s32.totalorder %v8243_v21, %v817_v44  ;;  %1005 = vperm.xlu1 %7792, %v672_v41  }
  0xe8   : > { %vm6224_vm11 = vmpackc.low %vm1124_vm9, %vm1123_vm10  ;;  %1002 = vperm.xlu0 %7791, %v671_v42  }
  0xea   : > { %v826_v48 = vpop.permute.xlu1 %825  ;;  %v823_v49 = vpop.permute.xlu0 %822 }
  0xeb   : > { %vm1126_vm12 = vcmp.eq.s32.totalorder %v8243_v21, %v826_v48  ;;  %7093 = vmatmul.mubr.msk.bf16.gmra.mxu0 %vm6224_vm11, %v10214_v28  ;;  %vm1125_vm13 = vcmp.eq.s32.totalorder %v8243_v21, %v823_v49  ;;  %1011 = vperm.xlu1 %7792, %v674_v46  }
  0xec   : > { %vm6226_vm14 = vmpackc.low %vm1126_vm12, %vm1125_vm13  ;;  %1008 = vperm.xlu0 %7791, %v673_v47  }
  0xed   : > { %7096 = vmatprep.mubr.msk.bf16.mxu0 %vm6226_vm14, %v10214_v28 }
  0xee   : > { %v832_v52 = vpop.permute.xlu1 %831  ;;  %v829_v53 = vpop.permute.xlu0 %828 }
  0xef   : > { %vm1128_vm15 = vcmp.eq.s32.totalorder %v8243_v21, %v832_v52  ;;  %vm1127_vm0 = vcmp.eq.s32.totalorder %v8243_v21, %v829_v53  ;;  %1017 = vperm.xlu1 %7792, %v676_v50  }
  0xf0   : > { %vm6228_vm1 = vmpackc.low %vm1128_vm15, %vm1127_vm0  ;;  %1014 = vperm.xlu0 %7791, %v675_v51  }
  0xf2   : > { %v838_v56 = vpop.permute.xlu1 %837  ;;  %v835_v57 = vpop.permute.xlu0 %834 }
  0xf3   : > { %vm1130_vm2 = vcmp.eq.s32.totalorder %v8243_v21, %v838_v56  ;;  %7097 = vmatmul.mubr.msk.bf16.gmra.mxu0 %vm6228_vm1, %v10214_v28  ;;  %vm1129_vm3 = vcmp.eq.s32.totalorder %v8243_v21, %v835_v57  ;;  %1023 = vperm.xlu1 %7792, %v678_v54  }
  0xf4   : > { %vm6230_vm4 = vmpackc.low %vm1130_vm2, %vm1129_vm3  ;;  %1020 = vperm.xlu0 %7791, %v677_v55  }
  0xf5   : > { %7100 = vmatprep.mubr.msk.bf16.mxu0 %vm6230_vm4, %v10214_v28 }
  0xf6   : > { %v844_v60 = vpop.permute.xlu1 %843  ;;  %v841_v61 = vpop.permute.xlu0 %840 }
  0xf7   : > { %vm1132_vm5 = vcmp.eq.s32.totalorder %v8243_v21, %v844_v60  ;;  %vm1131_vm6 = vcmp.eq.s32.totalorder %v8243_v21, %v841_v61  ;;  %1029 = vperm.xlu1 %7792, %v680_v58  }
  0xf8   : > { %vm6232_vm7 = vmpackc.low %vm1132_vm5, %vm1131_vm6  ;;  %1026 = vperm.xlu0 %7791, %v679_v59  }
  0xfa   : > { %v850_v0 = vpop.permute.xlu1 %849  ;;  %v847_v1 = vpop.permute.xlu0 %846 }
  0xfb   : > { %vm1134_vm8 = vcmp.eq.s32.totalorder %v8243_v21, %v850_v0  ;;  %7101 = vmatmul.mubr.msk.bf16.gmra.mxu0 %vm6232_vm7, %v10214_v28  ;;  %vm1133_vm9 = vcmp.eq.s32.totalorder %v8243_v21, %v847_v1  ;;  %1035 = vperm.xlu1 %7792, %v682_v62  }
  0xfc   : > { %vm6234_vm10 = vmpackc.low %vm1134_vm8, %vm1133_vm9  ;;  %1032 = vperm.xlu0 %7791, %v681_v63  }
  0xfd   : > { %7104 = vmatprep.mubr.msk.bf16.mxu0 %vm6234_vm10, %v10214_v28 }
  0xfe   : > { %v856_v4 = vpop.permute.xlu1 %855  ;;  %v853_v5 = vpop.permute.xlu0 %852 }
  0xff   : > { %vm1136_vm11 = vcmp.eq.s32.totalorder %v8243_v21, %v856_v4  ;;  %vm1135_vm12 = vcmp.eq.s32.totalorder %v8243_v21, %v853_v5  ;;  %1041 = vperm.xlu1 %7792, %v684_v2  }
 0x100   : > { %vm6236_vm13 = vmpackc.low %vm1136_vm11, %vm1135_vm12  ;;  %1038 = vperm.xlu0 %7791, %v683_v3  }
 0x102   : > { %v862_v8 = vpop.permute.xlu1 %861  ;;  %v859_v9 = vpop.permute.xlu0 %858 }
 0x103   : > { %vm1138_vm14 = vcmp.eq.s32.totalorder %v8243_v21, %v862_v8  ;;  %7105 = vmatmul.mubr.msk.bf16.gmra.mxu0 %vm6236_vm13, %v10214_v28  ;;  %vm1137_vm15 = vcmp.eq.s32.totalorder %v8243_v21, %v859_v9  ;;  %1047 = vperm.xlu1 %7792, %v686_v6  }
 0x104   : > { %vm6238_vm0 = vmpackc.low %vm1138_vm14, %vm1137_vm15  ;;  %1044 = vperm.xlu0 %7791, %v685_v7  }
 0x105   : > { %7108 = vmatprep.mubr.msk.bf16.mxu0 %vm6238_vm0, %v10214_v28 }
 0x106   : > { %v868_v12 = vpop.permute.xlu1 %867  ;;  %v865_v13 = vpop.permute.xlu0 %864 }
 0x107   : > { %vm1140_vm1 = vcmp.eq.s32.totalorder %v8243_v21, %v868_v12  ;;  %vm1139_vm2 = vcmp.eq.s32.totalorder %v8243_v21, %v865_v13  ;;  %1053 = vperm.xlu1 %7792, %v688_v10  }
 0x108   : > { %vm6240_vm3 = vmpackc.low %vm1140_vm1, %vm1139_vm2  ;;  %1050 = vperm.xlu0 %7791, %v687_v11  }
 0x10a   : > { %v874_v17 = vpop.permute.xlu1 %873  ;;  %v871_v18 = vpop.permute.xlu0 %870 }
 0x10b   : > { %vm1142_vm4 = vcmp.eq.s32.totalorder %v8243_v21, %v874_v17  ;;  %7109 = vmatmul.mubr.msk.bf16.gmra.mxu0 %vm6240_vm3, %v10214_v28  ;;  %vm1141_vm5 = vcmp.eq.s32.totalorder %v8243_v21, %v871_v18  ;;  %1059 = vperm.xlu1 %7792, %v690_v14  }
 0x10c   : > { %vm6242_vm6 = vmpackc.low %vm1142_vm4, %vm1141_vm5  ;;  %1056 = vperm.xlu0 %7791, %v689_v15  }
 0x10d   : > { %7112 = vmatprep.mubr.msk.bf16.mxu0 %vm6242_vm6, %v10214_v28 }
 0x10e   : > { %v880_v22 = vpop.permute.xlu1 %879  ;;  %v877_v23 = vpop.permute.xlu0 %876 }
 0x10f   : > { %vm1144_vm7 = vcmp.eq.s32.totalorder %v8243_v21, %v880_v22  ;;  %vm1143_vm8 = vcmp.eq.s32.totalorder %v8243_v21, %v877_v23  ;;  %1065 = vperm.xlu1 %7792, %v692_v19  }
 0x110   : > { %vm6244_vm9 = vmpackc.low %vm1144_vm7, %vm1143_vm8  ;;  %1062 = vperm.xlu0 %7791, %v691_v20  }
 0x112   : > { %v886_v26 = vpop.permute.xlu1 %885  ;;  %v883_v27 = vpop.permute.xlu0 %882 }
 0x113   : > { %vm1146_vm10 = vcmp.eq.s32.totalorder %v8243_v21, %v886_v26  ;;  %7113 = vmatmul.mubr.msk.bf16.gmra.mxu0 %vm6244_vm9, %v10214_v28  ;;  %vm1145_vm11 = vcmp.eq.s32.totalorder %v8243_v21, %v883_v27  ;;  %1071 = vperm.xlu1 %7792, %v694_v24  }
 0x114   : > { %vm6246_vm12 = vmpackc.low %vm1146_vm10, %vm1145_vm11  ;;  %1068 = vperm.xlu0 %7791, %v693_v25  }
 0x115   : > { %7116 = vmatprep.mubr.msk.bf16.mxu0 %vm6246_vm12, %v10214_v28 }
 0x116   : > { %v892_v31 = vpop.permute.xlu1 %891  ;;  %v889_v32 = vpop.permute.xlu0 %888 }
 0x117   : > { %vm1148_vm13 = vcmp.eq.s32.totalorder %v8243_v21, %v892_v31  ;;  %vm1147_vm14 = vcmp.eq.s32.totalorder %v8243_v21, %v889_v32  ;;  %1077 = vperm.xlu1 %7792, %v696_v29  }
 0x118   : > { %vm6248_vm15 = vmpackc.low %vm1148_vm13, %vm1147_vm14  ;;  %1074 = vperm.xlu0 %7791, %v695_v30  }
 0x11a   : > { %v898_v35 = vpop.permute.xlu1 %897  ;;  %v895_v36 = vpop.permute.xlu0 %894 }
 0x11b   : > { %vm1150_vm0 = vcmp.eq.s32.totalorder %v8243_v21, %v898_v35  ;;  %7117 = vmatmul.mubr.msk.bf16.gmra.mxu0 %vm6248_vm15, %v10214_v28  ;;  %vm1149_vm1 = vcmp.eq.s32.totalorder %v8243_v21, %v895_v36  ;;  %1083 = vperm.xlu1 %7792, %v698_v33  }
 0x11c   : > { %vm6250_vm2 = vmpackc.low %vm1150_vm0, %vm1149_vm1  ;;  %1080 = vperm.xlu0 %7791, %v697_v34  }
 0x11d   : > { %7120 = vmatprep.mubr.msk.bf16.mxu0 %vm6250_vm2, %v10214_v28 }
 0x11e   : > { %v904_v37 = vpop.permute.xlu1 %903 }
 0x11f   : > { %vm1152_vm3 = vcmp.eq.s32.totalorder %v8243_v21, %v904_v37  ;;  %v901_v38 = vpop.permute.xlu0 %900 }
 0x120   : > { %vm1151_vm4 = vcmp.eq.s32.totalorder %v8243_v21, %v901_v38 }
 0x121   : > { %vm6252_vm5 = vmpackc.low %vm1152_vm3, %vm1151_vm4 }
 0x122   : > { %v910_v39 = vpop.permute.xlu1 %909 }
 0x123   : > { %vm1154_vm6 = vcmp.eq.s32.totalorder %v8243_v21, %v910_v39  ;;  %7121 = vmatmul.mubr.msk.bf16.gmra.mxu0 %vm6252_vm5, %v10214_v28  ;;  %v907_v40 = vpop.permute.xlu0 %906 }
 0x124   : > { %vm1153_vm7 = vcmp.eq.s32.totalorder %v8243_v21, %v907_v40 }
 0x125   : > { %vm6254_vm8 = vmpackc.low %vm1154_vm6, %vm1153_vm7 }
 0x126   : > { %7124 = vmatprep.mubr.msk.bf16.mxu0 %vm6254_vm8, %v10214_v28  ;;  %v916_v41 = vpop.permute.xlu1 %915 }
 0x127   : > { %vm1156_vm9 = vcmp.eq.s32.totalorder %v8243_v21, %v916_v41  ;;  %v913_v42 = vpop.permute.xlu0 %912 }
 0x128   : > { %vm1155_vm10 = vcmp.eq.s32.totalorder %v8243_v21, %v913_v42 }
 0x129   : > { %vm6256_vm11 = vmpackc.low %vm1156_vm9, %vm1155_vm10 }
 0x12a   : > { %v922_v43 = vpop.permute.xlu1 %921 }
 0x12b   : > { %vm1158_vm12 = vcmp.eq.s32.totalorder %v8243_v21, %v922_v43  ;;  %7125 = vmatmul.mubr.msk.bf16.gmra.mxu0 %vm6256_vm11, %v10214_v28  ;;  %v919_v44 = vpop.permute.xlu0 %918 }
 0x12c   : > { %vm1157_vm13 = vcmp.eq.s32.totalorder %v8243_v21, %v919_v44 }
 0x12d   : > { %vm6258_vm14 = vmpackc.low %vm1158_vm12, %vm1157_vm13 }
 0x12e   : > { %7128 = vmatprep.mubr.msk.bf16.mxu0 %vm6258_vm14, %v10214_v28  ;;  %v928_v45 = vpop.permute.xlu1 %927 }
 0x12f   : > { %vm1160_vm15 = vcmp.eq.s32.totalorder %v8243_v21, %v928_v45  ;;  %v925_v46 = vpop.permute.xlu0 %924 }
 0x130   : > { %vm1159_vm0 = vcmp.eq.s32.totalorder %v8243_v21, %v925_v46 }
 0x131   : > { %vm6260_vm1 = vmpackc.low %vm1160_vm15, %vm1159_vm0 }
 0x132   : > { %v934_v47 = vpop.permute.xlu1 %933 }
 0x133   : > { %vm1162_vm2 = vcmp.eq.s32.totalorder %v8243_v21, %v934_v47  ;;  %7129 = vmatmul.mubr.msk.bf16.gmra.mxu0 %vm6260_vm1, %v10214_v28  ;;  %v931_v48 = vpop.permute.xlu0 %930 }
 0x134   : > { %vm1161_vm3 = vcmp.eq.s32.totalorder %v8243_v21, %v931_v48 }
 0x135   : > { %vm6262_vm4 = vmpackc.low %vm1162_vm2, %vm1161_vm3 }
 0x136   : > { %7132 = vmatprep.mubr.msk.bf16.mxu0 %vm6262_vm4, %v10214_v28  ;;  %v940_v49 = vpop.permute.xlu1 %939 }
 0x137   : > { %vm1164_vm5 = vcmp.eq.s32.totalorder %v8243_v21, %v940_v49  ;;  %v937_v50 = vpop.permute.xlu0 %936 }
 0x138   : > { %vm1163_vm6 = vcmp.eq.s32.totalorder %v8243_v21, %v937_v50 }
 0x139   : > { %vm6264_vm7 = vmpackc.low %vm1164_vm5, %vm1163_vm6 }
 0x13a   : > { %v946_v51 = vpop.permute.xlu1 %945 }
 0x13b   : > { %vm1166_vm8 = vcmp.eq.s32.totalorder %v8243_v21, %v946_v51  ;;  %7133 = vmatmul.mubr.msk.bf16.gmra.mxu0 %vm6264_vm7, %v10214_v28  ;;  %v943_v52 = vpop.permute.xlu0 %942 }
 0x13c   : > { %vm1165_vm9 = vcmp.eq.s32.totalorder %v8243_v21, %v943_v52 }
 0x13d   : > { %vm6266_vm10 = vmpackc.low %vm1166_vm8, %vm1165_vm9 }
 0x13e   : > { %7136 = vmatprep.mubr.msk.bf16.mxu0 %vm6266_vm10, %v10214_v28  ;;  %v952_v53 = vpop.permute.xlu1 %951 }
 0x13f   : > { %vm1168_vm11 = vcmp.eq.s32.totalorder %v8243_v21, %v952_v53  ;;  %v949_v54 = vpop.permute.xlu0 %948 }
 0x140   : > { %vm1167_vm12 = vcmp.eq.s32.totalorder %v8243_v21, %v949_v54 }
 0x141   : > { %vm6268_vm13 = vmpackc.low %vm1168_vm11, %vm1167_vm12 }
 0x142   : > { %v958_v55 = vpop.permute.xlu1 %957 }
 0x143   : > { %vm1170_vm14 = vcmp.eq.s32.totalorder %v8243_v21, %v958_v55  ;;  %7137 = vmatmul.mubr.msk.bf16.gmra.mxu0 %vm6268_vm13, %v10214_v28  ;;  %v955_v56 = vpop.permute.xlu0 %954 }
 0x144   : > { %vm1169_vm15 = vcmp.eq.s32.totalorder %v8243_v21, %v955_v56 }
 0x145   : > { %vm6270_vm0 = vmpackc.low %vm1170_vm14, %vm1169_vm15 }
 0x146   : > { %7140 = vmatprep.mubr.msk.bf16.mxu0 %vm6270_vm0, %v10214_v28  ;;  %v964_v57 = vpop.permute.xlu1 %963 }
 0x147   : > { %vm1172_vm1 = vcmp.eq.s32.totalorder %v8243_v21, %v964_v57  ;;  %v961_v58 = vpop.permute.xlu0 %960 }
 0x148   : > { %vm1171_vm2 = vcmp.eq.s32.totalorder %v8243_v21, %v961_v58 }
 0x149   : > { %vm6272_vm3 = vmpackc.low %vm1172_vm1, %vm1171_vm2 }
 0x14a   : > { %v970_v59 = vpop.permute.xlu1 %969 }
 0x14b   : > { %vm1174_vm4 = vcmp.eq.s32.totalorder %v8243_v21, %v970_v59  ;;  %7141 = vmatmul.mubr.msk.bf16.gmra.mxu0 %vm6272_vm3, %v10214_v28  ;;  %v967_v60 = vpop.permute.xlu0 %966 }
 0x14c   : > { %vm1173_vm5 = vcmp.eq.s32.totalorder %v8243_v21, %v967_v60 }
 0x14d   : > { %vm6274_vm6 = vmpackc.low %vm1174_vm4, %vm1173_vm5 }
 0x14e   : > { %7144 = vmatprep.mubr.msk.bf16.mxu0 %vm6274_vm6, %v10214_v28  ;;  %v976_v61 = vpop.permute.xlu1 %975 }
 0x14f   : > { %vm1176_vm7 = vcmp.eq.s32.totalorder %v8243_v21, %v976_v61  ;;  %v973_v62 = vpop.permute.xlu0 %972 }
 0x150   : > { %vm1175_vm8 = vcmp.eq.s32.totalorder %v8243_v21, %v973_v62 }
 0x151   : > { %vm6276_vm9 = vmpackc.low %vm1176_vm7, %vm1175_vm8 }
 0x152   : > { %v982_v63 = vpop.permute.xlu1 %981 }
 0x153   : > { %vm1178_vm10 = vcmp.eq.s32.totalorder %v8243_v21, %v982_v63  ;;  %7145 = vmatmul.mubr.msk.bf16.gmra.mxu0 %vm6276_vm9, %v10214_v28  ;;  %v979_v0 = vpop.permute.xlu0 %978 }
 0x154   : > { %vm1177_vm11 = vcmp.eq.s32.totalorder %v8243_v21, %v979_v0 }
 0x155   : > { %vm6278_vm12 = vmpackc.low %vm1178_vm10, %vm1177_vm11 }
 0x156   : > { %7148 = vmatprep.mubr.msk.bf16.mxu0 %vm6278_vm12, %v10214_v28  ;;  %v988_v1 = vpop.permute.xlu1 %987 }
 0x157   : > { %vm1180_vm13 = vcmp.eq.s32.totalorder %v8243_v21, %v988_v1  ;;  %v985_v2 = vpop.permute.xlu0 %984 }
 0x158   : > { %vm1179_vm14 = vcmp.eq.s32.totalorder %v8243_v21, %v985_v2 }
 0x159   : > { %vm6280_vm15 = vmpackc.low %vm1180_vm13, %vm1179_vm14 }
 0x15a   : > { %v994_v3 = vpop.permute.xlu1 %993 }
 0x15b   : > { %vm1182_vm0 = vcmp.eq.s32.totalorder %v8243_v21, %v994_v3  ;;  %7149 = vmatmul.mubr.msk.bf16.gmra.mxu0 %vm6280_vm15, %v10214_v28  ;;  %v991_v4 = vpop.permute.xlu0 %990 }
 0x15c   : > { %vm1181_vm1 = vcmp.eq.s32.totalorder %v8243_v21, %v991_v4 }
 0x15d   : > { %vm6282_vm2 = vmpackc.low %vm1182_vm0, %vm1181_vm1 }
 0x15e   : > { %7152 = vmatprep.mubr.msk.bf16.mxu0 %vm6282_vm2, %v10214_v28  ;;  %v1000_v5 = vpop.permute.xlu1 %999 }
 0x15f   : > { %vm1184_vm3 = vcmp.eq.s32.totalorder %v8243_v21, %v1000_v5  ;;  %v997_v6 = vpop.permute.xlu0 %996 }
 0x160   : > { %vm1183_vm4 = vcmp.eq.s32.totalorder %v8243_v21, %v997_v6 }
 0x161   : > { %vm6284_vm5 = vmpackc.low %vm1184_vm3, %vm1183_vm4 }
 0x162   : > { %v1006_v7 = vpop.permute.xlu1 %1005 }
 0x163   : > { %vm1186_vm6 = vcmp.eq.s32.totalorder %v8243_v21, %v1006_v7  ;;  %v7058_v8 = vpop.f32.mrf.mxu0  ;;  %7153 = vmatmul.mubr.msk.bf16.gmra.mxu0 %vm6284_vm5, %v10214_v28  ;;  %v1003_v9 = vpop.permute.xlu0 %1002 }
 0x164   : > { %vm1185_vm7 = vcmp.eq.s32.totalorder %v8243_v21, %v1003_v9 }
 0x165   : > { %vm6286_vm8 = vmpackc.low %vm1186_vm6, %vm1185_vm7  ;;  %v1889_v10 = vpop.f32.mrf.mxu0 }
 0x166   : > { %7156 = vmatprep.mubr.msk.bf16.mxu0 %vm6286_vm8, %v10214_v28  ;;  %v1012_v11 = vpop.permute.xlu1 %1011 }
 0x167   : > { %vm1188_vm9 = vcmp.eq.s32.totalorder %v8243_v21, %v1012_v11  ;;  %v7059_v12 = vpop.f32.mrf.mxu0  ;;  %v1009_v13 = vpop.permute.xlu0 %1008 }
 0x168   : > { %vm1187_vm10 = vcmp.eq.s32.totalorder %v8243_v21, %v1009_v13  ;;  %v2401_v18 = vpack.c.bf16 %v7059_v12, %v7058_v8 }
 0x169   : > { %vm6288_vm11 = vmpackc.low %vm1188_vm9, %vm1187_vm10  ;;  %v1892_v14 = vpop.f32.mrf.mxu0 }
 0x16a   : > { %v1018_v15 = vpop.permute.xlu1 %1017  ;;  %v2400_v17 = vpack.c.bf16 %v1892_v14, %v1889_v10 }
 0x16b   : > { %vm1190_vm12 = vcmp.eq.s32.totalorder %v8243_v21, %v1018_v15  ;;  %v7062_v19 = vpop.f32.mrf.mxu0  ;;  %7157 = vmatmul.mubr.msk.bf16.gmra.mxu0 %vm6288_vm11, %v10214_v28  ;;  %v1015_v20 = vpop.permute.xlu0 %1014 }
 0x16c   : > { %vm1189_vm13 = vcmp.eq.s32.totalorder %v8243_v21, %v1015_v20  ;;  %7200 = vmatprep.mubr.bf16.mxu1 %v2400_v17 }
 0x16d   : > { %vm6290_vm14 = vmpackc.low %vm1190_vm12, %vm1189_vm13  ;;  %v1905_v22 = vpop.f32.mrf.mxu0  ;;  %7201 = vmatmul.mubr.bf16.vlgmr.msra.gmra.mxu1 %v2401_v18  ;;  %v7809_v18 = vld [vmem:[%s8022_s27 + $0xb8] sm:$0xff]  }
 0x16e   : > { %7160 = vmatprep.mubr.msk.bf16.mxu0 %vm6290_vm14, %v10214_v28  ;;  %v1024_v23 = vpop.permute.xlu1 %1023  ;;  %7328 = vmatprep.subr.bf16.mxu0 %v7809_v18 }
 0x16f   : > { %vm1192_vm15 = vcmp.eq.s32.totalorder %v8243_v21, %v1024_v23  ;;  %v7063_v24 = vpop.f32.mrf.mxu0  ;;  %v1021_v25 = vpop.permute.xlu0 %1020  ;;  %7329 = vmatpush3.bf16.msra.mxu0 %v7809_v18 }
 0x170   : > { %vm1191_vm0 = vcmp.eq.s32.totalorder %v8243_v21, %v1021_v25  ;;  %v2403_v30 = vpack.c.bf16 %v7063_v24, %v7062_v19 }
 0x171   : > { %vm6292_vm1 = vmpackc.low %vm1192_vm15, %vm1191_vm0  ;;  %v1908_v26 = vpop.f32.mrf.mxu0 }
 0x172   : > { %v2402_v27 = vpack.c.bf16 %v1908_v26, %v1905_v22  ;;  %v1030_v29 = vpop.permute.xlu1 %1029 }
 0x173   : > { %vm1194_vm2 = vcmp.eq.s32.totalorder %v8243_v21, %v1030_v29  ;;  %v7066_v31 = vpop.f32.mrf.mxu0  ;;  %7161 = vmatmul.mubr.msk.bf16.gmra.mxu0 %vm6292_vm1, %v10214_v28  ;;  %v1027_v32 = vpop.permute.xlu0 %1026 }
 0x174   : > { %vm1193_vm3 = vcmp.eq.s32.totalorder %v8243_v21, %v1027_v32  ;;  %7204 = vmatprep.mubr.bf16.mxu1 %v2402_v27 }
 0x175   : > { %vm6294_vm4 = vmpackc.low %vm1194_vm2, %vm1193_vm3  ;;  %v1921_v33 = vpop.f32.mrf.mxu0  ;;  %7205 = vmatmul.mubr.bf16.gmra.mxu1 %v2403_v30 }
 0x176   : > { %7164 = vmatprep.mubr.msk.bf16.mxu0 %vm6294_vm4, %v10214_v28  ;;  %v1036_v34 = vpop.permute.xlu1 %1035 }
 0x177   : > { %vm1196_vm5 = vcmp.eq.s32.totalorder %v8243_v21, %v1036_v34  ;;  %v7067_v35 = vpop.f32.mrf.mxu0  ;;  %v1033_v36 = vpop.permute.xlu0 %1032 }
 0x178   : > { %vm1195_vm6 = vcmp.eq.s32.totalorder %v8243_v21, %v1033_v36  ;;  %v2405_v40 = vpack.c.bf16 %v7067_v35, %v7066_v31 }
 0x179   : > { %vm6296_vm7 = vmpackc.low %vm1196_vm5, %vm1195_vm6  ;;  %v1924_v37 = vpop.f32.mrf.mxu0 }
 0x17a   : > { %v2404_v38 = vpack.c.bf16 %v1924_v37, %v1921_v33  ;;  %v1042_v39 = vpop.permute.xlu1 %1041 }
 0x17b   : > { %vm1198_vm8 = vcmp.eq.s32.totalorder %v8243_v21, %v1042_v39  ;;  %v7070_v41 = vpop.f32.mrf.mxu0  ;;  %7165 = vmatmul.mubr.msk.bf16.gmra.mxu0 %vm6296_vm7, %v10214_v28  ;;  %v1039_v42 = vpop.permute.xlu0 %1038 }
 0x17c   : > { %vm1197_vm9 = vcmp.eq.s32.totalorder %v8243_v21, %v1039_v42  ;;  %7208 = vmatprep.mubr.bf16.mxu1 %v2404_v38 }
 0x17d   : > { %vm6298_vm10 = vmpackc.low %vm1198_vm8, %vm1197_vm9  ;;  %v1937_v43 = vpop.f32.mrf.mxu0  ;;  %7209 = vmatmul.mubr.bf16.gmra.mxu1 %v2405_v40 }
 0x17e   : > { %7168 = vmatprep.mubr.msk.bf16.mxu0 %vm6298_vm10, %v10214_v28  ;;  %v1048_v44 = vpop.permute.xlu1 %1047 }
 0x17f   : > { %vm1200_vm11 = vcmp.eq.s32.totalorder %v8243_v21, %v1048_v44  ;;  %v7071_v45 = vpop.f32.mrf.mxu0  ;;  %v1045_v46 = vpop.permute.xlu0 %1044 }
 0x180   : > { %vm1199_vm12 = vcmp.eq.s32.totalorder %v8243_v21, %v1045_v46  ;;  %v2407_v50 = vpack.c.bf16 %v7071_v45, %v7070_v41  ;;  %v7810_v45 = vld [vmem:[%s8022_s27 + $0xb0] sm:$0xff]  }
 0x181   : > { %vm6300_vm13 = vmpackc.low %vm1200_vm11, %vm1199_vm12  ;;  %v1940_v47 = vpop.f32.mrf.mxu0  ;;  %7330 = vmatprep.subr.bf16.mxu0 %v7810_v45 }
 0x182   : > { %v2406_v48 = vpack.c.bf16 %v1940_v47, %v1937_v43  ;;  %v1054_v49 = vpop.permute.xlu1 %1053  ;;  %7331 = vmatpush3.bf16.msra.mxu0 %v7810_v45 }
 0x183   : > { %vm1202_vm14 = vcmp.eq.s32.totalorder %v8243_v21, %v1054_v49  ;;  %v7074_v51 = vpop.f32.mrf.mxu0  ;;  %7169 = vmatmul.mubr.msk.bf16.gmra.mxu0 %vm6300_vm13, %v10214_v28  ;;  %v1051_v52 = vpop.permute.xlu0 %1050 }
 0x184   : > { %vm1201_vm15 = vcmp.eq.s32.totalorder %v8243_v21, %v1051_v52  ;;  %7212 = vmatprep.mubr.bf16.mxu1 %v2406_v48 }
 0x185   : > { %vm6302_vm0 = vmpackc.low %vm1202_vm14, %vm1201_vm15  ;;  %v1953_v53 = vpop.f32.mrf.mxu0  ;;  %7213 = vmatmul.mubr.bf16.gmra.mxu1 %v2407_v50 }
 0x186   : > { %7172 = vmatprep.mubr.msk.bf16.mxu0 %vm6302_vm0, %v10214_v28  ;;  %v1060_v54 = vpop.permute.xlu1 %1059 }
 0x187   : > { %vm1204_vm1 = vcmp.eq.s32.totalorder %v8243_v21, %v1060_v54  ;;  %v7075_v55 = vpop.f32.mrf.mxu0  ;;  %v1057_v56 = vpop.permute.xlu0 %1056 }
 0x188   : > { %vm1203_vm2 = vcmp.eq.s32.totalorder %v8243_v21, %v1057_v56  ;;  %v2409_v60 = vpack.c.bf16 %v7075_v55, %v7074_v51 }
 0x189   : > { %vm6304_vm3 = vmpackc.low %vm1204_vm1, %vm1203_vm2  ;;  %v1956_v57 = vpop.f32.mrf.mxu0 }
 0x18a   : > { %v2408_v58 = vpack.c.bf16 %v1956_v57, %v1953_v53  ;;  %v1066_v59 = vpop.permute.xlu1 %1065  ;;  %v7811_v57 = vld [vmem:[%s8022_s27 + $0x78] sm:$0xff]  }
 0x18b   : > { %vm1206_vm4 = vcmp.eq.s32.totalorder %v8243_v21, %v1066_v59  ;;  %v7078_v61 = vpop.f32.mrf.mxu0  ;;  %7173 = vmatmul.mubr.msk.bf16.gmra.mxu0 %vm6304_vm3, %v10214_v28  ;;  %v1063_v62 = vpop.permute.xlu0 %1062  ;;  %7408 = vmatprep.subr.bf16.mxu1 %v7811_v57 }
 0x18c   : > { %vm1205_vm5 = vcmp.eq.s32.totalorder %v8243_v21, %v1063_v62  ;;  %7216 = vmatprep.mubr.bf16.mxu1 %v2408_v58  ;;  %7409 = vmatpush3.bf16.msra.mxu1 %v7811_v57 }
 0x18d   : > { %vm6306_vm6 = vmpackc.low %vm1206_vm4, %vm1205_vm5  ;;  %v1969_v63 = vpop.f32.mrf.mxu0  ;;  %7217 = vmatmul.mubr.bf16.gmra.mxu1 %v2409_v60  ;;  %v7812_v60 = vld [vmem:[%s8022_s27 + $0x70] sm:$0xff]  }
 0x18e   : > { %7176 = vmatprep.mubr.msk.bf16.mxu0 %vm6306_vm6, %v10214_v28  ;;  %v1072_v0 = vpop.permute.xlu1 %1071  ;;  %7410 = vmatprep.subr.bf16.mxu1 %v7812_v60 }
 0x18f   : > { %vm1208_vm7 = vcmp.eq.s32.totalorder %v8243_v21, %v1072_v0  ;;  %v7079_v1 = vpop.f32.mrf.mxu0  ;;  %v1069_v2 = vpop.permute.xlu0 %1068 }
 0x190   : > { %vm1207_vm8 = vcmp.eq.s32.totalorder %v8243_v21, %v1069_v2  ;;  %v2411_v6 = vpack.c.bf16 %v7079_v1, %v7078_v61  ;;  %7411 = vmatpush3.bf16.msra.mxu1 %v7812_v60  ;;  %v7813_v1 = vld [vmem:[%s8022_s27 + $0x68] sm:$0xff]  }
 0x191   : > { %vm6308_vm9 = vmpackc.low %vm1208_vm7, %vm1207_vm8  ;;  %v1972_v3 = vpop.f32.mrf.mxu0  ;;  %7412 = vmatprep.subr.bf16.mxu1 %v7813_v1 }
 0x192   : > { %v2410_v4 = vpack.c.bf16 %v1972_v3, %v1969_v63  ;;  %v1078_v5 = vpop.permute.xlu1 %1077 }
 0x193   : > { %vm1210_vm10 = vcmp.eq.s32.totalorder %v8243_v21, %v1078_v5  ;;  %v7082_v7 = vpop.f32.mrf.mxu0  ;;  %7177 = vmatmul.mubr.msk.bf16.gmra.mxu0 %vm6308_vm9, %v10214_v28  ;;  %v1075_v8 = vpop.permute.xlu0 %1074 }
 0x194   : > { %vm1209_vm11 = vcmp.eq.s32.totalorder %v8243_v21, %v1075_v8  ;;  %7220 = vmatprep.mubr.bf16.mxu1 %v2410_v4  ;;  %7413 = vmatpush3.bf16.msra.mxu1 %v7813_v1  ;;  %v7814_v4 = vld [vmem:[%s8022_s27 + $0x60] sm:$0xff]  }
 0x195   : > { %vm6310_vm12 = vmpackc.low %vm1210_vm10, %vm1209_vm11  ;;  %v1985_v9 = vpop.f32.mrf.mxu0  ;;  %7221 = vmatmul.mubr.bf16.gmra.mxu1 %v2411_v6  ;;  %7414 = vmatprep.subr.bf16.mxu1 %v7814_v4 }
 0x196   : > { %7180 = vmatprep.mubr.msk.bf16.mxu0 %vm6310_vm12, %v10214_v28  ;;  %v1084_v10 = vpop.permute.xlu1 %1083 }
 0x197   : > { %vm1212_vm13 = vcmp.eq.s32.totalorder %v8243_v21, %v1084_v10  ;;  %v7083_v11 = vpop.f32.mrf.mxu0  ;;  %v1081_v12 = vpop.permute.xlu0 %1080 }
 0x198   : > { %vm1211_vm14 = vcmp.eq.s32.totalorder %v8243_v21, %v1081_v12  ;;  %v2413_v15 = vpack.c.bf16 %v7083_v11, %v7082_v7  ;;  %7415 = vmatpush3.bf16.msra.mxu1 %v7814_v4  ;;  %v7815_v11 = vld [vmem:[%s8022_s27 + $0xa8] sm:$0xff]  }
 0x199   : > { %vm6312_vm15 = vmpackc.low %vm1212_vm13, %vm1211_vm14  ;;  %v1988_v13 = vpop.f32.mrf.mxu0  ;;  %7332 = vmatprep.subr.bf16.mxu0 %v7815_v11 }
 0x19a   : > { %v2412_v14 = vpack.c.bf16 %v1988_v13, %v1985_v9  ;;  %v7816_v9 = vld [vmem:[%s8022_s27 + $0x58] sm:$0xff]   ;;  %v7817_v13 = vld [vmem:[%s8022_s27 + $0x50] sm:$0xff]   ;;  %7333 = vmatpush3.bf16.msra.mxu0 %v7815_v11 }
 0x19b   : > { %v7086_v17 = vpop.f32.mrf.mxu0  ;;  %7181 = vmatmul.mubr.msk.bf16.gmra.mxu0 %vm6312_vm15, %v10214_v28  ;;  %7416 = vmatprep.subr.bf16.mxu1 %v7816_v9 }
 0x19c   : > { %7224 = vmatprep.mubr.bf16.mxu1 %v2412_v14  ;;  %7417 = vmatpush3.bf16.msra.mxu1 %v7816_v9 }
 0x19d   : > { %v2001_v19 = vpop.f32.mrf.mxu0  ;;  %7225 = vmatmul.mubr.bf16.gmra.mxu1 %v2413_v15  ;;  %7418 = vmatprep.subr.bf16.mxu1 %v7817_v13 }
 0x19f   : > { %v7087_v20 = vpop.f32.mrf.mxu0 }
 0x1a0   : > { %v2415_v24 = vpack.c.bf16 %v7087_v20, %v7086_v17  ;;  %7419 = vmatpush3.bf16.msra.mxu1 %v7817_v13 }
 0x1a1   : > { %v2004_v22 = vpop.f32.mrf.mxu0 }
 0x1a2   : > { %v2414_v23 = vpack.c.bf16 %v2004_v22, %v2001_v19  ;;  %v7818_v19 = vld [vmem:[%s8022_s27 + $0x48] sm:$0xff]  }
 0x1a3   : > { %v7090_v25 = vpop.f32.mrf.mxu0  ;;  %7420 = vmatprep.subr.bf16.mxu1 %v7818_v19 }
 0x1a4   : > { %7228 = vmatprep.mubr.bf16.mxu1 %v2414_v23  ;;  %7421 = vmatpush3.bf16.msra.mxu1 %v7818_v19  ;;  %v7819_v23 = vld [vmem:[%s8022_s27 + $0x40] sm:$0xff]  }
 0x1a5   : > { %v2017_v21 = vpop.f32.mrf.mxu0  ;;  %7229 = vmatmul.mubr.bf16.gmra.mxu1 %v2415_v24  ;;  %7422 = vmatprep.subr.bf16.mxu1 %v7819_v23 }
 0x1a7   : > { %v7091_v26 = vpop.f32.mrf.mxu0 }
 0x1a8   : > { %v2417_v30 = vpack.c.bf16 %v7091_v26, %v7090_v25  ;;  %7423 = vmatpush3.bf16.msra.mxu1 %v7819_v23  ;;  %v7823_v23 = vld [vmem:[%s8022_s27 + $0x88] sm:$0xff]  }
 0x1a9   : > { %v2020_v27 = vpop.f32.mrf.mxu0 }
 0x1aa   : > { %v2416_v29 = vpack.c.bf16 %v2020_v27, %v2017_v21 }
 0x1ab   : > { %v7094_v31 = vpop.f32.mrf.mxu0 }
 0x1ac   : > { %7232 = vmatprep.mubr.bf16.mxu1 %v2416_v29 }
 0x1ad   : > { %v2033_v32 = vpop.f32.mrf.mxu0  ;;  %7233 = vmatmul.mubr.bf16.gmra.mxu1 %v2417_v30 }
 0x1af   : > { %v7095_v33 = vpop.f32.mrf.mxu0 }
 0x1b0   : > { %v2419_v36 = vpack.c.bf16 %v7095_v33, %v7094_v31 }
 0x1b1   : > { %v2036_v34 = vpop.f32.mrf.mxu0 }
 0x1b2   : > { %v2418_v35 = vpack.c.bf16 %v2036_v34, %v2033_v32 }
 0x1b3   : > { %v7098_v37 = vpop.f32.mrf.mxu0 }
 0x1b4   : > { %7236 = vmatprep.mubr.bf16.mxu1 %v2418_v35 }
 0x1b5   : > { %v2049_v38 = vpop.f32.mrf.mxu0  ;;  %7237 = vmatmul.mubr.bf16.gmra.mxu1 %v2419_v36 }
 0x1b7   : > { %v7099_v39 = vpop.f32.mrf.mxu0 }
 0x1b8   : > { %v2421_v42 = vpack.c.bf16 %v7099_v39, %v7098_v37 }
 0x1b9   : > { %v2052_v40 = vpop.f32.mrf.mxu0 }
 0x1ba   : > { %v2420_v41 = vpack.c.bf16 %v2052_v40, %v2049_v38 }
 0x1bb   : > { %v7102_v43 = vpop.f32.mrf.mxu0 }
 0x1bc   : > { %7240 = vmatprep.mubr.bf16.mxu1 %v2420_v41  ;;  %v7820_v41 = vld [vmem:[%s8022_s27 + $0xa0] sm:$0xff]  }
 0x1bd   : > { %v2065_v44 = vpop.f32.mrf.mxu0  ;;  %7241 = vmatmul.mubr.bf16.gmra.mxu1 %v2421_v42  ;;  %7334 = vmatprep.subr.bf16.mxu0 %v7820_v41 }
 0x1be   : > { %7335 = vmatpush3.bf16.msra.mxu0 %v7820_v41 }
 0x1bf   : > { %v7103_v46 = vpop.f32.mrf.mxu0 }
 0x1c0   : > { %v2423_v49 = vpack.c.bf16 %v7103_v46, %v7102_v43 }
 0x1c1   : > { %v2068_v47 = vpop.f32.mrf.mxu0 }
 0x1c2   : > { %v2422_v48 = vpack.c.bf16 %v2068_v47, %v2065_v44 }
 0x1c3   : > { %v7106_v50 = vpop.f32.mrf.mxu0 }
 0x1c4   : > { %7244 = vmatprep.mubr.bf16.mxu1 %v2422_v48 }
 0x1c5   : > { %v2081_v51 = vpop.f32.mrf.mxu0  ;;  %7245 = vmatmul.mubr.bf16.gmra.mxu1 %v2423_v49 }
 0x1c7   : > { %v7107_v52 = vpop.f32.mrf.mxu0 }
 0x1c8   : > { %v2425_v55 = vpack.c.bf16 %v7107_v52, %v7106_v50 }
 0x1c9   : > { %v2084_v53 = vpop.f32.mrf.mxu0 }
 0x1ca   : > { %v2424_v54 = vpack.c.bf16 %v2084_v53, %v2081_v51 }
 0x1cb   : > { %v7110_v56 = vpop.f32.mrf.mxu0 }
 0x1cc   : > { %7248 = vmatprep.mubr.bf16.mxu1 %v2424_v54 }
 0x1cd   : > { %v2097_v58 = vpop.f32.mrf.mxu0  ;;  %7249 = vmatmul.mubr.bf16.gmra.mxu1 %v2425_v55 }
 0x1cf   : > { %v7111_v59 = vpop.f32.mrf.mxu0 }
 0x1d0   : > { %v2427_v63 = vpack.c.bf16 %v7111_v59, %v7110_v56 }
 0x1d1   : > { %v2100_v61 = vpop.f32.mrf.mxu0 }
 0x1d2   : > { %v2426_v62 = vpack.c.bf16 %v2100_v61, %v2097_v58 }
 0x1d3   : > { %v7114_v0 = vpop.f32.mrf.mxu0 }
 0x1d4   : > { %7252 = vmatprep.mubr.bf16.mxu1 %v2426_v62 }
 0x1d5   : > { %v2113_v2 = vpop.f32.mrf.mxu0  ;;  %7253 = vmatmul.mubr.bf16.gmra.mxu1 %v2427_v63 }
 0x1d7   : > { %v7115_v3 = vpop.f32.mrf.mxu0 }
 0x1d8   : > { %v2429_v7 = vpack.c.bf16 %v7115_v3, %v7114_v0 }
 0x1d9   : > { %v2116_v5 = vpop.f32.mrf.mxu0 }
 0x1da   : > { %v2428_v6 = vpack.c.bf16 %v2116_v5, %v2113_v2  ;;  %v7821_v2 = vld [vmem:[%s8022_s27 + $0x98] sm:$0xff]  }
 0x1db   : > { %v7118_v8 = vpop.f32.mrf.mxu0  ;;  %7336 = vmatprep.subr.bf16.mxu0 %v7821_v2 }
 0x1dc   : > { %7256 = vmatprep.mubr.bf16.mxu1 %v2428_v6  ;;  %7337 = vmatpush3.bf16.msra.mxu0 %v7821_v2 }
 0x1dd   : > { %v2129_v10 = vpop.f32.mrf.mxu0  ;;  %7257 = vmatmul.mubr.bf16.gmra.mxu1 %v2429_v7 }
 0x1df   : > { %v7119_v12 = vpop.f32.mrf.mxu0 }
 0x1e0   : > { %v2431_v17 = vpack.c.bf16 %v7119_v12, %v7118_v8 }
 0x1e1   : > { %v2132_v14 = vpop.f32.mrf.mxu0 }
 0x1e2   : > { %v2430_v15 = vpack.c.bf16 %v2132_v14, %v2129_v10 }
 0x1e3   : > { %v7122_v18 = vpop.f32.mrf.mxu0 }
 0x1e4   : > { %7260 = vmatprep.mubr.bf16.mxu1 %v2430_v15 }
 0x1e5   : > { %v2145_v20 = vpop.f32.mrf.mxu0  ;;  %7261 = vmatmul.mubr.bf16.gmra.mxu1 %v2431_v17  ;;  %v7822_v17 = vld [vmem:[%s8022_s27 + $0x90] sm:$0xff]  }
 0x1e6   : > { %7338 = vmatprep.subr.bf16.mxu0 %v7822_v17 }
 0x1e7   : > { %v7123_v22 = vpop.f32.mrf.mxu0  ;;  %7339 = vmatpush3.bf16.msra.mxu0 %v7822_v17 }
 0x1e8   : > { %v2433_v21 = vpack.c.bf16 %v7123_v22, %v7122_v18  ;;  %7340 = vmatprep.subr.bf16.mxu0 %v7823_v23 }
 0x1e9   : > { %v2148_v24 = vpop.f32.mrf.mxu0 }
 0x1ea   : > { %v2432_v25 = vpack.c.bf16 %v2148_v24, %v2145_v20 }
 0x1eb   : > { %v7126_v26 = vpop.f32.mrf.mxu0  ;;  %7341 = vmatpush3.bf16.msra.mxu0 %v7823_v23 }
 0x1ec   : > { %7264 = vmatprep.mubr.bf16.mxu1 %v2432_v25 }
 0x1ed   : > { %v2161_v27 = vpop.f32.mrf.mxu0  ;;  %7265 = vmatmul.mubr.bf16.gmra.mxu1 %v2433_v21 }
 0x1ef   : > { %v7127_v29 = vpop.f32.mrf.mxu0 }
 0x1f0   : > { %v2435_v32 = vpack.c.bf16 %v7127_v29, %v7126_v26 }
 0x1f1   : > { %v2164_v30 = vpop.f32.mrf.mxu0 }
 0x1f2   : > { %v2434_v31 = vpack.c.bf16 %v2164_v30, %v2161_v27  ;;  %v7824_v30 = vld [vmem:[%s8022_s27 + $0x80] sm:$0xff]  }
 0x1f3   : > { %v7130_v33 = vpop.f32.mrf.mxu0  ;;  %7342 = vmatprep.subr.bf16.mxu0 %v7824_v30 }
 0x1f4   : > { %7268 = vmatprep.mubr.bf16.mxu1 %v2434_v31  ;;  %7343 = vmatpush3.bf16.msra.mxu0 %v7824_v30 }
 0x1f5   : > { %v2177_v34 = vpop.f32.mrf.mxu0  ;;  %7269 = vmatmul.mubr.bf16.gmra.mxu1 %v2435_v32 }
 0x1f7   : > { %v7131_v35 = vpop.f32.mrf.mxu0 }
 0x1f8   : > { %v2437_v38 = vpack.c.bf16 %v7131_v35, %v7130_v33 }
 0x1f9   : > { %v2180_v36 = vpop.f32.mrf.mxu0 }
 0x1fa   : > { %v2436_v37 = vpack.c.bf16 %v2180_v36, %v2177_v34 }
 0x1fb   : > { %v7134_v39 = vpop.f32.mrf.mxu0 }
 0x1fc   : > { %7272 = vmatprep.mubr.bf16.mxu1 %v2436_v37 }
 0x1fd   : > { %v2193_v40 = vpop.f32.mrf.mxu0  ;;  %7273 = vmatmul.mubr.bf16.gmra.mxu1 %v2437_v38 }
 0x1ff   : > { %v7135_v42 = vpop.f32.mrf.mxu0 }
 0x200   : > { %v2439_v45 = vpack.c.bf16 %v7135_v42, %v7134_v39 }
 0x201   : > { %v2196_v43 = vpop.f32.mrf.mxu0 }
 0x202   : > { %v2438_v44 = vpack.c.bf16 %v2196_v43, %v2193_v40 }
 0x203   : > { %v7138_v46 = vpop.f32.mrf.mxu0 }
 0x204   : > { %7276 = vmatprep.mubr.bf16.mxu1 %v2438_v44 }
 0x205   : > { %v2209_v47 = vpop.f32.mrf.mxu0  ;;  %7277 = vmatmul.mubr.bf16.gmra.mxu1 %v2439_v45 }
 0x207   : > { %v7139_v48 = vpop.f32.mrf.mxu0 }
 0x208   : > { %v2441_v51 = vpack.c.bf16 %v7139_v48, %v7138_v46 }
 0x209   : > { %v2212_v49 = vpop.f32.mrf.mxu0 }
 0x20a   : > { %v2440_v50 = vpack.c.bf16 %v2212_v49, %v2209_v47 }
 0x20b   : > { %v7142_v52 = vpop.f32.mrf.mxu0 }
 0x20c   : > { %7280 = vmatprep.mubr.bf16.mxu1 %v2440_v50 }
 0x20d   : > { %v2225_v53 = vpop.f32.mrf.mxu0  ;;  %7281 = vmatmul.mubr.bf16.gmra.mxu1 %v2441_v51 }
 0x20f   : > { %v7143_v54 = vpop.f32.mrf.mxu0 }
 0x210   : > { %v2443_v57 = vpack.c.bf16 %v7143_v54, %v7142_v52 }
 0x211   : > { %v2228_v55 = vpop.f32.mrf.mxu0 }
 0x212   : > { %v2442_v56 = vpack.c.bf16 %v2228_v55, %v2225_v53 }
 0x213   : > { %v7146_v58 = vpop.f32.mrf.mxu0 }
 0x214   : > { %7284 = vmatprep.mubr.bf16.mxu1 %v2442_v56 }
 0x215   : > { %v2241_v59 = vpop.f32.mrf.mxu0  ;;  %7285 = vmatmul.mubr.bf16.gmra.mxu1 %v2443_v57 }
 0x217   : > { %v7147_v60 = vpop.f32.mrf.mxu0 }
 0x218   : > { %v2445_v63 = vpack.c.bf16 %v7147_v60, %v7146_v58 }
 0x219   : > { %v2244_v61 = vpop.f32.mrf.mxu0 }
 0x21a   : > { %v2444_v62 = vpack.c.bf16 %v2244_v61, %v2241_v59 }
 0x21b   : > { %v7150_v0 = vpop.f32.mrf.mxu0 }
 0x21c   : > { %7288 = vmatprep.mubr.bf16.mxu1 %v2444_v62 }
 0x21d   : > { %v2257_v1 = vpop.f32.mrf.mxu0  ;;  %7289 = vmatmul.mubr.bf16.gmra.mxu1 %v2445_v63 }
 0x21f   : > { %v7151_v3 = vpop.f32.mrf.mxu0 }
 0x220   : > { %v2447_v6 = vpack.c.bf16 %v7151_v3, %v7150_v0 }
 0x221   : > { %v2260_v4 = vpop.f32.mrf.mxu0 }
 0x222   : > { %v2446_v5 = vpack.c.bf16 %v2260_v4, %v2257_v1  ;;  %v8692_v1 = vshrl.u32 %v699_v16, 7 }
 0x223   : > { %v7154_v7 = vpop.f32.mrf.mxu0 }
 0x224   : > { %7292 = vmatprep.mubr.bf16.mxu1 %v2446_v5  ;;  %10225 = vst [vmem:[#allocation7_spill] sm:$0xff] %v8692_v1 }
 0x225   : > { %v2273_v8 = vpop.f32.mrf.mxu0  ;;  %7293 = vmatmul.mubr.bf16.gmra.mxu1 %v2447_v6 }
 0x227   : > { %v7155_v9 = vpop.f32.mrf.mxu0 }
 0x228   : > { %v2449_v12 = vpack.c.bf16 %v7155_v9, %v7154_v7  ;;  %v570_v9 = vld [vmem:[%s8017_s23] sm:$0xff] }
 0x229   : > { %v2276_v10 = vpop.f32.mrf.mxu0 }
 0x22a   : > { %v2448_v11 = vpack.c.bf16 %v2276_v10, %v2273_v8  ;;  %v8699_v8 = vsub.s32 0, %v8692_v1 }
 0x22b   : > { %v7158_v13 = vpop.f32.mrf.mxu0 }
 0x22c   : > { %7296 = vmatprep.mubr.bf16.mxu1 %v2448_v11  ;;  %10226 = vst [vmem:[#allocation8_spill] sm:$0xff] %v8699_v8 }
 0x22d   : > { %v2289_v14 = vpop.f32.mrf.mxu0  ;;  %v8650_v15 = vpop.f32.mrf.mxu1  ;;  %7297 = vmatmul.mubr.bf16.gmra.mxu1 %v2449_v12 }
 0x22f   : > { %v7159_v18 = vpop.f32.mrf.mxu0  ;;  %v8653_v19 = vpop.f32.mrf.mxu1 }
 0x230   : > { %v2451_v25 = vpack.c.bf16 %v7159_v18, %v7158_v13  ;;  %v8707_v13 = vrot.slane %v570_v9, %v8699_v8 }
 0x231   : > { %v2292_v20 = vpop.f32.mrf.mxu0  ;;  %v8655_v22 = vpop.f32.mrf.mxu1 }
 0x232   : > { %v2450_v24 = vpack.c.bf16 %v2292_v20, %v2289_v14 }
 0x233   : > { %v7162_v21 = vpop.f32.mrf.mxu0  ;;  %v8658_v26 = vpop.f32.mrf.mxu1 }
 0x234   : > { %7300 = vmatprep.mubr.bf16.mxu1 %v2450_v24  ;;  %v2554_v23 = vadd.f32 %v8658_v26, %v8707_v13  ;;  %v2562_v26 = vadd.f32 %v8655_v22, %v8707_v13 }
 0x235   : > { %v2305_v27 = vpop.f32.mrf.mxu0  ;;  %v8660_v29 = vpop.f32.mrf.mxu1  ;;  %7301 = vmatmul.mubr.bf16.gmra.mxu1 %v2451_v25 }
 0x237   : > { %v7163_v31 = vpop.f32.mrf.mxu0  ;;  %v8663_v32 = vpop.f32.mrf.mxu1 }
 0x238   : > { %v2453_v36 = vpack.c.bf16 %v7163_v31, %v7162_v21  ;;  %v2551_v21 = vadd.f32 %v8653_v19, %v8707_v13  ;;  %v3062_v31 = vmax.f32 %v2554_v23, 0.0 }
 0x239   : > { %v2308_v33 = vpop.f32.mrf.mxu0  ;;  %v8665_v34 = vpop.f32.mrf.mxu1 }
 0x23a   : > { %v2452_v35 = vpack.c.bf16 %v2308_v33, %v2305_v27 }
 0x23b   : > { %v7166_v37 = vpop.f32.mrf.mxu0  ;;  %v8667_v38 = vpop.f32.mrf.mxu1 }
 0x23c   : > { %7304 = vmatprep.mubr.bf16.mxu1 %v2452_v35 }
 0x23d   : > { %v2321_v39 = vpop.f32.mrf.mxu0  ;;  %v8669_v40 = vpop.f32.mrf.mxu1  ;;  %7305 = vmatmul.mubr.bf16.gmra.mxu1 %v2453_v36  ;;  %v3061_v36 = vmax.f32 %v2551_v21, 0.0 }
 0x23f   : > { %v7167_v41 = vpop.f32.mrf.mxu0  ;;  %v8671_v42 = vpop.f32.mrf.mxu1  ;;  %v3189_v19 = vpack.c.bf16 %v3062_v31, %v3061_v36 }
 0x240   : > { %v2455_v46 = vpack.c.bf16 %v7167_v41, %v7166_v37 }
 0x241   : > { %v2324_v43 = vpop.f32.mrf.mxu0  ;;  %v8673_v44 = vpop.f32.mrf.mxu1 }
 0x242   : > { %v2454_v45 = vpack.c.bf16 %v2324_v43, %v2321_v39  ;;  %v2570_v43 = vadd.f32 %v8667_v38, %v8707_v13 }
 0x243   : > { %v7170_v47 = vpop.f32.mrf.mxu0  ;;  %v8675_v48 = vpop.f32.mrf.mxu1 }
 0x244   : > { %7308 = vmatprep.mubr.bf16.mxu1 %v2454_v45  ;;  %v2559_v45 = vadd.f32 %v8650_v15, %v8707_v13 }
 0x245   : > { %v2337_v49 = vpop.f32.mrf.mxu0  ;;  %v8677_v50 = vpop.f32.mrf.mxu1  ;;  %7309 = vmatmul.mubr.bf16.gmra.mxu1 %v2455_v46 }
 0x247   : > { %v7171_v51 = vpop.f32.mrf.mxu0  ;;  %v8679_v52 = vpop.f32.mrf.mxu1 }
 0x248   : > { %v2457_v56 = vpack.c.bf16 %v7171_v51, %v7170_v47  ;;  %v2567_v47 = vadd.f32 %v8663_v32, %v8707_v13  ;;  %v3066_v51 = vmax.f32 %v2570_v43, 0.0  ;;  %v2575_v32 = vadd.f32 %v8660_v29, %v8707_v13 }
 0x249   : > { %v2340_v53 = vpop.f32.mrf.mxu0  ;;  %v8681_v54 = vpop.f32.mrf.mxu1  ;;  %v2599_v23 = vadd.f32 %v8679_v52, %v8707_v13  ;;  %v2607_v52 = vadd.f32 %v8677_v50, %v8707_v13 }
 0x24a   : > { %v2456_v55 = vpack.c.bf16 %v2340_v53, %v2337_v49  ;;  %v3064_v49 = vmax.f32 %v2562_v26, 0.0  ;;  %v3063_v53 = vmax.f32 %v2559_v45, 0.0  ;;  %v3065_v38 = vmax.f32 %v2567_v47, 0.0 }
 0x24b   : > { %v7174_v57 = vpop.f32.mrf.mxu0  ;;  %v8683_v58 = vpop.f32.mrf.mxu1  ;;  %v2610_v36 = vadd.f32 %v8681_v54, %v8707_v13  ;;  %v3075_v47 = vmax.f32 %v2607_v52, 0.0 }
 0x24c   : > { %7312 = vmatprep.mubr.bf16.mxu1 %v2456_v55 }
 0x24d   : > { %v2353_v59 = vpop.f32.mrf.mxu0  ;;  %v8685_v60 = vpop.f32.mrf.mxu1  ;;  %7313 = vmatmul.mubr.bf16.gmra.mxu1 %v2457_v56  ;;  %v3190_v56 = vpack.c.bf16 %v3064_v49, %v3063_v53 }
 0x24f   : > { %v7175_v61 = vpop.f32.mrf.mxu0  ;;  %v8687_v62 = vpop.f32.mrf.mxu1 }
 0x250   : > { %v2459_v3 = vpack.c.bf16 %v7175_v61, %v7174_v57  ;;  %v2578_v57 = vadd.f32 %v8665_v34, %v8707_v13  ;;  %v3191_v61 = vpack.c.bf16 %v3066_v51, %v3065_v38  ;;  %v2615_v43 = vadd.f32 %v8687_v62, %v8707_v13 }
 0x251   : > { %v2356_v63 = vpop.f32.mrf.mxu0  ;;  %v8689_v0 = vpop.f32.mrf.mxu1  ;;  %v2623_v62 = vadd.f32 %v8685_v60, %v8707_v13 }
 0x252   : > { %v2458_v2 = vpack.c.bf16 %v2356_v63, %v2353_v59  ;;  %v2586_v59 = vadd.f32 %v8675_v48, %v8707_v13  ;;  %v3077_v51 = vmax.f32 %v2615_v43, 0.0  ;;  %v2626_v53 = vadd.f32 %v8689_v0, %v8707_v13 }
 0x253   : > { %v7178_v4 = vpop.f32.mrf.mxu0  ;;  %v8694_v5 = vpop.f32.mrf.mxu1 }
 0x254   : > { %7316 = vmatprep.mubr.bf16.mxu1 %v2458_v2  ;;  %v2583_v2 = vadd.f32 %v8671_v42, %v8707_v13  ;;  %v3070_v34 = vmax.f32 %v2586_v59, 0.0  ;;  %v2591_v42 = vadd.f32 %v8669_v40, %v8707_v13 }
 0x255   : > { %v2369_v6 = vpop.f32.mrf.mxu0  ;;  %v8696_v7 = vpop.f32.mrf.mxu1  ;;  %7317 = vmatmul.mubr.bf16.gmra.mxu1 %v2459_v3  ;;  %v3068_v3 = vmax.f32 %v2578_v57, 0.0 }
 0x257   : > { %v7179_v10 = vpop.f32.mrf.mxu0  ;;  %v8702_v11 = vpop.f32.mrf.mxu1 }
 0x258   : > { %v2461_v17 = vpack.c.bf16 %v7179_v10, %v7178_v4  ;;  %v3069_v10 = vmax.f32 %v2583_v2, 0.0  ;;  %v2631_v59 = vadd.f32 %v8702_v11, %v8707_v13  ;;  %v3079_v2 = vmax.f32 %v2623_v62, 0.0 }
 0x259   : > { %v2372_v12 = vpop.f32.mrf.mxu0  ;;  %v8704_v16 = vpop.f32.mrf.mxu1  ;;  %v2639_v11 = vadd.f32 %v8696_v7, %v8707_v13 }
 0x25a   : > { %v2460_v14 = vpack.c.bf16 %v2372_v12, %v2369_v6  ;;  %v3067_v6 = vmax.f32 %v2575_v32, 0.0  ;;  %v2594_v12 = vadd.f32 %v8673_v44, %v8707_v13 }
 0x25b   : > { %v7182_v18 = vpop.f32.mrf.mxu0  ;;  %v8709_v20 = vpop.f32.mrf.mxu1 }
 0x25c   : > { %7320 = vmatprep.mubr.bf16.mxu1 %v2460_v14  ;;  %v3192_v48 = vpack.c.bf16 %v3068_v3, %v3067_v6  ;;  %v2602_v14 = vadd.f32 %v8683_v58, %v8707_v13  ;;  %v2634_v38 = vadd.f32 %v8709_v20, %v8707_v13  ;;  %v2642_v6 = vadd.f32 %v8704_v16, %v8707_v13 }
 0x25d   : > { %v2385_v24 = vpop.f32.mrf.mxu0  ;;  %v8713_v25 = vpop.f32.mrf.mxu1  ;;  %7321 = vmatmul.mubr.bf16.gmra.mxu1 %v2461_v17  ;;  %v3193_v17 = vpack.c.bf16 %v3070_v34, %v3069_v10  ;;  %v3081_v34 = vmax.f32 %v2631_v59, 0.0 }
 0x25e   : > { %v3074_v44 = vmax.f32 %v2602_v14, 0.0  ;;  %v3082_v0 = vmax.f32 %v2634_v38, 0.0 }
 0x25f   : > { %v7183_v27 = vpop.f32.mrf.mxu0  ;;  %v8717_v30 = vpop.f32.mrf.mxu1 }
 0x260   : > { %v2463_v39 = vpack.c.bf16 %v7183_v27, %v7182_v18  ;;  %v3071_v27 = vmax.f32 %v2591_v42, 0.0  ;;  %v2647_v14 = vadd.f32 %v8717_v30, %v8707_v13 }
 0x261   : > { %v2388_v33 = vpop.f32.mrf.mxu0  ;;  %v8719_v35 = vpop.f32.mrf.mxu1 }
 0x262   : > { %v2462_v37 = vpack.c.bf16 %v2388_v33, %v2385_v24  ;;  %v3072_v24 = vmax.f32 %v2594_v12, 0.0  ;;  %v3073_v33 = vmax.f32 %v2599_v23, 0.0  ;;  %v3083_v23 = vmax.f32 %v2639_v11, 0.0 }
 0x263   : > { %v8723_v41 = vpop.f32.mrf.mxu1  ;;  %v2658_v7 = vadd.f32 %v8719_v35, %v8707_v13 }
 0x264   : > { %7324 = vmatprep.mubr.bf16.mxu1 %v2462_v37  ;;  %v3194_v58 = vpack.c.bf16 %v3072_v24, %v3071_v27  ;;  %v2618_v37 = vadd.f32 %v8694_v5, %v8707_v13  ;;  %v3195_v26 = vpack.c.bf16 %v3074_v44, %v3073_v33  ;;  %v2650_v10 = vadd.f32 %v8723_v41, %v8707_v13 }
 0x265   : > { %v8729_v46 = vpop.f32.mrf.mxu1  ;;  %7325 = vmatmul.mubr.bf16.gmra.mxu1 %v2463_v39  ;;  %v3085_v44 = vmax.f32 %v2647_v14, 0.0 }
 0x266   : > { %7424 = vmatprep.mubr.bf16.mxu1 %v3189_v19  ;;  %v3076_v19 = vmax.f32 %v2610_v36, 0.0  ;;  %v3078_v54 = vmax.f32 %v2618_v37, 0.0  ;;  %v3086_v16 = vmax.f32 %v2650_v10, 0.0 }
 0x267   : > { %v8733_v22 = vpop.f32.mrf.mxu1 }
 0x268   : > { %v3196_v5 = vpack.c.bf16 %v3076_v19, %v3075_v47  ;;  %v3201_v30 = vpack.c.bf16 %v3086_v16, %v3085_v44  ;;  %v2663_v37 = vadd.f32 %v8733_v22, %v8707_v13 }
 0x269   : > { %v8735_v55 = vpop.f32.mrf.mxu1 }
 0x26b   : > { %v8739_v15 = vpop.f32.mrf.mxu1 }
 0x26c   : > { %v2666_v33 = vadd.f32 %v8739_v15, %v8707_v13  ;;  %v3089_v15 = vmax.f32 %v2663_v37, 0.0 }
 0x26d   : > { %v8745_v63 = vpop.f32.mrf.mxu1  ;;  %7425 = vmatmul.mubr.bf16.vlgmr.msra.gmra.mxu1 %v3190_v56  ;;  %v3197_v56 = vpack.c.bf16 %v3078_v54, %v3077_v51  ;;  %v8834_v54 = vld [vmem:[%s8022_s27 + $0xf8] sm:$0xff]  }
 0x26e   : > { %7428 = vmatprep.mubr.bf16.mxu1 %v3191_v61  ;;  %v3080_v61 = vmax.f32 %v2626_v53, 0.0  ;;  %v3090_v35 = vmax.f32 %v2666_v33, 0.0  ;;  %7488 = vmatprep.subr.bf16.mxu0 %v8834_v54  ;;  %v2671_v53 = vadd.f32 %v8729_v46, %v8707_v13 }
 0x26f   : > { %v8749_v4 = vpop.f32.mrf.mxu1 }
 0x270   : > { %v3198_v20 = vpack.c.bf16 %v3080_v61, %v3079_v2  ;;  %v3091_v61 = vmax.f32 %v2671_v53, 0.0 }
 0x271   : > { %v8751_v9 = vpop.f32.mrf.mxu1 }
 0x273   : > { %v8755_v29 = vpop.f32.mrf.mxu1 }
 0x274   : > { %v2682_v22 = vadd.f32 %v8755_v29, %v8707_v13 }
 0x275   : > { %v8761_v18 = vpop.f32.mrf.mxu1  ;;  %7429 = vmatmul.mubr.bf16.gmra.mxu1 %v3192_v48  ;;  %v3199_v48 = vpack.c.bf16 %v3082_v0, %v3081_v34  ;;  %v2690_v34 = vadd.f32 %v8751_v9, %v8707_v13 }
 0x276   : > { %7432 = vmatprep.mubr.bf16.mxu1 %v3193_v17  ;;  %v3084_v17 = vmax.f32 %v2642_v6, 0.0  ;;  %v3094_v59 = vmax.f32 %v2682_v22, 0.0 }
 0x277   : > { %v8765_v21 = vpop.f32.mrf.mxu1  ;;  %v3096_v11 = vmax.f32 %v2690_v34, 0.0 }
 0x278   : > { %v3200_v41 = vpack.c.bf16 %v3084_v17, %v3083_v23 }
 0x279   : > { %v8767_v31 = vpop.f32.mrf.mxu1 }
 0x27a   : > { %v2706_v44 = vadd.f32 %v8767_v31, %v8707_v13 }
 0x27b   : > { %v8771_v40 = vpop.f32.mrf.mxu1 }
 0x27d   : > { %v8777_v39 = vpop.f32.mrf.mxu1  ;;  %7433 = vmatmul.mubr.bf16.gmra.mxu1 %v3194_v58  ;;  %v2655_v58 = vadd.f32 %v8713_v25, %v8707_v13  ;;  %v2674_v25 = vadd.f32 %v8735_v55, %v8707_v13 }
 0x27e   : > { %7436 = vmatprep.mubr.bf16.mxu1 %v3195_v26  ;;  %v3088_v26 = vmax.f32 %v2658_v7, 0.0 }
 0x27f   : > { %v8781_v45 = vpop.f32.mrf.mxu1  ;;  %v3087_v43 = vmax.f32 %v2655_v58, 0.0  ;;  %v3092_v62 = vmax.f32 %v2674_v25, 0.0  ;;  %v3100_v58 = vmax.f32 %v2706_v44, 0.0 }
 0x281   : > { %v8783_v49 = vpop.f32.mrf.mxu1  ;;  %v3202_v47 = vpack.c.bf16 %v3088_v26, %v3087_v43  ;;  %v3204_v29 = vpack.c.bf16 %v3092_v62, %v3091_v61 }
 0x283   : > { %v8787_v50 = vpop.f32.mrf.mxu1 }
 0x285   : > { %v8793_v57 = vpop.f32.mrf.mxu1  ;;  %7437 = vmatmul.mubr.bf16.gmra.mxu1 %v3196_v5  ;;  %v3203_v5 = vpack.c.bf16 %v3090_v35, %v3089_v15 }
 0x286   : > { %7440 = vmatprep.mubr.bf16.mxu1 %v3197_v56  ;;  %v2679_v56 = vadd.f32 %v8749_v4, %v8707_v13  ;;  %v2687_v4 = vadd.f32 %v8745_v63, %v8707_v13 }
 0x287   : > { %v8797_v32 = vpop.f32.mrf.mxu1 }
 0x288   : > { %v3093_v2 = vmax.f32 %v2679_v56, 0.0  ;;  %v3095_v17 = vmax.f32 %v2687_v4, 0.0  ;;  %v2719_v56 = vadd.f32 %v8777_v39, %v8707_v13  ;;  %v2727_v61 = vadd.f32 %v8797_v32, %v8707_v13 }
 0x289   : > { %v8799_v3 = vpop.f32.mrf.mxu1 }
 0x28a   : > { %v3205_v6 = vpack.c.bf16 %v3094_v59, %v3093_v2  ;;  %v3103_v4 = vmax.f32 %v2719_v56, 0.0  ;;  %v3105_v39 = vmax.f32 %v2727_v61, 0.0 }
 0x28b   : > { %v8803_v60 = vpop.f32.mrf.mxu1 }
 0x28d   : > { %v8809_v12 = vpop.f32.mrf.mxu1  ;;  %7441 = vmatmul.mubr.bf16.gmra.mxu1 %v3198_v20  ;;  %v2698_v20 = vadd.f32 %v8771_v40, %v8707_v13  ;;  %v3206_v40 = vpack.c.bf16 %v3096_v11, %v3095_v17 }
 0x28e   : > { %7444 = vmatprep.mubr.bf16.mxu1 %v3199_v48  ;;  %v2695_v48 = vadd.f32 %v8765_v21, %v8707_v13  ;;  %v2703_v21 = vadd.f32 %v8761_v18, %v8707_v13  ;;  %v2722_v18 = vadd.f32 %v8783_v49, %v8707_v13 }
 0x28f   : > { %v8813_v42 = vpop.f32.mrf.mxu1  ;;  %v3098_v9 = vmax.f32 %v2698_v20, 0.0 }
 0x290   : > { %v3097_v23 = vmax.f32 %v2695_v48, 0.0  ;;  %v3099_v35 = vmax.f32 %v2703_v21, 0.0 }
 0x291   : > { %v8815_v24 = vpop.f32.mrf.mxu1 }
 0x292   : > { %v3207_v7 = vpack.c.bf16 %v3098_v9, %v3097_v23  ;;  %v7826_v9 = vld [vmem:[%s8022_s27 + $0xf0] sm:$0xff]  }
 0x293   : > { %v8819_v27 = vpop.f32.mrf.mxu1 }
 0x295   : > { %v8825_v36 = vpop.f32.mrf.mxu1  ;;  %7445 = vmatmul.mubr.bf16.gmra.mxu1 %v3200_v41  ;;  %v2714_v41 = vadd.f32 %v8787_v50, %v8707_v13 }
 0x296   : > { %7448 = vmatprep.mubr.bf16.mxu1 %v3201_v30  ;;  %v2711_v30 = vadd.f32 %v8781_v45, %v8707_v13  ;;  %v2730_v45 = vadd.f32 %v8803_v60, %v8707_v13 }
 0x297   : > { %v8829_v52 = vpop.f32.mrf.mxu1  ;;  %v3102_v26 = vmax.f32 %v2714_v41, 0.0 }
 0x298   : > { %v3101_v43 = vmax.f32 %v2711_v30, 0.0  ;;  %v3106_v60 = vmax.f32 %v2730_v45, 0.0  ;;  %v2735_v30 = vadd.f32 %v8793_v57, %v8707_v13 }
 0x299   : > { %v8831_v19 = vpop.f32.mrf.mxu1 }
 0x29a   : > { %v3209_v53 = vpack.c.bf16 %v3102_v26, %v3101_v43  ;;  %v2743_v26 = vadd.f32 %v8813_v42, %v8707_v13 }
 0x29b   : > { %v8838_v51 = vpop.f32.mrf.mxu1 }
 0x29d   : > { %v8845_v38 = vpop.f32.mrf.mxu1  ;;  %7449 = vmatmul.mubr.bf16.gmra.mxu1 %v3202_v47  ;;  %v3208_v47 = vpack.c.bf16 %v3100_v58, %v3099_v35 }
 0x29e   : > { %7452 = vmatprep.mubr.bf16.mxu1 %v3203_v5 }
 0x29f   : > { %v8849_v55 = vpop.f32.mrf.mxu1 }
 0x2a1   : > { %v8851_v0 = vpop.f32.mrf.mxu1 }
 0x2a3   : > { %v8855_v46 = vpop.f32.mrf.mxu1 }
 0x2a5   : > { %v8861_v10 = vpop.f32.mrf.mxu1  ;;  %7453 = vmatmul.mubr.bf16.gmra.mxu1 %v3204_v29  ;;  %v3104_v29 = vmax.f32 %v2722_v18, 0.0 }
 0x2a6   : > { %7456 = vmatprep.mubr.bf16.mxu1 %v3205_v6 }
 0x2a7   : > { %v8865_v14 = vpop.f32.mrf.mxu1  ;;  %v3210_v32 = vpack.c.bf16 %v3104_v29, %v3103_v4 }
 0x2a9   : > { %v8867_v16 = vpop.f32.mrf.mxu1 }
 0x2ab   : > { %v8871_v63 = vpop.f32.mrf.mxu1 }
 0x2ad   : > { %v7266_v33 = vpop.f32.mrf.mxu1  ;;  %7457 = vmatmul.mubr.bf16.gmra.mxu1 %v3206_v40  ;;  %v2738_v40 = vadd.f32 %v8799_v3, %v8707_v13  ;;  %v7827_v3 = vld [vmem:[%s8022_s27 + $0xe8] sm:$0xff]  }
 0x2ae   : > { %7460 = vmatprep.mubr.bf16.mxu1 %v3207_v7  ;;  %v2815_v25 = vadd.f32 %v7266_v33, %v8707_v13  ;;  %v2746_v7 = vadd.f32 %v8819_v27, %v8707_v13  ;;  %v3211_v33 = vpack.c.bf16 %v3106_v60, %v3105_v39 }
 0x2af   : > { %v2806_v37 = vpop.f32.mrf.mxu1  ;;  %v3108_v27 = vmax.f32 %v2738_v40, 0.0 }
 0x2b0   : > { %v2807_v15 = vadd.f32 %v2806_v37, %v8707_v13  ;;  %v3127_v34 = vmax.f32 %v2815_v25, 0.0  ;;  %v7828_v25 = vld [vmem:[%s8022_s27 + $0xe0] sm:$0xff]  }
 0x2b1   : > { %v7267_v31 = vpop.f32.mrf.mxu1 }
 0x2b2   : > { %v2818_v50 = vadd.f32 %v7267_v31, %v8707_v13  ;;  %v3125_v49 = vmax.f32 %v2807_v15, 0.0 }
 0x2b3   : > { %v2809_v22 = vpop.f32.mrf.mxu1 }
 0x2b4   : > { %v2810_v5 = vadd.f32 %v2809_v22, %v8707_v13  ;;  %v3128_v62 = vmax.f32 %v2818_v50, 0.0  ;;  %v3110_v50 = vmax.f32 %v2746_v7, 0.0  ;;  %v3109_v22 = vmax.f32 %v2743_v26, 0.0 }
 0x2b5   : > { %v7270_v59 = vpop.f32.mrf.mxu1  ;;  %7461 = vmatmul.mubr.bf16.gmra.mxu1 %v3208_v47  ;;  %v3107_v47 = vmax.f32 %v2735_v30, 0.0 }
 0x2b6   : > { %v3126_v2 = vmax.f32 %v2810_v5, 0.0  ;;  %7464 = vmatprep.mubr.bf16.mxu1 %v3209_v53  ;;  %v3222_v48 = vpack.c.bf16 %v3128_v62, %v3127_v34  ;;  %v2831_v44 = vadd.f32 %v7270_v59, %v8707_v13  ;;  %v2754_v53 = vadd.f32 %v8815_v24, %v8707_v13  ;;  %v7829_v24 = vld [vmem:[%s8022_s27 + $0xd8] sm:$0xff]  }
 0x2b7   : > { %v2822_v20 = vpop.f32.mrf.mxu1  ;;  %v3212_v42 = vpack.c.bf16 %v3108_v27, %v3107_v47  ;;  %v2762_v59 = vadd.f32 %v8838_v51, %v8707_v13 }
 0x2b8   : > { %v3221_v6 = vpack.c.bf16 %v3126_v2, %v3125_v49  ;;  %v2823_v17 = vadd.f32 %v2822_v20, %v8707_v13  ;;  %v3131_v43 = vmax.f32 %v2831_v44, 0.0  ;;  %v3213_v49 = vpack.c.bf16 %v3110_v50, %v3109_v22 }
 0x2b9   : > { %v7271_v11 = vpop.f32.mrf.mxu1  ;;  %v2751_v2 = vadd.f32 %v8809_v12, %v8707_v13  ;;  %v2759_v20 = vadd.f32 %v8829_v52, %v8707_v13  ;;  %v3112_v51 = vmax.f32 %v2754_v53, 0.0 }
 0x2ba   : > { %v2834_v23 = vadd.f32 %v7271_v11, %v8707_v13  ;;  %7344 = vmatprep.mubr.bf16.mxu0 %v3221_v6  ;;  %v3129_v35 = vmax.f32 %v2823_v17, 0.0  ;;  %v3114_v11 = vmax.f32 %v2762_v59, 0.0 }
 0x2bb   : > { %v2825_v41 = vpop.f32.mrf.mxu1  ;;  %7345 = vmatmul.mubr.bf16.vlgmr.msra.gmra.mxu0 %v3222_v48  ;;  %v3111_v39 = vmax.f32 %v2751_v2, 0.0 }
 0x2bc   : > { %v2826_v21 = vadd.f32 %v2825_v41, %v8707_v13  ;;  %7489 = vmatpush3.bf16.msra.mxu0 %v8834_v54  ;;  %v3132_v58 = vmax.f32 %v2834_v23, 0.0  ;;  %v7830_v23 = vld [vmem:[%s8022_s27 + $0xd0] sm:$0xff]   ;;  %v2770_v41 = vadd.f32 %v8831_v19, %v8707_v13  ;;  %v7831_v19 = vld [vmem:[%s8022_s27 + $0xc8] sm:$0xff]  }
 0x2bd   : > { %v7274_v37 = vpop.f32.mrf.mxu1  ;;  %7465 = vmatmul.mubr.bf16.gmra.mxu1 %v3210_v32  ;;  %7490 = vmatprep.subr.bf16.mxu0 %v7826_v9  ;;  %v3113_v32 = vmax.f32 %v2759_v20, 0.0  ;;  %v3214_v52 = vpack.c.bf16 %v3112_v51, %v3111_v39 }
 0x2be   : > { %v3130_v31 = vmax.f32 %v2826_v21, 0.0  ;;  %7468 = vmatprep.mubr.bf16.mxu1 %v3211_v33  ;;  %v3224_v57 = vpack.c.bf16 %v3132_v58, %v3131_v43  ;;  %v2847_v56 = vadd.f32 %v7274_v37, %v8707_v13  ;;  %v2778_v33 = vadd.f32 %v8855_v46, %v8707_v13 }
 0x2bf   : > { %v2838_v15 = vpop.f32.mrf.mxu1  ;;  %v3215_v58 = vpack.c.bf16 %v3114_v11, %v3113_v32  ;;  %v2767_v37 = vadd.f32 %v8825_v36, %v8707_v13  ;;  %v3116_v46 = vmax.f32 %v2770_v41, 0.0 }
 0x2c0   : > { %v3223_v54 = vpack.c.bf16 %v3130_v31, %v3129_v35  ;;  %7491 = vmatpush3.bf16.msra.mxu0 %v7826_v9  ;;  %v2839_v45 = vadd.f32 %v2838_v15, %v8707_v13  ;;  %v3135_v4 = vmax.f32 %v2847_v56, 0.0  ;;  %v2775_v35 = vadd.f32 %v8849_v55, %v8707_v13 }
 0x2c1   : > { %v7275_v18 = vpop.f32.mrf.mxu1  ;;  %7492 = vmatprep.subr.bf16.mxu0 %v7827_v3  ;;  %v3118_v50 = vmax.f32 %v2778_v33, 0.0  ;;  %v3115_v47 = vmax.f32 %v2767_v37, 0.0  ;;  %v2794_v56 = vadd.f32 %v8871_v63, %v8707_v13 }
 0x2c2   : > { %v2850_v5 = vadd.f32 %v7275_v18, %v8707_v13  ;;  %7348 = vmatprep.mubr.bf16.mxu0 %v3223_v54  ;;  %v3133_v60 = vmax.f32 %v2839_v45, 0.0  ;;  %v7832_v18 = vld [vmem:[%s8022_s27 + $0xc0] sm:$0xff]  }
 0x2c3   : > { %v2841_v62 = vpop.f32.mrf.mxu1  ;;  %7349 = vmatmul.mubr.bf16.gmra.mxu0 %v3224_v57  ;;  %v3216_v55 = vpack.c.bf16 %v3116_v46, %v3115_v47 }
 0x2c4   : > { %v2842_v61 = vadd.f32 %v2841_v62, %v8707_v13  ;;  %7493 = vmatpush3.bf16.msra.mxu0 %v7827_v3  ;;  %v3136_v29 = vmax.f32 %v2850_v5, 0.0  ;;  %v2786_v5 = vadd.f32 %v8851_v0, %v8707_v13  ;;  %v2791_v0 = vadd.f32 %v8865_v14, %v8707_v13 }
 0x2c5   : > { %v7278_v34 = vpop.f32.mrf.mxu1  ;;  %7469 = vmatmul.mubr.bf16.gmra.mxu1 %v3212_v42  ;;  %7494 = vmatprep.subr.bf16.mxu0 %v7828_v25  ;;  %v2802_v14 = vadd.f32 %v8867_v16, %v8707_v13 }
 0x2c6   : > { %v3134_v6 = vmax.f32 %v2842_v61, 0.0  ;;  %7472 = vmatprep.mubr.bf16.mxu1 %v3213_v49  ;;  %v3226_v12 = vpack.c.bf16 %v3136_v29, %v3135_v4  ;;  %v2863_v7 = vadd.f32 %v7278_v34, %v8707_v13  ;;  %v2783_v61 = vadd.f32 %v8845_v38, %v8707_v13 }
 0x2c7   : > { %v2854_v48 = vpop.f32.mrf.mxu1  ;;  %v3121_v38 = vmax.f32 %v2791_v0, 0.0 }
 0x2c8   : > { %v3225_v9 = vpack.c.bf16 %v3134_v6, %v3133_v60  ;;  %7495 = vmatpush3.bf16.msra.mxu0 %v7828_v25  ;;  %v2855_v40 = vadd.f32 %v2854_v48, %v8707_v13  ;;  %v3139_v43 = vmax.f32 %v2863_v7, 0.0  ;;  %v3117_v25 = vmax.f32 %v2775_v35, 0.0 }
 0x2c9   : > { %v7279_v17 = vpop.f32.mrf.mxu1  ;;  %7496 = vmatprep.subr.bf16.mxu0 %v7829_v24  ;;  %v3122_v60 = vmax.f32 %v2794_v56, 0.0  ;;  %v3119_v51 = vmax.f32 %v2783_v61, 0.0 }
 0x2ca   : > { %v2866_v44 = vadd.f32 %v7279_v17, %v8707_v13  ;;  %7352 = vmatprep.mubr.bf16.mxu0 %v3225_v9  ;;  %v3137_v31 = vmax.f32 %v2855_v40, 0.0  ;;  %v3217_v59 = vpack.c.bf16 %v3118_v50, %v3117_v25  ;;  %v2799_v40 = vadd.f32 %v8861_v10, %v8707_v13 }
 0x2cb   : > { %v2857_v21 = vpop.f32.mrf.mxu1  ;;  %7353 = vmatmul.mubr.bf16.gmra.mxu0 %v3226_v12  ;;  %v3219_v32 = vpack.c.bf16 %v3122_v60, %v3121_v38 }
 0x2cc   : > { %v2858_v30 = vadd.f32 %v2857_v21, %v8707_v13  ;;  %7497 = vmatpush3.bf16.msra.mxu0 %v7829_v24  ;;  %v3140_v3 = vmax.f32 %v2866_v44, 0.0  ;;  %v3120_v24 = vmax.f32 %v2786_v5, 0.0  ;;  %v3124_v21 = vmax.f32 %v2802_v14, 0.0 }
 0x2cd   : > { %v7282_v26 = vpop.f32.mrf.mxu1  ;;  %7473 = vmatmul.mubr.bf16.gmra.mxu1 %v3214_v52  ;;  %7498 = vmatprep.subr.bf16.mxu0 %v7830_v23 }
 0x2ce   : > { %v3138_v27 = vmax.f32 %v2858_v30, 0.0  ;;  %7476 = vmatprep.mubr.bf16.mxu1 %v3215_v58  ;;  %v3228_v36 = vpack.c.bf16 %v3140_v3, %v3139_v43  ;;  %v2879_v42 = vadd.f32 %v7282_v26, %v8707_v13  ;;  %v3218_v39 = vpack.c.bf16 %v3120_v24, %v3119_v51 }
 0x2cf   : > { %v2870_v15 = vpop.f32.mrf.mxu1  ;;  %v3123_v58 = vmax.f32 %v2799_v40, 0.0 }
 0x2d0   : > { %v3227_v54 = vpack.c.bf16 %v3138_v27, %v3137_v31  ;;  %7499 = vmatpush3.bf16.msra.mxu0 %v7830_v23  ;;  %v2871_v22 = vadd.f32 %v2870_v15, %v8707_v13  ;;  %v3143_v20 = vmax.f32 %v2879_v42, 0.0 }
 0x2d1   : > { %v7283_v57 = vpop.f32.mrf.mxu1  ;;  %7500 = vmatprep.subr.bf16.mxu0 %v7831_v19  ;;  %v3220_v35 = vpack.c.bf16 %v3124_v21, %v3123_v58 }
 0x2d2   : > { %v2882_v45 = vadd.f32 %v7283_v57, %v8707_v13  ;;  %7356 = vmatprep.mubr.bf16.mxu0 %v3227_v54  ;;  %v3141_v29 = vmax.f32 %v2871_v22, 0.0 }
 0x2d3   : > { %v2873_v53 = vpop.f32.mrf.mxu1  ;;  %7357 = vmatmul.mubr.bf16.gmra.mxu0 %v3228_v36 }
 0x2d4   : > { %v2874_v62 = vadd.f32 %v2873_v53, %v8707_v13  ;;  %7501 = vmatpush3.bf16.msra.mxu0 %v7831_v19  ;;  %v3144_v49 = vmax.f32 %v2882_v45, 0.0 }
 0x2d5   : > { %v7286_v2 = vpop.f32.mrf.mxu1  ;;  %7477 = vmatmul.mubr.bf16.gmra.mxu1 %v3216_v55  ;;  %7502 = vmatprep.subr.bf16.mxu0 %v7832_v18 }
 0x2d6   : > { %v3142_v34 = vmax.f32 %v2874_v62, 0.0  ;;  %7480 = vmatprep.mubr.bf16.mxu1 %v3217_v59  ;;  %v3230_v4 = vpack.c.bf16 %v3144_v49, %v3143_v20  ;;  %v2895_v12 = vadd.f32 %v7286_v2, %v8707_v13 }
 0x2d7   : > { %v2886_v63 = vpop.f32.mrf.mxu1 }
 0x2d8   : > { %v3229_v6 = vpack.c.bf16 %v3142_v34, %v3141_v29  ;;  %7503 = vmatpush3.bf16.msra.mxu0 %v7832_v18  ;;  %v2887_v11 = vadd.f32 %v2886_v63, %v8707_v13  ;;  %v3147_v33 = vmax.f32 %v2895_v12, 0.0 }
 0x2d9   : > { %v7287_v48 = vpop.f32.mrf.mxu1 }
 0x2da   : > { %v2898_v9 = vadd.f32 %v7287_v48, %v8707_v13  ;;  %7360 = vmatprep.mubr.bf16.mxu0 %v3229_v6  ;;  %v3145_v41 = vmax.f32 %v2887_v11, 0.0 }
 0x2db   : > { %v2889_v17 = vpop.f32.mrf.mxu1  ;;  %7361 = vmatmul.mubr.bf16.gmra.mxu0 %v3230_v4 }
 0x2dc   : > { %v2890_v23 = vadd.f32 %v2889_v17, %v8707_v13  ;;  %v3148_v44 = vmax.f32 %v2898_v9, 0.0 }
 0x2dd   : > { %v7290_v52 = vpop.f32.mrf.mxu1  ;;  %7481 = vmatmul.mubr.bf16.gmra.mxu1 %v3218_v39 }
 0x2de   : > { %v3146_v7 = vmax.f32 %v2890_v23, 0.0  ;;  %7484 = vmatprep.mubr.bf16.mxu1 %v3219_v32  ;;  %v3232_v37 = vpack.c.bf16 %v3148_v44, %v3147_v33  ;;  %v2911_v10 = vadd.f32 %v7290_v52, %v8707_v13 }
 0x2df   : > { %v2902_v30 = vpop.f32.mrf.mxu1 }
 0x2e0   : > { %v3231_v16 = vpack.c.bf16 %v3146_v7, %v3145_v41  ;;  %v2903_v26 = vadd.f32 %v2902_v30, %v8707_v13  ;;  %v3151_v54 = vmax.f32 %v2911_v10, 0.0 }
 0x2e1   : > { %v7291_v3 = vpop.f32.mrf.mxu1 }
 0x2e2   : > { %v2914_v19 = vadd.f32 %v7291_v3, %v8707_v13  ;;  %7364 = vmatprep.mubr.bf16.mxu0 %v3231_v16  ;;  %v3149_v15 = vmax.f32 %v2903_v26, 0.0 }
 0x2e3   : > { %v2905_v31 = vpop.f32.mrf.mxu1  ;;  %7365 = vmatmul.mubr.bf16.gmra.mxu0 %v3232_v37 }
 0x2e4   : > { %v2906_v27 = vadd.f32 %v2905_v31, %v8707_v13  ;;  %v3152_v46 = vmax.f32 %v2914_v19, 0.0 }
 0x2e5   : > { %v7294_v43 = vpop.f32.mrf.mxu1  ;;  %7485 = vmatmul.mubr.bf16.gmra.mxu1 %v3220_v35 }
 0x2e6   : > { %v3150_v50 = vmax.f32 %v2906_v27, 0.0  ;;  %v3234_v57 = vpack.c.bf16 %v3152_v46, %v3151_v54  ;;  %v2927_v45 = vadd.f32 %v7294_v43, %v8707_v13 }
 0x2e7   : > { %v2918_v47 = vpop.f32.mrf.mxu1 }
 0x2e8   : > { %v3233_v36 = vpack.c.bf16 %v3150_v50, %v3149_v15  ;;  %v2919_v25 = vadd.f32 %v2918_v47, %v8707_v13  ;;  %v3155_v59 = vmax.f32 %v2927_v45, 0.0 }
 0x2e9   : > { %v7295_v18 = vpop.f32.mrf.mxu1 }
 0x2ea   : > { %v2930_v22 = vadd.f32 %v7295_v18, %v8707_v13  ;;  %7368 = vmatprep.mubr.bf16.mxu0 %v3233_v36  ;;  %v3153_v56 = vmax.f32 %v2919_v25, 0.0 }
 0x2eb   : > { %v2921_v55 = vpop.f32.mrf.mxu1  ;;  %7369 = vmatmul.mubr.bf16.gmra.mxu0 %v3234_v57 }
 0x2ec   : > { %v2922_v5 = vadd.f32 %v2921_v55, %v8707_v13  ;;  %v3156_v42 = vmax.f32 %v2930_v22, 0.0 }
 0x2ed   : > { %v7298_v53 = vpop.f32.mrf.mxu1 }
 0x2ee   : > { %v3154_v62 = vmax.f32 %v2922_v5, 0.0  ;;  %v3236_v2 = vpack.c.bf16 %v3156_v42, %v3155_v59  ;;  %v2943_v24 = vadd.f32 %v7298_v53, %v8707_v13 }
 0x2ef   : > { %v2934_v61 = vpop.f32.mrf.mxu1 }
 0x2f0   : > { %v3235_v49 = vpack.c.bf16 %v3154_v62, %v3153_v56  ;;  %v2935_v29 = vadd.f32 %v2934_v61, %v8707_v13  ;;  %v3159_v48 = vmax.f32 %v2943_v24, 0.0 }
 0x2f1   : > { %v7299_v0 = vpop.f32.mrf.mxu1 }
 0x2f2   : > { %v2946_v34 = vadd.f32 %v7299_v0, %v8707_v13  ;;  %7372 = vmatprep.mubr.bf16.mxu0 %v3235_v49  ;;  %v3157_v51 = vmax.f32 %v2935_v29, 0.0 }
 0x2f3   : > { %v2937_v20 = vpop.f32.mrf.mxu1  ;;  %7373 = vmatmul.mubr.bf16.gmra.mxu0 %v3236_v2 }
 0x2f4   : > { %v2938_v63 = vadd.f32 %v2937_v20, %v8707_v13  ;;  %v3160_v60 = vmax.f32 %v2946_v34, 0.0 }
 0x2f5   : > { %v7302_v6 = vpop.f32.mrf.mxu1 }
 0x2f6   : > { %v3158_v4 = vmax.f32 %v2938_v63, 0.0  ;;  %v3238_v9 = vpack.c.bf16 %v3160_v60, %v3159_v48  ;;  %v2959_v17 = vadd.f32 %v7302_v6, %v8707_v13 }
 0x2f7   : > { %v2950_v38 = vpop.f32.mrf.mxu1 }
 0x2f8   : > { %v3237_v11 = vpack.c.bf16 %v3158_v4, %v3157_v51  ;;  %v2951_v14 = vadd.f32 %v2950_v38, %v8707_v13  ;;  %v3163_v7 = vmax.f32 %v2959_v17, 0.0 }
 0x2f9   : > { %v7303_v39 = vpop.f32.mrf.mxu1 }
 0x2fa   : > { %v2962_v12 = vadd.f32 %v7303_v39, %v8707_v13  ;;  %7376 = vmatprep.mubr.bf16.mxu0 %v3237_v11  ;;  %v3161_v52 = vmax.f32 %v2951_v14, 0.0 }
 0x2fb   : > { %v2953_v23 = vpop.f32.mrf.mxu1  ;;  %7377 = vmatmul.mubr.bf16.gmra.mxu0 %v3238_v9 }
 0x2fc   : > { %v2954_v32 = vadd.f32 %v2953_v23, %v8707_v13  ;;  %v3164_v40 = vmax.f32 %v2962_v12, 0.0 }
 0x2fd   : > { %v7306_v44 = vpop.f32.mrf.mxu1 }
 0x2fe   : > { %v3162_v41 = vmax.f32 %v2954_v32, 0.0  ;;  %v3240_v30 = vpack.c.bf16 %v3164_v40, %v3163_v7  ;;  %v2975_v3 = vadd.f32 %v7306_v44, %v8707_v13 }
 0x2ff   : > { %v2966_v21 = vpop.f32.mrf.mxu1 }
 0x300   : > { %v3239_v33 = vpack.c.bf16 %v3162_v41, %v3161_v52  ;;  %v2967_v58 = vadd.f32 %v2966_v21, %v8707_v13  ;;  %v3167_v46 = vmax.f32 %v2975_v3, 0.0 }
 0x301   : > { %v7307_v16 = vpop.f32.mrf.mxu1 }
 0x302   : > { %v2978_v37 = vadd.f32 %v7307_v16, %v8707_v13  ;;  %7380 = vmatprep.mubr.bf16.mxu0 %v3239_v33  ;;  %v3165_v31 = vmax.f32 %v2967_v58, 0.0 }
 0x303   : > { %v2969_v26 = vpop.f32.mrf.mxu1  ;;  %7381 = vmatmul.mubr.bf16.gmra.mxu0 %v3240_v30 }
 0x304   : > { %v2970_v19 = vadd.f32 %v2969_v26, %v8707_v13  ;;  %v3168_v35 = vmax.f32 %v2978_v37, 0.0 }
 0x305   : > { %v7310_v10 = vpop.f32.mrf.mxu1 }
 0x306   : > { %v3166_v27 = vmax.f32 %v2970_v19, 0.0  ;;  %v3242_v50 = vpack.c.bf16 %v3168_v35, %v3167_v46  ;;  %v2991_v57 = vadd.f32 %v7310_v10, %v8707_v13 }
 0x307   : > { %v2982_v43 = vpop.f32.mrf.mxu1 }
 0x308   : > { %v3241_v15 = vpack.c.bf16 %v3166_v27, %v3165_v31  ;;  %v2983_v47 = vadd.f32 %v2982_v43, %v8707_v13  ;;  %v3171_v42 = vmax.f32 %v2991_v57, 0.0 }
 0x309   : > { %v7311_v54 = vpop.f32.mrf.mxu1 }
 0x30a   : > { %v2994_v36 = vadd.f32 %v7311_v54, %v8707_v13  ;;  %7384 = vmatprep.mubr.bf16.mxu0 %v3241_v15  ;;  %v3169_v55 = vmax.f32 %v2983_v47, 0.0 }
 0x30b   : > { %v2985_v18 = vpop.f32.mrf.mxu1  ;;  %7385 = vmatmul.mubr.bf16.gmra.mxu0 %v3242_v50 }
 0x30c   : > { %v2986_v25 = vadd.f32 %v2985_v18, %v8707_v13  ;;  %v3172_v22 = vmax.f32 %v2994_v36, 0.0 }
 0x30d   : > { %v7314_v45 = vpop.f32.mrf.mxu1 }
 0x30e   : > { %v3170_v5 = vmax.f32 %v2986_v25, 0.0  ;;  %v3244_v62 = vpack.c.bf16 %v3172_v22, %v3171_v42  ;;  %v3007_v2 = vadd.f32 %v7314_v45, %v8707_v13  ;;  %v7833_v45 = vld [vmem:[%s8012_s20] sm:$0xff]   ;;  %v7835_v42 = vld [vmem:[%s8012_s20 + $0x10] sm:$0xff]  }
 0x30f   : > { %v2998_v53 = vpop.f32.mrf.mxu1 }
 0x310   : > { %v3243_v56 = vpack.c.bf16 %v3170_v5, %v3169_v55  ;;  %v2999_v61 = vadd.f32 %v2998_v53, %v8707_v13  ;;  %v3175_v60 = vmax.f32 %v3007_v2, 0.0  ;;  %v7834_v5 = vld [vmem:[%s8012_s20 + $0x8] sm:$0xff]   ;;  %v7837_v53 = vld [vmem:[%s8012_s20 + $0x20] sm:$0xff]   ;;  %v7843_v2 = vld [vmem:[%s8012_s20 + $0x50] sm:$0xff]  }
 0x311   : > { %v7315_v59 = vpop.f32.mrf.mxu1 }
 0x312   : > { %v3010_v49 = vadd.f32 %v7315_v59, %v8707_v13  ;;  %7388 = vmatprep.mubr.bf16.mxu0 %v3243_v56  ;;  %v3173_v20 = vmax.f32 %v2999_v61, 0.0  ;;  %v7838_v56 = vld [vmem:[%s8012_s20 + $0x28] sm:$0xff]   ;;  %v7840_v59 = vld [vmem:[%s8012_s20 + $0x38] sm:$0xff]   ;;  %v7841_v61 = vld [vmem:[%s8012_s20 + $0x40] sm:$0xff]  }
 0x313   : > { %v3001_v0 = vpop.f32.mrf.mxu1  ;;  %7389 = vmatmul.mubr.bf16.gmra.mxu0 %v3244_v62  ;;  %v7839_v62 = vld [vmem:[%s8012_s20 + $0x30] sm:$0xff]  }
 0x314   : > { %v3002_v29 = vadd.f32 %v3001_v0, %v8707_v13  ;;  %v3176_v34 = vmax.f32 %v3010_v49, 0.0  ;;  %v7842_v49 = vld [vmem:[%s8012_s20 + $0x48] sm:$0xff]   ;;  %v7844_v0 = vld [vmem:[%s8012_s20 + $0x58] sm:$0xff]  }
 0x315   : > { %v7318_v24 = vpop.f32.mrf.mxu1 }
 0x316   : > { %v3174_v63 = vmax.f32 %v3002_v29, 0.0  ;;  %v3246_v4 = vpack.c.bf16 %v3176_v34, %v3175_v60  ;;  %v3023_v9 = vadd.f32 %v7318_v24, %v8707_v13  ;;  %v7845_v29 = vld [vmem:[%s8012_s20 + $0x60] sm:$0xff]   ;;  %v7846_v34 = vld [vmem:[%s8012_s20 + $0x68] sm:$0xff]   ;;  %v7847_v24 = vld [vmem:[%s8012_s20 + $0x70] sm:$0xff]  }
 0x317   : > { %v3014_v6 = vpop.f32.mrf.mxu1  ;;  %v7848_v60 = vld [vmem:[%s8012_s20 + $0x78] sm:$0xff]  }
 0x318   : > { %v3245_v51 = vpack.c.bf16 %v3174_v63, %v3173_v20  ;;  %v3015_v38 = vadd.f32 %v3014_v6, %v8707_v13  ;;  %v3179_v40 = vmax.f32 %v3023_v9, 0.0  ;;  %v7865_v20 = vld [vmem:[%s8022_s27 + $0x138] sm:$0xff]   ;;  %v7866_v63 = vld [vmem:[%s8022_s27 + $0x130] sm:$0xff]   ;;  %v7849_v6 = vld [vmem:[%s8012_s20 + $0x80] sm:$0xff]  }
 0x319   : > { %v7319_v48 = vpop.f32.mrf.mxu1  ;;  %7568 = vmatprep.subr.bf16.mxu1 %v7865_v20 }
 0x31a   : > { %v3026_v11 = vadd.f32 %v7319_v48, %v8707_v13  ;;  %7392 = vmatprep.mubr.bf16.mxu0 %v3245_v51  ;;  %v3177_v23 = vmax.f32 %v3015_v38, 0.0  ;;  %7569 = vmatpush3.bf16.msra.mxu1 %v7865_v20  ;;  %v7867_v51 = vld [vmem:[%s8022_s27 + $0x128] sm:$0xff]   ;;  %v7851_v38 = vld [vmem:[%s8012_s20 + $0x90] sm:$0xff]  }
 0x31b   : > { %v3017_v39 = vpop.f32.mrf.mxu1  ;;  %7393 = vmatmul.mubr.bf16.gmra.mxu0 %v3246_v4  ;;  %7570 = vmatprep.subr.bf16.mxu1 %v7866_v63  ;;  %v7868_v4 = vld [vmem:[%s8022_s27 + $0x120] sm:$0xff]   ;;  %v7850_v48 = vld [vmem:[%s8012_s20 + $0x88] sm:$0xff]  }
 0x31c   : > { %v3018_v14 = vadd.f32 %v3017_v39, %v8707_v13  ;;  %v3180_v12 = vmax.f32 %v3026_v11, 0.0  ;;  %v7869_v11 = vld [vmem:[%s8022_s27 + $0x118] sm:$0xff]  }
 0x31d   : > { %v7322_v17 = vpop.f32.mrf.mxu1 }
 0x31e   : > { %v3178_v32 = vmax.f32 %v3018_v14, 0.0  ;;  %v3248_v41 = vpack.c.bf16 %v3180_v12, %v3179_v40  ;;  %v3039_v30 = vadd.f32 %v7322_v17, %v8707_v13  ;;  %7571 = vmatpush3.bf16.msra.mxu1 %v7866_v63  ;;  %v7870_v12 = vld [vmem:[%s8022_s27 + $0x110] sm:$0xff]   ;;  %v7853_v40 = vld [vmem:[%s8012_s20 + $0xa0] sm:$0xff]  }
 0x31f   : > { %v3030_v44 = vpop.f32.mrf.mxu1  ;;  %7572 = vmatprep.subr.bf16.mxu1 %v7867_v51 }
 0x320   : > { %v3247_v52 = vpack.c.bf16 %v3178_v32, %v3177_v23  ;;  %v3031_v21 = vadd.f32 %v3030_v44, %v8707_v13  ;;  %v3183_v35 = vmax.f32 %v3039_v30, 0.0  ;;  %v7852_v32 = vld [vmem:[%s8012_s20 + $0x98] sm:$0xff]  }
 0x321   : > { %v7323_v7 = vpop.f32.mrf.mxu1 }
 0x322   : > { %v3042_v33 = vadd.f32 %v7323_v7, %v8707_v13  ;;  %7396 = vmatprep.mubr.bf16.mxu0 %v3247_v52  ;;  %v3181_v26 = vmax.f32 %v3031_v21, 0.0  ;;  %7573 = vmatpush3.bf16.msra.mxu1 %v7867_v51  ;;  %v7871_v52 = vld [vmem:[%s8022_s27 + $0x108] sm:$0xff]   ;;  %v7864_v51 = vld [vmem:[%s8012_s20 + $0xf8] sm:$0xff]  }
 0x323   : > { %v3033_v16 = vpop.f32.mrf.mxu1  ;;  %7397 = vmatmul.mubr.bf16.gmra.mxu0 %v3248_v41  ;;  %7574 = vmatprep.subr.bf16.mxu1 %v7868_v4 }
 0x324   : > { %v3034_v58 = vadd.f32 %v3033_v16, %v8707_v13  ;;  %v3184_v37 = vmax.f32 %v3042_v33, 0.0  ;;  %v7872_v33 = vld [vmem:[%s8022_s27 + $0x100] sm:$0xff]  }
 0x325   : > { %v7326_v3 = vpop.f32.mrf.mxu1 }
 0x326   : > { %v3182_v19 = vmax.f32 %v3034_v58, 0.0  ;;  %v3250_v27 = vpack.c.bf16 %v3184_v37, %v3183_v35  ;;  %v3055_v50 = vadd.f32 %v7326_v3, %v8707_v13  ;;  %7575 = vmatpush3.bf16.msra.mxu1 %v7868_v4  ;;  %v7854_v58 = vld [vmem:[%s8012_s20 + $0xa8] sm:$0xff]   ;;  %v7855_v37 = vld [vmem:[%s8012_s20 + $0xb0] sm:$0xff]  }
 0x327   : > { %v3046_v10 = vpop.f32.mrf.mxu1  ;;  %7576 = vmatprep.subr.bf16.mxu1 %v7869_v11 }
 0x328   : > { %v3249_v31 = vpack.c.bf16 %v3182_v19, %v3181_v26  ;;  %v3047_v43 = vadd.f32 %v3046_v10, %v8707_v13  ;;  %v3187_v25 = vmax.f32 %v3055_v50, 0.0 }
 0x329   : > { %v7327_v46 = vpop.f32.mrf.mxu1 }
 0x32a   : > { %v3058_v15 = vadd.f32 %v7327_v46, %v8707_v13  ;;  %7400 = vmatprep.mubr.bf16.mxu0 %v3249_v31  ;;  %v3185_v57 = vmax.f32 %v3047_v43, 0.0  ;;  %7577 = vmatpush3.bf16.msra.mxu1 %v7869_v11  ;;  %v7857_v46 = vld [vmem:[%s8012_s20 + $0xc0] sm:$0xff]  }
 0x32b   : > { %v3049_v54 = vpop.f32.mrf.mxu1  ;;  %7401 = vmatmul.mubr.bf16.gmra.mxu0 %v3250_v27  ;;  %7578 = vmatprep.subr.bf16.mxu1 %v7870_v12  ;;  %v7856_v27 = vld [vmem:[%s8012_s20 + $0xb8] sm:$0xff]  }
 0x32c   : > { %v3050_v47 = vadd.f32 %v3049_v54, %v8707_v13  ;;  %v3188_v36 = vmax.f32 %v3058_v15, 0.0  ;;  %v7836_v13 = vld [vmem:[%s8012_s20 + $0x18] sm:$0xff]  }
 0x32d   : > { %v9019_v9 = vpop.f32.mrf.mxu1 }
 0x32e   : > { %v3186_v18 = vmax.f32 %v3050_v47, 0.0  ;;  %v3252_v55 = vpack.c.bf16 %v3188_v36, %v3187_v25  ;;  %7579 = vmatpush3.bf16.msra.mxu1 %v7870_v12 }
 0x32f   : > { %v9026_v17 = vpop.f32.mrf.mxu1  ;;  %7580 = vmatprep.subr.bf16.mxu1 %v7871_v52 }
 0x330   : > { %v3251_v22 = vpack.c.bf16 %v3186_v18, %v3185_v57  ;;  %v7858_v57 = vld [vmem:[%s8012_s20 + $0xc8] sm:$0xff]   ;;  %v7859_v18 = vld [vmem:[%s8012_s20 + $0xd0] sm:$0xff]  }
 0x331   : > { %v9035_v41 = vpop.f32.mrf.mxu1 }
 0x332   : > { %7404 = vmatprep.mubr.bf16.mxu0 %v3251_v22  ;;  %7581 = vmatpush3.bf16.msra.mxu1 %v7871_v52 }
 0x333   : > { %7405 = vmatmul.mubr.bf16.gmra.mxu0 %v3252_v55  ;;  %v9042_v30 = vpop.f32.mrf.mxu1  ;;  %7582 = vmatprep.subr.bf16.mxu1 %v7872_v33 }
 0x334   : > { %7504 = vmatprep.mubr.bf16.mxu0 %v7833_v45 }
 0x335   : > { %v9050_v26 = vpop.f32.mrf.mxu1 }
 0x336   : > { %7583 = vmatpush3.bf16.msra.mxu1 %v7872_v33 }
 0x337   : > { %v9056_v10 = vpop.f32.mrf.mxu1 }
 0x339   : > { %v9064_v15 = vpop.f32.mrf.mxu1 }
 0x33b   : > { %7505 = vmatmul.mubr.bf16.vlgmr.msra.gmra.mxu0 %v7834_v5  ;;  %v9070_v47 = vpop.f32.mrf.mxu1 }
 0x33c   : > { %7508 = vmatprep.mubr.bf16.mxu0 %v7835_v42 }
 0x33d   : > { %v9078_v22 = vpop.f32.mrf.mxu1 }
 0x33f   : > { %v9084_v5 = vpop.f32.mrf.mxu1 }
 0x343   : > { %7509 = vmatmul.mubr.bf16.gmra.mxu0 %v7836_v13  ;;  %v7860_v13 = vld [vmem:[%s8012_s20 + $0xd8] sm:$0xff]  }
 0x344   : > { %7512 = vmatprep.mubr.bf16.mxu0 %v7837_v53  ;;  %v7861_v53 = vld [vmem:[%s8012_s20 + $0xe0] sm:$0xff]  }
 0x34b   : > { %7513 = vmatmul.mubr.bf16.gmra.mxu0 %v7838_v56 }
 0x34c   : > { %7516 = vmatprep.mubr.bf16.mxu0 %v7839_v62  ;;  %v9092_v62 = vpop.f32.mrf.mxu1 }
 0x353   : > { %7517 = vmatmul.mubr.bf16.gmra.mxu0 %v7840_v59 }
 0x354   : > { %7520 = vmatprep.mubr.bf16.mxu0 %v7841_v61 }
 0x35b   : > { %7521 = vmatmul.mubr.bf16.gmra.mxu0 %v7842_v49  ;;  %v9098_v49 = vpop.f32.mrf.mxu1 }
 0x35c   : > { %7524 = vmatprep.mubr.bf16.mxu0 %v7843_v2 }
 0x363   : > { %7525 = vmatmul.mubr.bf16.gmra.mxu0 %v7844_v0  ;;  %v7862_v0 = vld [vmem:[%s8012_s20 + $0xe8] sm:$0xff]  }
 0x364   : > { %7528 = vmatprep.mubr.bf16.mxu0 %v7845_v29  ;;  %v7863_v29 = vld [vmem:[%s8012_s20 + $0xf0] sm:$0xff]  }
 0x36b   : > { %7529 = vmatmul.mubr.bf16.gmra.mxu0 %v7846_v34 }
 0x36c   : > { %7532 = vmatprep.mubr.bf16.mxu0 %v7847_v24  ;;  %v9106_v24 = vpop.f32.mrf.mxu1 }
 0x373   : > { %7533 = vmatmul.mubr.bf16.gmra.mxu0 %v7848_v60  ;;  %v9112_v60 = vpop.f32.mrf.mxu1 }
 0x374   : > { %7536 = vmatprep.mubr.bf16.mxu0 %v7849_v6 }
 0x37b   : > { %v9021_v39 = vpop.f32.mrf.mxu0  ;;  %7537 = vmatmul.mubr.bf16.gmra.mxu0 %v7850_v48  ;;  %v9119_v48 = vpop.f32.mrf.mxu1 }
 0x37c   : > { %7540 = vmatprep.mubr.bf16.mxu0 %v7851_v38 }
 0x37d   : > { %v9023_v14 = vpop.f32.mrf.mxu0  ;;  %v9125_v12 = vpop.f32.mrf.mxu1 }
 0x37f   : > { %v9028_v23 = vpop.f32.mrf.mxu0  ;;  %v9131_v52 = vpop.f32.mrf.mxu1 }
 0x381   : > { %v9032_v44 = vpop.f32.mrf.mxu0 }
 0x383   : > { %v9037_v7 = vpop.f32.mrf.mxu0  ;;  %7541 = vmatmul.mubr.bf16.gmra.mxu0 %v7852_v32 }
 0x384   : > { %7544 = vmatprep.mubr.bf16.mxu0 %v7853_v40 }
 0x385   : > { %v9039_v21 = vpop.f32.mrf.mxu0 }
 0x387   : > { %v9044_v16 = vpop.f32.mrf.mxu0 }
 0x389   : > { %v9048_v3 = vpop.f32.mrf.mxu0 }
 0x38b   : > { %v9052_v19 = vpop.f32.mrf.mxu0  ;;  %7545 = vmatmul.mubr.bf16.gmra.mxu0 %v7854_v58 }
 0x38c   : > { %7548 = vmatprep.mubr.bf16.mxu0 %v7855_v37  ;;  %v9137_v37 = vpop.f32.mrf.mxu1 }
 0x38d   : > { %v9054_v35 = vpop.f32.mrf.mxu0 }
 0x38f   : > { %v9058_v31 = vpop.f32.mrf.mxu0 }
 0x391   : > { %v9062_v43 = vpop.f32.mrf.mxu0 }
 0x393   : > { %v9066_v50 = vpop.f32.mrf.mxu0  ;;  %7549 = vmatmul.mubr.bf16.gmra.mxu0 %v7856_v27 }
 0x394   : > { %7552 = vmatprep.mubr.bf16.mxu0 %v7857_v46 }
 0x395   : > { %v9068_v54 = vpop.f32.mrf.mxu0 }
 0x397   : > { %v9072_v36 = vpop.f32.mrf.mxu0 }
 0x399   : > { %v9076_v25 = vpop.f32.mrf.mxu0 }
 0x39b   : > { %v9080_v45 = vpop.f32.mrf.mxu0  ;;  %7553 = vmatmul.mubr.bf16.gmra.mxu0 %v7858_v57  ;;  %v9143_v57 = vpop.f32.mrf.mxu1 }
 0x39c   : > { %7556 = vmatprep.mubr.bf16.mxu0 %v7859_v18 }
 0x39d   : > { %v9082_v55 = vpop.f32.mrf.mxu0 }
 0x39f   : > { %v9086_v42 = vpop.f32.mrf.mxu0 }
 0x3a1   : > { %v9090_v56 = vpop.f32.mrf.mxu0 }
 0x3a3   : > { %v9094_v59 = vpop.f32.mrf.mxu0  ;;  %7557 = vmatmul.mubr.bf16.gmra.mxu0 %v7860_v13 }
 0x3a4   : > { %7560 = vmatprep.mubr.bf16.mxu0 %v7861_v53  ;;  %v9149_v53 = vpop.f32.mrf.mxu1 }
 0x3a5   : > { %v9096_v61 = vpop.f32.mrf.mxu0 }
 0x3a7   : > { %v9100_v2 = vpop.f32.mrf.mxu0 }
 0x3a9   : > { %v9104_v34 = vpop.f32.mrf.mxu0 }
 0x3ab   : > { %v9108_v20 = vpop.f32.mrf.mxu0  ;;  %7561 = vmatmul.mubr.bf16.gmra.mxu0 %v7862_v0 }
 0x3ac   : > { %7564 = vmatprep.mubr.bf16.mxu0 %v7863_v29 }
 0x3ad   : > { %v9110_v63 = vpop.f32.mrf.mxu0 }
 0x3af   : > { %v9114_v6 = vpop.f32.mrf.mxu0 }
 0x3b0   : > { %10227 = vst [vmem:[#allocation9_spill] sm:$0xff] %v9114_v6 }
 0x3b1   : > { %v9117_v4 = vpop.f32.mrf.mxu0 }
 0x3b2   : > { %10228 = vst [vmem:[#allocation10_spill] sm:$0xff] %v9117_v4 }
 0x3b3   : > { %v9121_v38 = vpop.f32.mrf.mxu0  ;;  %7565 = vmatmul.mubr.bf16.gmra.mxu0 %v7864_v51  ;;  %v9155_v51 = vpop.f32.mrf.mxu1 }
 0x3b4   : > { %10229 = vst [vmem:[#allocation11_spill] sm:$0xff] %v9121_v38 }
 0x3b5   : > { %v9123_v11 = vpop.f32.mrf.mxu0 }
 0x3b6   : > { %10230 = vst [vmem:[#allocation12_spill] sm:$0xff] %v9123_v11 }
 0x3b7   : > { %v9127_v32 = vpop.f32.mrf.mxu0 }
 0x3b8   : > { %10231 = vst [vmem:[#allocation13_spill] sm:$0xff] %v9127_v32 }
 0x3b9   : > { %v9129_v40 = vpop.f32.mrf.mxu0 }
 0x3ba   : > { %10232 = vst [vmem:[#allocation14_spill] sm:$0xff] %v9129_v40 }
 0x3bb   : > { %v9133_v33 = vpop.f32.mrf.mxu0 }
 0x3bc   : > { %10233 = vst [vmem:[#allocation15_spill] sm:$0xff] %v9133_v33 }
 0x3bd   : > { %v9135_v58 = vpop.f32.mrf.mxu0 }
 0x3be   : > { %10234 = vst [vmem:[#allocation16_spill] sm:$0xff] %v9135_v58 }
 0x3bf   : > { %v9139_v27 = vpop.f32.mrf.mxu0 }
 0x3c0   : > { %10235 = vst [vmem:[#allocation17_spill] sm:$0xff] %v9139_v27  ;;  %v9161_v27 = vpop.f32.mrf.mxu1 }
 0x3c1   : > { %v9141_v46 = vpop.f32.mrf.mxu0 }
 0x3c2   : > { %10236 = vst [vmem:[#allocation18_spill] sm:$0xff] %v9141_v46 }
 0x3c3   : > { %v9145_v18 = vpop.f32.mrf.mxu0 }
 0x3c4   : > { %10237 = vst [vmem:[#allocation19_spill] sm:$0xff] %v9145_v18  ;;  %v9167_v18 = vpop.f32.mrf.mxu1 }
 0x3c5   : > { %v9147_v13 = vpop.f32.mrf.mxu0 }
 0x3c6   : > { %10238 = vst [vmem:[#allocation20_spill] sm:$0xff] %v9147_v13 }
 0x3c7   : > { %v9151_v0 = vpop.f32.mrf.mxu0 }
 0x3c8   : > { %10239 = vst [vmem:[#allocation21_spill] sm:$0xff] %v9151_v0  ;;  %v9173_v0 = vpop.f32.mrf.mxu1 }
 0x3c9   : > { %v9153_v29 = vpop.f32.mrf.mxu0 }
 0x3ca   : > { %10240 = vst [vmem:[#allocation22_spill] sm:$0xff] %v9153_v29 }
 0x3cb   : > { %v9157_v28 = vpop.f32.mrf.mxu0 }
 0x3cc   : > { %10241 = vst [vmem:[#allocation23_spill] sm:$0xff] %v9157_v28  ;;  %v9179_v28 = vpop.f32.mrf.mxu1 }
 0x3cd   : > { %v9159_v8 = vpop.f32.mrf.mxu0 }
 0x3ce   : > { %10242 = vst [vmem:[#allocation24_spill] sm:$0xff] %v9159_v8 }
 0x3cf   : > { %v9163_v46 = vpop.f32.mrf.mxu0 }
 0x3d0   : > { %10243 = vst [vmem:[#allocation25_spill] sm:$0xff] %v9163_v46  ;;  %v9185_v46 = vpop.f32.mrf.mxu1 }
 0x3d1   : > { %v9165_v58 = vpop.f32.mrf.mxu0 }
 0x3d2   : > { %10244 = vst [vmem:[#allocation26_spill] sm:$0xff] %v9165_v58 }
 0x3d3   : > { %v9169_v13 = vpop.f32.mrf.mxu0 }
 0x3d4   : > { %10245 = vst [vmem:[#allocation27_spill] sm:$0xff] %v9169_v13  ;;  %v9191_v13 = vpop.f32.mrf.mxu1 }
 0x3d5   : > { %v9171_v33 = vpop.f32.mrf.mxu0  ;;  %10253 = vst [vmem:[#allocation35_spill] sm:$0xff] %v9191_v13 }
 0x3d6   : > { %10246 = vst [vmem:[#allocation28_spill] sm:$0xff] %v9171_v33 }
 0x3d7   : > { %v9175_v29 = vpop.f32.mrf.mxu0 }
 0x3d8   : > { %10247 = vst [vmem:[#allocation29_spill] sm:$0xff] %v9175_v29  ;;  %v9197_v29 = vpop.f32.mrf.mxu1 }
 0x3d9   : > { %v9177_v40 = vpop.f32.mrf.mxu0  ;;  %10256 = vst [vmem:[#allocation38_spill] sm:$0xff] %v9197_v29 }
 0x3da   : > { %10248 = vst [vmem:[#allocation30_spill] sm:$0xff] %v9177_v40 }
 0x3db   : > { %v9181_v8 = vpop.f32.mrf.mxu0 }
 0x3dc   : > { %10249 = vst [vmem:[#allocation31_spill] sm:$0xff] %v9181_v8  ;;  %v9203_v8 = vpop.f32.mrf.mxu1 }
 0x3dd   : > { %v9183_v32 = vpop.f32.mrf.mxu0  ;;  %10259 = vst [vmem:[#allocation41_spill] sm:$0xff] %v9203_v8 }
 0x3de   : > { %10250 = vst [vmem:[#allocation32_spill] sm:$0xff] %v9183_v32 }
 0x3df   : > { %v9187_v58 = vpop.f32.mrf.mxu0 }
 0x3e0   : > { %10251 = vst [vmem:[#allocation33_spill] sm:$0xff] %v9187_v58 }
 0x3e1   : > { %v9189_v11 = vpop.f32.mrf.mxu0 }
 0x3e2   : > { %10252 = vst [vmem:[#allocation34_spill] sm:$0xff] %v9189_v11  ;;  %v9209_v11 = vpop.f32.mrf.mxu1 }
 0x3e3   : > { %v9193_v33 = vpop.f32.mrf.mxu0  ;;  %10262 = vst [vmem:[#allocation44_spill] sm:$0xff] %v9209_v11 }
 0x3e4   : > { %10254 = vst [vmem:[#allocation36_spill] sm:$0xff] %v9193_v33 }
 0x3e5   : > { %v9195_v38 = vpop.f32.mrf.mxu0 }
 0x3e6   : > { %10255 = vst [vmem:[#allocation37_spill] sm:$0xff] %v9195_v38  ;;  %v9215_v38 = vpop.f32.mrf.mxu1 }
 0x3e7   : > { %v9199_v40 = vpop.f32.mrf.mxu0  ;;  %10265 = vst [vmem:[#allocation47_spill] sm:$0xff] %v9215_v38 }
 0x3e8   : > { %10257 = vst [vmem:[#allocation39_spill] sm:$0xff] %v9199_v40 }
 0x3e9   : > { %v9201_v4 = vpop.f32.mrf.mxu0 }
 0x3ea   : > { %10258 = vst [vmem:[#allocation40_spill] sm:$0xff] %v9201_v4  ;;  %v9221_v4 = vpop.f32.mrf.mxu1 }
 0x3eb   : > { %v9205_v32 = vpop.f32.mrf.mxu0  ;;  %10268 = vst [vmem:[#allocation50_spill] sm:$0xff] %v9221_v4 }
 0x3ec   : > { %10260 = vst [vmem:[#allocation42_spill] sm:$0xff] %v9205_v32  ;;  %v9226_v32 = vsub.s32 1, %v8692_v1  ;;  %v9232_v11 = vpop.f32.mrf.mxu1 }
 0x3ed   : > { %v9207_v6 = vpop.f32.mrf.mxu0  ;;  %10272 = vst [vmem:[#allocation54_spill] sm:$0xff] %v9232_v11 }
 0x3ee   : > { %10261 = vst [vmem:[#allocation43_spill] sm:$0xff] %v9207_v6  ;;  %10270 = vst [vmem:[#allocation52_spill] sm:$0xff] %v9226_v32  ;;  %v9245_v13 = vpop.f32.mrf.mxu1 }
 0x3ef   : > { %v9211_v58 = vpop.f32.mrf.mxu0 }
 0x3f0   : > { %10263 = vst [vmem:[#allocation45_spill] sm:$0xff] %v9211_v58  ;;  %v3681_v58 = vadd.f32 %v9019_v9, %v9021_v39  ;;  %v3676_v39 = vadd.f32 %v9042_v30, %v9032_v44 }
 0x3f1   : > { %v9213_v33 = vpop.f32.mrf.mxu0 }
 0x3f2   : > { %10264 = vst [vmem:[#allocation46_spill] sm:$0xff] %v9213_v33 }
 0x3f3   : > { %v9217_v29 = vpop.f32.mrf.mxu0 }
 0x3f4   : > { %10266 = vst [vmem:[#allocation48_spill] sm:$0xff] %v9217_v29  ;;  %v3673_v29 = vadd.f32 %v9026_v17, %v9023_v14 }
 0x3f5   : > { %v9219_v40 = vpop.f32.mrf.mxu0 }
 0x3f6   : > { %10267 = vst [vmem:[#allocation49_spill] sm:$0xff] %v9219_v40  ;;  %v9237_v40 = vld [vmem:[%s8017_s23] sm:$0xff] }
 0x3f7   : > { %v9223_v8 = vpop.f32.mrf.mxu0  ;;  %10273 = vst [vmem:[#allocation55_spill] sm:$0xff] %v9237_v40 }
 0x3f8   : > { %10269 = vst [vmem:[#allocation51_spill] sm:$0xff] %v9223_v8  ;;  %v9241_v8 = vrot.slane %v9237_v40, %v9226_v32 }
 0x3f9   : > { %v9228_v6 = vpop.f32.mrf.mxu0 }
 0x3fa   : > { %10271 = vst [vmem:[#allocation53_spill] sm:$0xff] %v9228_v6  ;;  %v3684_v6 = vadd.f32 %v9035_v41, %v9028_v23  ;;  %v9254_v23 = vpop.f32.mrf.mxu1 }
 0x3fb   : > { %v7506_v33 = vpop.f32.mrf.mxu0 }
 0x3fc   : > { %v4522_v38 = vadd.f32 %v7506_v33, %v3681_v58  ;;  %v3697_v58 = vadd.f32 %v9050_v26, %v9037_v7 }
 0x3fd   : > { %v4265_v1 = vpop.f32.mrf.mxu0 }
 0x3fe   : > { %v4520_v4 = vadd.f32 %v4265_v1, %v3673_v29  ;;  %v4590_v14 = vadd.f32 %v9241_v8, %v4522_v38  ;;  %v3689_v1 = vadd.f32 %v9056_v10, %v9039_v21  ;;  %v3700_v38 = vadd.f32 %v9064_v15, %v9044_v16 }
 0x3ff   : > { %v7507_v9 = vpop.f32.mrf.mxu0  ;;  %v3692_v21 = vadd.f32 %v9070_v47, %v9048_v3 }
 0x400   : > { %v4523_v17 = vadd.f32 %v7507_v9, %v3684_v6  ;;  %v4588_v32 = vadd.f32 %v9241_v8, %v4520_v4  ;;  %v4654_v29 = vmax.f32 %v4590_v14, 0.0 }
 0x401   : > { %v4268_v33 = vpop.f32.mrf.mxu0 }
 0x402   : > { %v4591_v40 = vadd.f32 %v9241_v8, %v4523_v17  ;;  %v4521_v11 = vadd.f32 %v4268_v33, %v3676_v39  ;;  %v4652_v26 = vmax.f32 %v4588_v32, 0.0  ;;  %v9261_v39 = vpop.f32.mrf.mxu1 }
 0x403   : > { %v7510_v41 = vpop.f32.mrf.mxu0 }
 0x404   : > { %v4655_v44 = vmax.f32 %v4591_v40, 0.0  ;;  %v4589_v30 = vadd.f32 %v9241_v8, %v4521_v11  ;;  %v4526_v6 = vadd.f32 %v7510_v41, %v3697_v58  ;;  %v3713_v58 = vadd.f32 %v9078_v22, %v9052_v19 }
 0x405   : > { %v4281_v7 = vpop.f32.mrf.mxu0  ;;  %v3705_v41 = vadd.f32 %v9084_v5, %v9054_v35  ;;  %v3716_v19 = vadd.f32 %v9092_v62, %v9058_v31  ;;  %v3708_v35 = vadd.f32 %v9098_v49, %v9062_v43 }
 0x406   : > { %v4717_v4 = vpack.c.bf16 %v4655_v44, %v4654_v29  ;;  %v4653_v9 = vmax.f32 %v4589_v30, 0.0  ;;  %v4524_v17 = vadd.f32 %v4281_v7, %v3689_v1  ;;  %v4594_v10 = vadd.f32 %v9241_v8, %v4526_v6  ;;  %v9270_v1 = vpop.f32.mrf.mxu1 }
 0x407   : > { %v7511_v33 = vpop.f32.mrf.mxu0 }
 0x408   : > { %v4527_v40 = vadd.f32 %v7511_v33, %v3700_v38  ;;  %v4716_v14 = vpack.c.bf16 %v4653_v9, %v4652_v26  ;;  %v4592_v16 = vadd.f32 %v9241_v8, %v4524_v17  ;;  %v4658_v47 = vmax.f32 %v4594_v10, 0.0  ;;  %v9277_v9 = vpop.f32.mrf.mxu1 }
 0x409   : > { %v4284_v11 = vpop.f32.mrf.mxu0  ;;  %v3729_v10 = vadd.f32 %v9106_v24, %v9066_v50  ;;  %v3732_v50 = vadd.f32 %v9119_v48, %v9072_v36 }
 0x40a   : > { %v4595_v15 = vadd.f32 %v9241_v8, %v4527_v40  ;;  %v4525_v32 = vadd.f32 %v4284_v11, %v3692_v21  ;;  %7584 = vmatprep.mubr.bf16.mxu1 %v4716_v14  ;;  %v4656_v6 = vmax.f32 %v4592_v16, 0.0  ;;  %v9286_v14 = vpop.f32.mrf.mxu1  ;;  %v3721_v11 = vadd.f32 %v9112_v60, %v9068_v54 }
 0x40b   : > { %v7514_v3 = vpop.f32.mrf.mxu0  ;;  %7585 = vmatmul.mubr.bf16.vlgmr.msra.gmra.mxu1 %v4717_v4  ;;  %v3724_v54 = vadd.f32 %v9125_v12, %v9076_v25 }
 0x40c   : > { %v4659_v29 = vmax.f32 %v4595_v15, 0.0  ;;  %v4593_v44 = vadd.f32 %v9241_v8, %v4525_v32  ;;  %v4530_v30 = vadd.f32 %v7514_v3, %v3713_v58 }
 0x40d   : > { %v4297_v22 = vpop.f32.mrf.mxu0 }
 0x40e   : > { %v4719_v38 = vpack.c.bf16 %v4659_v29, %v4658_v47  ;;  %v4657_v7 = vmax.f32 %v4593_v44, 0.0  ;;  %v4528_v26 = vadd.f32 %v4297_v22, %v3705_v41  ;;  %v4598_v5 = vadd.f32 %v9241_v8, %v4530_v30  ;;  %v9293_v29 = vpop.f32.mrf.mxu1 }
 0x40f   : > { %v7515_v17 = vpop.f32.mrf.mxu0 }
 0x410   : > { %v4531_v4 = vadd.f32 %v7515_v17, %v3716_v19  ;;  %v4718_v33 = vpack.c.bf16 %v4657_v7, %v4656_v6  ;;  %v4596_v31 = vadd.f32 %v9241_v8, %v4528_v26  ;;  %v4662_v49 = vmax.f32 %v4598_v5, 0.0  ;;  %v9302_v7 = vpop.f32.mrf.mxu1 }
 0x411   : > { %v4300_v21 = vpop.f32.mrf.mxu0  ;;  %v3745_v6 = vadd.f32 %v9131_v52, %v9080_v45  ;;  %v3737_v26 = vadd.f32 %v9137_v37, %v9082_v55  ;;  %v3748_v45 = vadd.f32 %v9143_v57, %v9086_v42  ;;  %v3740_v55 = vadd.f32 %v9149_v53, %v9090_v56 }
 0x412   : > { %v4599_v62 = vadd.f32 %v9241_v8, %v4531_v4  ;;  %v4529_v40 = vadd.f32 %v4300_v21, %v3708_v35  ;;  %7588 = vmatprep.mubr.bf16.mxu1 %v4718_v33  ;;  %v4660_v32 = vmax.f32 %v4596_v31, 0.0  ;;  %v9309_v31 = vpop.f32.mrf.mxu1 }
 0x413   : > { %v7518_v43 = vpop.f32.mrf.mxu0  ;;  %7589 = vmatmul.mubr.bf16.gmra.mxu1 %v4719_v38 }
 0x414   : > { %v4663_v58 = vmax.f32 %v4599_v62, 0.0  ;;  %v4597_v16 = vadd.f32 %v9241_v8, %v4529_v40  ;;  %v4534_v15 = vadd.f32 %v7518_v43, %v3729_v10 }
 0x415   : > { %v4313_v24 = vpop.f32.mrf.mxu0 }
 0x416   : > { %v4721_v41 = vpack.c.bf16 %v4663_v58, %v4662_v49  ;;  %v4661_v3 = vmax.f32 %v4597_v16, 0.0  ;;  %v4532_v47 = vadd.f32 %v4313_v24, %v3721_v11  ;;  %v4602_v60 = vadd.f32 %v9241_v8, %v4534_v15  ;;  %v9318_v16 = vpop.f32.mrf.mxu1 }
 0x417   : > { %v7519_v44 = vpop.f32.mrf.mxu0  ;;  %v3761_v49 = vadd.f32 %v9155_v51, %v9094_v59  ;;  %v3753_v15 = vadd.f32 %v9161_v27, %v9096_v61  ;;  %v3764_v59 = vadd.f32 %v9167_v18, %v9100_v2  ;;  %v3756_v61 = vadd.f32 %v9173_v0, %v9104_v34 }
 0x418   : > { %v4535_v30 = vadd.f32 %v7519_v44, %v3732_v50  ;;  %v4720_v19 = vpack.c.bf16 %v4661_v3, %v4660_v32  ;;  %v4600_v36 = vadd.f32 %v9241_v8, %v4532_v47  ;;  %v4666_v12 = vmax.f32 %v4602_v60, 0.0 }
 0x419   : > { %v4316_v22 = vpop.f32.mrf.mxu0 }
 0x41a   : > { %v4603_v48 = vadd.f32 %v9241_v8, %v4535_v30  ;;  %v4533_v38 = vadd.f32 %v4316_v22, %v3724_v54  ;;  %7592 = vmatprep.mubr.bf16.mxu1 %v4720_v19  ;;  %v4664_v4 = vmax.f32 %v4600_v36, 0.0  ;;  %v9325_v54 = vpop.f32.mrf.mxu1 }
 0x41b   : > { %v7522_v25 = vpop.f32.mrf.mxu0  ;;  %7593 = vmatmul.mubr.bf16.gmra.mxu1 %v4721_v41 }
 0x41c   : > { %v4667_v17 = vmax.f32 %v4603_v48, 0.0  ;;  %v4601_v35 = vadd.f32 %v9241_v8, %v4533_v38  ;;  %v4538_v5 = vadd.f32 %v7522_v25, %v3745_v6  ;;  %v3777_v6 = vadd.f32 %v9179_v28, %v9108_v20  ;;  %v9334_v48 = vpop.f32.mrf.mxu1  ;;  %v10275_v28 = vld [vmem:[#allocation35_spill] sm:$0xff] }
 0x41d   : > { %v4329_v52 = vpop.f32.mrf.mxu0  ;;  %v3769_v38 = vadd.f32 %v9185_v46, %v9110_v63  ;;  %v10277_v63 = vld [vmem:[#allocation38_spill] sm:$0xff] }
 0x41e   : > { %v4723_v33 = vpack.c.bf16 %v4667_v17, %v4666_v12  ;;  %v4665_v21 = vmax.f32 %v4601_v35, 0.0  ;;  %v4536_v10 = vadd.f32 %v4329_v52, %v3737_v26  ;;  %v4606_v37 = vadd.f32 %v9241_v8, %v4538_v5  ;;  %v10274_v17 = vld [vmem:[#allocation9_spill] sm:$0xff] }
 0x41f   : > { %v7523_v62 = vpop.f32.mrf.mxu0  ;;  %v3780_v20 = vadd.f32 %v10275_v28, %v10274_v17 }
 0x420   : > { %v4539_v40 = vadd.f32 %v7523_v62, %v3748_v45  ;;  %v4722_v11 = vpack.c.bf16 %v4665_v21, %v4664_v4  ;;  %v4604_v42 = vadd.f32 %v9241_v8, %v4536_v10  ;;  %v4670_v53 = vmax.f32 %v4606_v37, 0.0  ;;  %v10276_v10 = vld [vmem:[#allocation10_spill] sm:$0xff] }
 0x421   : > { %v4332_v43 = vpop.f32.mrf.mxu0  ;;  %v3772_v46 = vadd.f32 %v10277_v63, %v10276_v10 }
 0x422   : > { %v4607_v57 = vadd.f32 %v9241_v8, %v4539_v40  ;;  %v4537_v58 = vadd.f32 %v4332_v43, %v3740_v55  ;;  %7596 = vmatprep.mubr.bf16.mxu1 %v4722_v11  ;;  %v4668_v41 = vmax.f32 %v4604_v42, 0.0  ;;  %v10278_v11 = vld [vmem:[#allocation11_spill] sm:$0xff]  ;;  %v10279_v43 = vld [vmem:[#allocation41_spill] sm:$0xff] }
 0x423   : > { %v7526_v56 = vpop.f32.mrf.mxu0  ;;  %7597 = vmatmul.mubr.bf16.gmra.mxu1 %v4723_v33  ;;  %v9341_v33 = vpop.f32.mrf.mxu1 }
 0x424   : > { %v4671_v50 = vmax.f32 %v4607_v57, 0.0  ;;  %v4605_v24 = vadd.f32 %v9241_v8, %v4537_v58  ;;  %v4542_v32 = vadd.f32 %v7526_v56, %v3761_v49  ;;  %v3793_v49 = vadd.f32 %v10279_v43, %v10278_v11  ;;  %v10280_v56 = vld [vmem:[#allocation12_spill] sm:$0xff] }
 0x425   : > { %v4345_v51 = vpop.f32.mrf.mxu0 }
 0x426   : > { %v4725_v3 = vpack.c.bf16 %v4671_v50, %v4670_v53  ;;  %v4669_v47 = vmax.f32 %v4605_v24, 0.0  ;;  %v4540_v44 = vadd.f32 %v4345_v51, %v3753_v15  ;;  %v4610_v27 = vadd.f32 %v9241_v8, %v4542_v32  ;;  %v9350_v15 = vpop.f32.mrf.mxu1  ;;  %v10281_v53 = vld [vmem:[#allocation44_spill] sm:$0xff] }
 0x427   : > { %v7527_v60 = vpop.f32.mrf.mxu0  ;;  %v3785_v50 = vadd.f32 %v10281_v53, %v10280_v56 }
 0x428   : > { %v4543_v30 = vadd.f32 %v7527_v60, %v3764_v59  ;;  %v4724_v19 = vpack.c.bf16 %v4669_v47, %v4668_v41  ;;  %v4608_v2 = vadd.f32 %v9241_v8, %v4540_v44  ;;  %v4674_v0 = vmax.f32 %v4610_v27, 0.0  ;;  %v10283_v47 = vld [vmem:[#allocation47_spill] sm:$0xff] }
 0x429   : > { %v4348_v22 = vpop.f32.mrf.mxu0 }
 0x42a   : > { %v4611_v18 = vadd.f32 %v9241_v8, %v4543_v30  ;;  %v4541_v36 = vadd.f32 %v4348_v22, %v3756_v61  ;;  %7600 = vmatprep.mubr.bf16.mxu1 %v4724_v19  ;;  %v4672_v5 = vmax.f32 %v4608_v2, 0.0  ;;  %v9357_v22 = vpop.f32.mrf.mxu1  ;;  %v10284_v2 = vld [vmem:[#allocation14_spill] sm:$0xff] }
 0x42b   : > { %v7530_v34 = vpop.f32.mrf.mxu0  ;;  %7601 = vmatmul.mubr.bf16.gmra.mxu1 %v4725_v3  ;;  %v10282_v3 = vld [vmem:[#allocation13_spill] sm:$0xff] }
 0x42c   : > { %v4675_v26 = vmax.f32 %v4611_v18, 0.0  ;;  %v4609_v25 = vadd.f32 %v9241_v8, %v4541_v36  ;;  %v4546_v12 = vadd.f32 %v7530_v34, %v3777_v6  ;;  %v3796_v44 = vadd.f32 %v10283_v47, %v10282_v3  ;;  %v10285_v18 = vld [vmem:[#allocation50_spill] sm:$0xff]  ;;  %v10292_v47 = vld [vmem:[#allocation20_spill] sm:$0xff] }
 0x42d   : > { %v4361_v35 = vpop.f32.mrf.mxu0  ;;  %v3788_v36 = vadd.f32 %v10285_v18, %v10284_v2 }
 0x42e   : > { %v4727_v45 = vpack.c.bf16 %v4675_v26, %v4674_v0  ;;  %v4673_v52 = vmax.f32 %v4609_v25, 0.0  ;;  %v4544_v4 = vadd.f32 %v4361_v35, %v3769_v38  ;;  %v4614_v62 = vadd.f32 %v9241_v8, %v4546_v12  ;;  %v10286_v25 = vld [vmem:[#allocation15_spill] sm:$0xff]  ;;  %v10287_v12 = vld [vmem:[#allocation54_spill] sm:$0xff] }
 0x42f   : > { %v7531_v21 = vpop.f32.mrf.mxu0  ;;  %v3809_v17 = vadd.f32 %v10287_v12, %v10286_v25 }
 0x430   : > { %v4547_v55 = vadd.f32 %v7531_v21, %v3780_v20  ;;  %v4726_v37 = vpack.c.bf16 %v4673_v52, %v4672_v5  ;;  %v4612_v42 = vadd.f32 %v9241_v8, %v4544_v4  ;;  %v4678_v32 = vmax.f32 %v4614_v62, 0.0  ;;  %v9366_v5 = vpop.f32.mrf.mxu1  ;;  %v10289_v62 = vld [vmem:[#allocation17_spill] sm:$0xff] }
 0x431   : > { %v4364_v40 = vpop.f32.mrf.mxu0 }
 0x432   : > { %v4615_v57 = vadd.f32 %v9241_v8, %v4547_v55  ;;  %v4545_v58 = vadd.f32 %v4364_v40, %v3772_v46  ;;  %7604 = vmatprep.mubr.bf16.mxu1 %v4726_v37  ;;  %v4676_v61 = vmax.f32 %v4612_v42, 0.0  ;;  %v3812_v55 = vadd.f32 %v9254_v23, %v10289_v62  ;;  %v9373_v42 = vpop.f32.mrf.mxu1 }
 0x433   : > { %v7534_v24 = vpop.f32.mrf.mxu0  ;;  %7605 = vmatmul.mubr.bf16.gmra.mxu1 %v4727_v45  ;;  %v10288_v45 = vld [vmem:[#allocation16_spill] sm:$0xff] }
 0x434   : > { %v4679_v59 = vmax.f32 %v4615_v57, 0.0  ;;  %v4613_v51 = vadd.f32 %v9241_v8, %v4545_v58  ;;  %v4550_v41 = vadd.f32 %v7534_v24, %v3793_v49  ;;  %v3801_v52 = vadd.f32 %v9245_v13, %v10288_v45  ;;  %v10290_v58 = vld [vmem:[#allocation18_spill] sm:$0xff]  ;;  %v9382_v3 = vpop.f32.mrf.mxu1 }
 0x435   : > { %v4377_v60 = vpop.f32.mrf.mxu0  ;;  %v3804_v13 = vadd.f32 %v9261_v39, %v10290_v58 }
 0x436   : > { %v4729_v27 = vpack.c.bf16 %v4679_v59, %v4678_v32  ;;  %v4677_v30 = vmax.f32 %v4613_v51, 0.0  ;;  %v4548_v19 = vadd.f32 %v4377_v60, %v3785_v50  ;;  %v4618_v38 = vadd.f32 %v9241_v8, %v4550_v41  ;;  %v10291_v32 = vld [vmem:[#allocation19_spill] sm:$0xff] }
 0x437   : > { %v7535_v6 = vpop.f32.mrf.mxu0  ;;  %v3825_v59 = vadd.f32 %v9270_v1, %v10291_v32 }
 0x438   : > { %v4551_v34 = vadd.f32 %v7535_v6, %v3796_v44  ;;  %v4728_v0 = vpack.c.bf16 %v4677_v30, %v4676_v61  ;;  %v4616_v28 = vadd.f32 %v9241_v8, %v4548_v19  ;;  %v4682_v21 = vmax.f32 %v4618_v38, 0.0  ;;  %v10293_v19 = vld [vmem:[#allocation21_spill] sm:$0xff] }
 0x439   : > { %v4380_v26 = vpop.f32.mrf.mxu0  ;;  %v3817_v44 = vadd.f32 %v9277_v9, %v10292_v47  ;;  %v3828_v1 = vadd.f32 %v9286_v14, %v10293_v19  ;;  %v10301_v19 = vld [vmem:[#allocation29_spill] sm:$0xff] }
 0x43a   : > { %v4619_v20 = vadd.f32 %v9241_v8, %v4551_v34  ;;  %v4549_v35 = vadd.f32 %v4380_v26, %v3788_v36  ;;  %7608 = vmatprep.mubr.bf16.mxu1 %v4728_v0  ;;  %v4680_v40 = vmax.f32 %v4616_v28, 0.0  ;;  %v9389_v34 = vpop.f32.mrf.mxu1  ;;  %v10294_v26 = vld [vmem:[#allocation22_spill] sm:$0xff] }
 0x43b   : > { %v7538_v4 = vpop.f32.mrf.mxu0  ;;  %7609 = vmatmul.mubr.bf16.gmra.mxu1 %v4729_v27  ;;  %v3820_v9 = vadd.f32 %v9293_v29, %v10294_v26  ;;  %v10302_v26 = vld [vmem:[#allocation30_spill] sm:$0xff] }
 0x43c   : > { %v4683_v10 = vmax.f32 %v4619_v20, 0.0  ;;  %v4617_v63 = vadd.f32 %v9241_v8, %v4549_v35  ;;  %v4554_v46 = vadd.f32 %v7538_v4, %v3809_v17  ;;  %v10295_v20 = vld [vmem:[#allocation23_spill] sm:$0xff]  ;;  %v9398_v4 = vpop.f32.mrf.mxu1 }
 0x43d   : > { %v4393_v37 = vpop.f32.mrf.mxu0  ;;  %v3841_v35 = vadd.f32 %v9302_v7, %v10295_v20 }
 0x43e   : > { %v4731_v11 = vpack.c.bf16 %v4683_v10, %v4682_v21  ;;  %v4681_v43 = vmax.f32 %v4617_v63, 0.0  ;;  %v4552_v49 = vadd.f32 %v4393_v37, %v3801_v52  ;;  %v4622_v56 = vadd.f32 %v9241_v8, %v4554_v46  ;;  %v10296_v21 = vld [vmem:[#allocation24_spill] sm:$0xff]  ;;  %v10297_v37 = vld [vmem:[#allocation25_spill] sm:$0xff]  ;;  %v9405_v58 = vpop.f32.mrf.mxu1 }
 0x43f   : > { %v7539_v57 = vpop.f32.mrf.mxu0  ;;  %v3833_v10 = vadd.f32 %v9309_v31, %v10296_v21  ;;  %v3844_v7 = vadd.f32 %v9318_v16, %v10297_v37 }
 0x440   : > { %v4555_v53 = vadd.f32 %v7539_v57, %v3812_v55  ;;  %v4730_v50 = vpack.c.bf16 %v4681_v43, %v4680_v40  ;;  %v4620_v23 = vadd.f32 %v9241_v8, %v4552_v49  ;;  %v4686_v60 = vmax.f32 %v4622_v56, 0.0  ;;  %v10298_v56 = vld [vmem:[#allocation26_spill] sm:$0xff]  ;;  %v7479_v47 = vpop.f32.mrf.mxu1 }
 0x441   : > { %v4396_v24 = vpop.f32.mrf.mxu0  ;;  %v3836_v31 = vadd.f32 %v9325_v54, %v10298_v56 }
 0x442   : > { %v4623_v51 = vadd.f32 %v9241_v8, %v4555_v53  ;;  %v4553_v41 = vadd.f32 %v4396_v24, %v3804_v13  ;;  %7612 = vmatprep.mubr.bf16.mxu1 %v4730_v50  ;;  %v4684_v2 = vmax.f32 %v4620_v23, 0.0 }
 0x443   : > { %v7542_v39 = vpop.f32.mrf.mxu0  ;;  %7613 = vmatmul.mubr.bf16.gmra.mxu1 %v4731_v11 }
 0x444   : > { %v4687_v61 = vmax.f32 %v4623_v51, 0.0  ;;  %v4621_v27 = vadd.f32 %v9241_v8, %v4553_v41  ;;  %v4558_v30 = vadd.f32 %v7542_v39, %v3825_v59  ;;  %v10299_v59 = vld [vmem:[#allocation27_spill] sm:$0xff] }
 0x445   : > { %v4409_v6 = vpop.f32.mrf.mxu0  ;;  %v3857_v23 = vadd.f32 %v9334_v48, %v10299_v59  ;;  %v3860_v48 = vadd.f32 %v9350_v15, %v10301_v19 }
 0x446   : > { %v4733_v18 = vpack.c.bf16 %v4687_v61, %v4686_v60  ;;  %v4685_v36 = vmax.f32 %v4621_v27, 0.0  ;;  %v4556_v38 = vadd.f32 %v4409_v6, %v3817_v44  ;;  %v4626_v25 = vadd.f32 %v9241_v8, %v4558_v30  ;;  %v10300_v44 = vld [vmem:[#allocation28_spill] sm:$0xff] }
 0x447   : > { %v7543_v0 = vpop.f32.mrf.mxu0  ;;  %v3849_v39 = vadd.f32 %v9341_v33, %v10300_v44  ;;  %v3852_v33 = vadd.f32 %v9357_v22, %v10302_v26 }
 0x448   : > { %v4559_v12 = vadd.f32 %v7543_v0, %v3828_v1  ;;  %v4732_v17 = vpack.c.bf16 %v4685_v36, %v4684_v2  ;;  %v4624_v14 = vadd.f32 %v9241_v8, %v4556_v38  ;;  %v4690_v63 = vmax.f32 %v4626_v25, 0.0  ;;  %v3883_v38 = vpop.f32.mrf.mxu1 }
 0x449   : > { %v4412_v28 = vpop.f32.mrf.mxu0 }
 0x44a   : > { %v4627_v45 = vadd.f32 %v9241_v8, %v4559_v12  ;;  %v4557_v52 = vadd.f32 %v4412_v28, %v3820_v9  ;;  %7616 = vmatprep.mubr.bf16.mxu1 %v4732_v17  ;;  %v4688_v11 = vmax.f32 %v4624_v14, 0.0  ;;  %v10303_v28 = vld [vmem:[#allocation31_spill] sm:$0xff] }
 0x44b   : > { %v7546_v29 = vpop.f32.mrf.mxu0  ;;  %7617 = vmatmul.mubr.bf16.gmra.mxu1 %v4733_v18  ;;  %v3873_v20 = vadd.f32 %v9366_v5, %v10303_v28  ;;  %v10312_v28 = vld [vmem:[#allocation43_spill] sm:$0xff] }
 0x44c   : > { %v4691_v46 = vmax.f32 %v4627_v45, 0.0  ;;  %v4625_v62 = vadd.f32 %v9241_v8, %v4557_v52  ;;  %v4562_v55 = vadd.f32 %v7546_v29, %v3841_v35  ;;  %v7482_v45 = vpop.f32.mrf.mxu1  ;;  %v10304_v52 = vld [vmem:[#allocation32_spill] sm:$0xff] }
 0x44d   : > { %v4425_v40 = vpop.f32.mrf.mxu0  ;;  %v3865_v21 = vadd.f32 %v9373_v42, %v10304_v52 }
 0x44e   : > { %v4735_v43 = vpack.c.bf16 %v4691_v46, %v4690_v63  ;;  %v4689_v49 = vmax.f32 %v4625_v62, 0.0  ;;  %v4560_v57 = vadd.f32 %v4425_v40, %v3833_v10  ;;  %v4630_v53 = vadd.f32 %v9241_v8, %v4562_v55  ;;  %v10305_v62 = vld [vmem:[#allocation33_spill] sm:$0xff] }
 0x44f   : > { %v7547_v13 = vpop.f32.mrf.mxu0  ;;  %v3876_v5 = vadd.f32 %v9382_v3, %v10305_v62 }
 0x450   : > { %v4563_v50 = vadd.f32 %v7547_v13, %v3844_v7  ;;  %v4734_v24 = vpack.c.bf16 %v4689_v49, %v4688_v11  ;;  %v4628_v16 = vadd.f32 %v9241_v8, %v4560_v57  ;;  %v4694_v54 = vmax.f32 %v4630_v53, 0.0  ;;  %v10306_v57 = vld [vmem:[#allocation34_spill] sm:$0xff] }
 0x451   : > { %v4428_v32 = vpop.f32.mrf.mxu0  ;;  %v3868_v42 = vadd.f32 %v9389_v34, %v10306_v57 }
 0x452   : > { %v4631_v51 = vadd.f32 %v9241_v8, %v4563_v50  ;;  %v4561_v41 = vadd.f32 %v4428_v32, %v3836_v31  ;;  %7620 = vmatprep.mubr.bf16.mxu1 %v4734_v24  ;;  %v4692_v6 = vmax.f32 %v4628_v16, 0.0  ;;  %v10307_v50 = vld [vmem:[#allocation36_spill] sm:$0xff]  ;;  %v10308_v16 = vld [vmem:[#allocation37_spill] sm:$0xff] }
 0x453   : > { %v7550_v60 = vpop.f32.mrf.mxu0  ;;  %7621 = vmatmul.mubr.bf16.gmra.mxu1 %v4735_v43  ;;  %v3896_v43 = vpop.f32.mrf.mxu1  ;;  %v3889_v24 = vadd.f32 %v9398_v4, %v10307_v50 }
 0x454   : > { %v4695_v61 = vmax.f32 %v4631_v51, 0.0  ;;  %v4629_v27 = vadd.f32 %v9241_v8, %v4561_v41  ;;  %v4566_v30 = vadd.f32 %v7550_v60, %v3857_v23  ;;  %v3881_v51 = vadd.f32 %v9405_v58, %v10308_v16  ;;  %v10317_v16 = vld [vmem:[#allocation51_spill] sm:$0xff] }
 0x455   : > { %v4441_v1 = vpop.f32.mrf.mxu0  ;;  %v7483_v23 = vpop.f32.mrf.mxu1 }
 0x456   : > { %v4737_v2 = vpack.c.bf16 %v4695_v61, %v4694_v54  ;;  %v4693_v18 = vmax.f32 %v4629_v27, 0.0  ;;  %v4564_v36 = vadd.f32 %v4441_v1, %v3849_v39  ;;  %v4634_v9 = vadd.f32 %v9241_v8, %v4566_v30  ;;  %v10309_v54 = vld [vmem:[#allocation39_spill] sm:$0xff] }
 0x457   : > { %v7551_v0 = vpop.f32.mrf.mxu0  ;;  %v3892_v61 = vadd.f32 %v7479_v47, %v10309_v54  ;;  %v3899_v1 = vpop.f32.mrf.mxu1 }
 0x458   : > { %v4567_v25 = vadd.f32 %v7551_v0, %v3860_v48  ;;  %v4736_v12 = vpack.c.bf16 %v4693_v18, %v4692_v6  ;;  %v4632_v15 = vadd.f32 %v9241_v8, %v4564_v36  ;;  %v4698_v22 = vmax.f32 %v4634_v9, 0.0 }
 0x459   : > { %v4444_v17 = vpop.f32.mrf.mxu0 }
 0x45a   : > { %v4635_v35 = vadd.f32 %v9241_v8, %v4567_v25  ;;  %v4565_v14 = vadd.f32 %v4444_v17, %v3852_v33  ;;  %7624 = vmatprep.mubr.bf16.mxu1 %v4736_v12  ;;  %v4696_v37 = vmax.f32 %v4632_v15, 0.0  ;;  %v10311_v33 = vld [vmem:[#allocation42_spill] sm:$0xff]  ;;  %v7486_v17 = vpop.f32.mrf.mxu1 }
 0x45b   : > { %v7554_v10 = vpop.f32.mrf.mxu0  ;;  %7625 = vmatmul.mubr.bf16.gmra.mxu1 %v4737_v2  ;;  %v10310_v2 = vld [vmem:[#allocation40_spill] sm:$0xff]  ;;  %v3905_v9 = vadd.f32 %v7482_v45, %v10311_v33 }
 0x45c   : > { %v4699_v29 = vmax.f32 %v4635_v35, 0.0  ;;  %v4633_v63 = vadd.f32 %v9241_v8, %v4565_v14  ;;  %v4570_v46 = vadd.f32 %v7554_v10, %v3873_v20  ;;  %v3884_v18 = vadd.f32 %v3883_v38, %v10310_v2  ;;  %v3912_v62 = vpop.f32.mrf.mxu1 }
 0x45d   : > { %v4457_v55 = vpop.f32.mrf.mxu0  ;;  %v3897_v20 = vadd.f32 %v3896_v43, %v10312_v28  ;;  %v10321_v28 = vld [vmem:[#allocation55_spill] sm:$0xff] }
 0x45e   : > { %v4739_v7 = vpack.c.bf16 %v4699_v29, %v4698_v22  ;;  %v4697_v40 = vmax.f32 %v4633_v63, 0.0  ;;  %v4568_v11 = vadd.f32 %v4457_v55, %v3865_v21  ;;  %v4638_v13 = vadd.f32 %v9241_v8, %v4570_v46  ;;  %v10313_v21 = vld [vmem:[#allocation45_spill] sm:$0xff]  ;;  %v10314_v55 = vld [vmem:[#allocation46_spill] sm:$0xff] }
 0x45f   : > { %v7555_v49 = vpop.f32.mrf.mxu0  ;;  %v3908_v10 = vadd.f32 %v7483_v23, %v10313_v21 }
 0x460   : > { %v4571_v56 = vadd.f32 %v7555_v49, %v3876_v5  ;;  %v4738_v31 = vpack.c.bf16 %v4697_v40, %v4696_v37  ;;  %v4636_v3 = vadd.f32 %v9241_v8, %v4568_v11  ;;  %v4702_v34 = vmax.f32 %v4638_v13, 0.0  ;;  %v10315_v49 = vld [vmem:[#allocation48_spill] sm:$0xff] }
 0x461   : > { %v4460_v53 = vpop.f32.mrf.mxu0  ;;  %v3900_v37 = vadd.f32 %v3899_v1, %v10314_v55  ;;  %v3921_v57 = vadd.f32 %v7486_v17, %v10315_v49 }
 0x462   : > { %v4639_v32 = vadd.f32 %v9241_v8, %v4571_v56  ;;  %v4569_v59 = vadd.f32 %v4460_v53, %v3868_v42  ;;  %7628 = vmatprep.mubr.bf16.mxu1 %v4738_v31  ;;  %v4700_v27 = vmax.f32 %v4636_v3, 0.0  ;;  %v7487_v31 = vpop.f32.mrf.mxu1  ;;  %v10316_v53 = vld [vmem:[#allocation49_spill] sm:$0xff] }
 0x463   : > { %v7558_v41 = vpop.f32.mrf.mxu0  ;;  %7629 = vmatmul.mubr.bf16.gmra.mxu1 %v4739_v7  ;;  %v3913_v50 = vadd.f32 %v3912_v62, %v10316_v53  ;;  %v10323_v53 = vld [vmem:[#allocation8_spill] sm:$0xff] }
 0x464   : > { %v4703_v44 = vmax.f32 %v4639_v32, 0.0  ;;  %v4637_v39 = vadd.f32 %v9241_v8, %v4569_v59  ;;  %v4574_v60 = vadd.f32 %v7558_v41, %v3889_v24  ;;  %v3915_v54 = vpop.f32.mrf.mxu1 }
 0x465   : > { %v4473_v4 = vpop.f32.mrf.mxu0 }
 0x466   : > { %v4741_v30 = vpack.c.bf16 %v4703_v44, %v4702_v34  ;;  %v4701_v19 = vmax.f32 %v4637_v39, 0.0  ;;  %v4572_v48 = vadd.f32 %v4473_v4, %v3881_v51  ;;  %v4642_v58 = vadd.f32 %v9241_v8, %v4574_v60  ;;  %v10318_v4 = vld [vmem:[#allocation53_spill] sm:$0xff] }
 0x467   : > { %v7559_v6 = vpop.f32.mrf.mxu0  ;;  %v3924_v51 = vadd.f32 %v7487_v31, %v10317_v16 }
 0x468   : > { %v4575_v36 = vadd.f32 %v7559_v6, %v3892_v61  ;;  %v4740_v0 = vpack.c.bf16 %v4701_v19, %v4700_v27  ;;  %v4640_v25 = vadd.f32 %v9241_v8, %v4572_v48  ;;  %v4706_v35 = vmax.f32 %v4642_v58, 0.0 }
 0x469   : > { %v4476_v26 = vpop.f32.mrf.mxu0  ;;  %v3916_v27 = vadd.f32 %v3915_v54, %v10318_v4 }
 0x46a   : > { %v4643_v47 = vadd.f32 %v9241_v8, %v4575_v36  ;;  %v4573_v12 = vadd.f32 %v4476_v26, %v3884_v18  ;;  %7632 = vmatprep.mubr.bf16.mxu1 %v4740_v0  ;;  %v4704_v45 = vmax.f32 %v4640_v25, 0.0 }
 0x46b   : > { %v7562_v15 = vpop.f32.mrf.mxu0  ;;  %7633 = vmatmul.mubr.bf16.gmra.mxu1 %v4741_v30 }
 0x46c   : > { %v4707_v38 = vmax.f32 %v4643_v47, 0.0  ;;  %v4641_v14 = vadd.f32 %v9241_v8, %v4573_v12  ;;  %v4578_v52 = vadd.f32 %v7562_v15, %v3905_v9  ;;  %v10319_v47 = vld [vmem:[#allocation7_spill] sm:$0xff] }
 0x46d   : > { %v4489_v22 = vpop.f32.mrf.mxu0  ;;  %v9464_v12 = vsub.s32 2, %v10319_v47 }
 0x46e   : > { %v4743_v29 = vpack.c.bf16 %v4707_v38, %v4706_v35  ;;  %v4705_v63 = vmax.f32 %v4641_v14, 0.0  ;;  %v4576_v46 = vadd.f32 %v4489_v22, %v3897_v20  ;;  %v4646_v7 = vadd.f32 %v9241_v8, %v4578_v52 }
 0x46f   : > { %v7563_v5 = vpop.f32.mrf.mxu0  ;;  %10320 = vst [vmem:[#allocation9_spill] sm:$0xff] %v9464_v12  ;;  %v9468_v20 = vrot.slane %v10321_v28, %v9464_v12 }
 0x470   : > { %v4579_v40 = vadd.f32 %v7563_v5, %v3908_v10  ;;  %v4742_v11 = vpack.c.bf16 %v4705_v63, %v4704_v45  ;;  %v4644_v42 = vadd.f32 %v9241_v8, %v4576_v46  ;;  %v4710_v3 = vmax.f32 %v4646_v7, 0.0 }
 0x471   : > { %v4492_v43 = vpop.f32.mrf.mxu0 }
 0x472   : > { %v4647_v13 = vadd.f32 %v9241_v8, %v4579_v40  ;;  %v4577_v56 = vadd.f32 %v4492_v43, %v3900_v37  ;;  %7636 = vmatprep.mubr.bf16.mxu1 %v4742_v11  ;;  %v4708_v34 = vmax.f32 %v4644_v42, 0.0 }
 0x473   : > { %v7566_v24 = vpop.f32.mrf.mxu0  ;;  %7637 = vmatmul.mubr.bf16.gmra.mxu1 %v4743_v29 }
 0x474   : > { %v4711_v32 = vmax.f32 %v4647_v13, 0.0  ;;  %v4645_v59 = vadd.f32 %v9241_v8, %v4577_v56  ;;  %v4582_v23 = vadd.f32 %v7566_v24, %v3921_v57  ;;  %v1550_v57 = vld [vmem:[%s10206_s2] sm:$0xf]  ;;  %v1535_v13 = vadd.s32 8, %v10319_v47  ;;  %v10322_v56 = vld [vmem:[#allocation52_spill] sm:$0xff] }
 0x475   : > { %v4505_v41 = vpop.f32.mrf.mxu0  ;;  %v9515_v31 = vrot.slane %v1550_v57, %v10322_v56  ;;  %v10345_v56 = vmov 0 }
 0x476   : > { %v4745_v44 = vpack.c.bf16 %v4711_v32, %v4710_v3  ;;  %v4709_v39 = vmax.f32 %v4645_v59, 0.0  ;;  %v4580_v60 = vadd.f32 %v4505_v41, %v3913_v50  ;;  %v4650_v30 = vadd.f32 %v9241_v8, %v4582_v23 }
 0x477   : > { %v7567_v61 = vpop.f32.mrf.mxu0  ;;  %v9518_v50 = vrot.slane %v1550_v57, %v10323_v53  ;;  %vm1568_vm0 = vcmp.eq.s32.totalorder %v10319_v47, %v9515_v31  ;;  %vm1572_vm1 = vcmp.eq.s32.totalorder %v1535_v13, %v9515_v31  ;;  %v10324_v32 = vmov 1.0|1.0  }
 0x478   : > { %v4583_v19 = vadd.f32 %v7567_v61, %v3924_v51  ;;  %v4744_v48 = vpack.c.bf16 %v4709_v39, %v4708_v34  ;;  %v4648_v6 = vadd.f32 %v9241_v8, %v4580_v60  ;;  %v4714_v58 = vmax.f32 %v4650_v30, 0.0  ;;  %vm6386_vm2 = vmpackc.low %vm1572_vm1, %vm1568_vm0 }
 0x479   : > { %v4508_v1 = vpop.f32.mrf.mxu0  ;;  %vm1567_vm3 = vcmp.eq.s32.totalorder %v10319_v47, %v9518_v50  ;;  %vm1571_vm4 = vcmp.eq.s32.totalorder %v1535_v13, %v9518_v50  ;;  %6387 = vmatprep.mubr.msk.bf16.mxu0 %vm6386_vm2, %v10324_v32  ;;  %v1565_v59 = vsub.s32 3, %v10319_v47  ;;  %v9539_v41 = vrot.slane %v1550_v57, %v9464_v12 }
 0x47a   : > { %v4651_v2 = vadd.f32 %v9241_v8, %v4583_v19  ;;  %v4581_v18 = vadd.f32 %v4508_v1, %v3916_v27  ;;  %7640 = vmatprep.mubr.bf16.mxu1 %v4744_v48  ;;  %v4712_v26 = vmax.f32 %v4648_v6, 0.0  ;;  %vm9532_vm5 = vmpackc.low %vm1571_vm4, %vm1567_vm3  ;;  %v9553_v39 = vadd.s32 24, %v10319_v47 }
 0x47b   : > { %7641 = vmatmul.mubr.bf16.gmra.mxu1 %v4745_v44  ;;  %v9536_v51 = vrot.slane %v1550_v57, %v1565_v59  ;;  %vm1569_vm9 = vcmp.eq.s32.totalorder %v10319_v47, %v9539_v41  ;;  %vm1573_vm10 = vcmp.eq.s32.totalorder %v1535_v13, %v9539_v41  ;;  %v9550_v44 = vadd.s32 16, %v10319_v47 }
 0x47c   : > { %v4715_v36 = vmax.f32 %v4651_v2, 0.0  ;;  %v4649_v0 = vadd.f32 %v9241_v8, %v4581_v18  ;;  %vm9558_vm11 = vmpackc.low %vm1573_vm10, %vm1569_vm9  ;;  %vm1581_vm0 = vcmp.eq.s32.totalorder %v9553_v39, %v9539_v41  ;;  %v9585_v48 = vadd.s32 32, %v10319_v47 }
 0x47d   : > { %vm1570_vm6 = vcmp.eq.s32.totalorder %v10319_v47, %v9536_v51  ;;  %vm1574_vm7 = vcmp.eq.s32.totalorder %v1535_v13, %v9536_v51  ;;  %vm1578_vm12 = vcmp.eq.s32.totalorder %v9550_v44, %v9536_v51  ;;  %vm1582_vm13 = vcmp.eq.s32.totalorder %v9553_v39, %v9536_v51 }
 0x47e   : > { %v4747_v33 = vpack.c.bf16 %v4715_v36, %v4714_v58  ;;  %v4713_v9 = vmax.f32 %v4649_v0, 0.0  ;;  %vm6418_vm8 = vmpackc.low %vm1574_vm7, %vm1570_vm6  ;;  %vm1577_vm15 = vcmp.eq.s32.totalorder %v9550_v44, %v9539_v41  ;;  %v9588_v1 = vadd.s32 40, %v10319_v47 }
 0x47f   : > { %vm9568_vm14 = vmpackc.low %vm1582_vm13, %vm1578_vm12  ;;  %vm1586_vm2 = vcmp.eq.s32.totalorder %v9585_v48, %v9536_v51  ;;  %vm1585_vm6 = vcmp.eq.s32.totalorder %v9585_v48, %v9539_v41 }
 0x480   : > { %v4746_v25 = vpack.c.bf16 %v4713_v9, %v4712_v26  ;;  %vm9578_vm1 = vmpackc.low %vm1581_vm0, %vm1577_vm15  ;;  %vm1590_vm3 = vcmp.eq.s32.totalorder %v9588_v1, %v9536_v51  ;;  %vm1589_vm7 = vcmp.eq.s32.totalorder %v9588_v1, %v9539_v41  ;;  %v9615_v26 = vadd.s32 48, %v10319_v47 }
 0x481   : > { %vm9598_vm4 = vmpackc.low %vm1590_vm3, %vm1586_vm2 }
 0x482   : > { %7644 = vmatprep.mubr.bf16.mxu1 %v4746_v25  ;;  %vm1594_vm9 = vcmp.eq.s32.totalorder %v9615_v26, %v9536_v51  ;;  %vm1593_vm13 = vcmp.eq.s32.totalorder %v9615_v26, %v9539_v41 }
 0x483   : > { %7645 = vmatmul.mubr.bf16.gmra.mxu1 %v4747_v33  ;;  %v9618_v33 = vadd.s32 56, %v10319_v47 }
 0x484   : > { %6419 = vmatprep.mubr.msk.bf16.mxu1 %vm6418_vm8, %v10324_v32  ;;  %vm9608_vm8 = vmpackc.low %vm1589_vm7, %vm1585_vm6 }
 0x485   : > { %vm1598_vm10 = vcmp.eq.s32.totalorder %v9618_v33, %v9536_v51  ;;  %vm1597_vm15 = vcmp.eq.s32.totalorder %v9618_v33, %v9539_v41 }
 0x486   : > { %vm9624_vm12 = vmpackc.low %vm1598_vm10, %vm1594_vm9 }
 0x487   : > { %vm9632_vm0 = vmpackc.low %vm1597_vm15, %vm1593_vm13 }
 0x4cb   : > { %v7586_v17 = vpop.f32.mrf.mxu1 }
 0x4cc   : > { %v9471_v38 = vadd.f32 %v7586_v17, %v9468_v20 }
 0x4cd   : > { %v4834_v15 = vpop.f32.mrf.mxu1 }
 0x4ce   : > { %v9477_v52 = vadd.f32 %v4834_v15, %v9468_v20  ;;  %v10339_v15 = vmov 0 }
 0x4cf   : > { %v7587_v35 = vpop.f32.mrf.mxu1  ;;  %v10340_v15 = vsel %vm9632_vm0, 4294967295, %v10339_v15 }
 0x4d0   : > { %v9474_v8 = vadd.f32 %v7587_v35, %v9468_v20  ;;  %10341 = vst [vmem:[#allocation35_spill] sm:$0xff] %v10340_v15 }
 0x4d1   : > { %v4837_v14 = vpop.f32.mrf.mxu1 }
 0x4d2   : > { %v9482_v10 = vadd.f32 %v4837_v14, %v9468_v20  ;;  %v9637_v14 = vadd.s32 64, %v10319_v47 }
 0x4d3   : > { %v7590_v22 = vpop.f32.mrf.mxu1 }
 0x4d4   : > { %v9487_v46 = vadd.f32 %v7590_v22, %v9468_v20  ;;  %v9640_v22 = vadd.s32 72, %v10319_v47  ;;  %vm1602_vm2 = vcmp.eq.s32.totalorder %v9637_v14, %v9536_v51  ;;  %vm1601_vm7 = vcmp.eq.s32.totalorder %v9637_v14, %v9539_v41 }
 0x4d5   : > { %v4850_v29 = vpop.f32.mrf.mxu1 }
 0x4d6   : > { %v9493_v55 = vadd.f32 %v4850_v29, %v9468_v20  ;;  %vm1606_vm3 = vcmp.eq.s32.totalorder %v9640_v22, %v9536_v51  ;;  %vm1605_vm9 = vcmp.eq.s32.totalorder %v9640_v22, %v9539_v41 }
 0x4d7   : > { %v7591_v63 = vpop.f32.mrf.mxu1  ;;  %vm9646_vm6 = vmpackc.low %vm1606_vm3, %vm1602_vm2 }
 0x4d8   : > { %v9490_v62 = vadd.f32 %v7591_v63, %v9468_v20  ;;  %vm9655_vm10 = vmpackc.low %vm1605_vm9, %vm1601_vm7 }
 0x4d9   : > { %v4853_v5 = vpop.f32.mrf.mxu1  ;;  %v10346_v56 = vsel %vm9655_vm10, 4294967295, %v10345_v56  ;;  %vm1587_vm10 = vcmp.eq.s32.totalorder %v9588_v1, %v9518_v50 }
 0x4da   : > { %v9498_v7 = vadd.f32 %v4853_v5, %v9468_v20  ;;  %v10342_v5 = vmov 0  ;;  %10347 = vst [vmem:[#allocation38_spill] sm:$0xff] %v10346_v56 }
 0x4db   : > { %v9500_v40 = vpop.f32.mrf.mxu1  ;;  %v10343_v5 = vsel %vm9646_vm6, 4294967295, %v10342_v5  ;;  %vm1600_vm6 = vcmp.eq.s32.totalorder %v9637_v14, %v9515_v31 }
 0x4dc   : > { %10344 = vst [vmem:[#allocation10_spill] sm:$0xff] %v10343_v5  ;;  %v9669_v5 = vadd.s32 88, %v10319_v47 }
 0x4dd   : > { %v9504_v43 = vpop.f32.mrf.mxu1 }
 0x4de   : > { %vm1614_vm15 = vcmp.eq.s32.totalorder %v9669_v5, %v9536_v51  ;;  %vm1613_vm7 = vcmp.eq.s32.totalorder %v9669_v5, %v9539_v41 }
 0x4df   : > { %v9506_v49 = vpop.f32.mrf.mxu1 }
 0x4e1   : > { %v9511_v42 = vpop.f32.mrf.mxu1  ;;  %v10371_v4 = vld [vmem:[#allocation38_spill] sm:$0xff] }
 0x4e3   : > { %v9520_v24 = vpop.f32.mrf.mxu1  ;;  %v10369_v54 = vld [vmem:[#allocation10_spill] sm:$0xff] }
 0x4e4   : > { %v4891_v45 = vadd.f32 %v9520_v24, %v9468_v20 }
 0x4e5   : > { %v9528_v3 = vpop.f32.mrf.mxu1 }
 0x4e7   : > { %v7599_v16 = vpop.f32.mrf.mxu1 }
 0x4e8   : > { %v4894_v57 = vadd.f32 %v7599_v16, %v9468_v20  ;;  %v9666_v16 = vadd.s32 80, %v10319_v47 }
 0x4e9   : > { %v9541_v34 = vpop.f32.mrf.mxu1 }
 0x4ea   : > { %v5096_v56 = vpack.c.bf16 %v4894_v57, %v4891_v45  ;;  %vm1610_vm13 = vcmp.eq.s32.totalorder %v9666_v16, %v9536_v51  ;;  %v10348_v45 = vmov 0  ;;  %vm1609_vm3 = vcmp.eq.s32.totalorder %v9666_v16, %v9539_v41 }
 0x4eb   : > { %v9555_v60 = vpop.f32.mrf.mxu1  ;;  %vm9680_vm2 = vmpackc.low %vm1614_vm15, %vm1610_vm13 }
 0x4ec   : > { %v10349_v45 = vsel %vm9680_vm2, 4294967295, %v10348_v45  ;;  %vm9691_vm9 = vmpackc.low %vm1613_vm7, %vm1609_vm3 }
 0x4ed   : > { %v9566_v61 = vpop.f32.mrf.mxu1 }
 0x4ef   : > { %v9576_v27 = vpop.f32.mrf.mxu1 }
 0x4f1   : > { %v9582_v19 = vpop.f32.mrf.mxu1 }
 0x4f3   : > { %v9590_v6 = vpop.f32.mrf.mxu1 }
 0x4f5   : > { %v9596_v2 = vpop.f32.mrf.mxu1 }
 0x4f7   : > { %v9606_v58 = vpop.f32.mrf.mxu1 }
 0x4f9   : > { %v9612_v0 = vpop.f32.mrf.mxu1 }
 0x4fb   : > { %v7610_v9 = vpop.f32.mrf.mxu1 }
 0x4fd   : > { %v4930_v25 = vpop.f32.mrf.mxu1 }
 0x4ff   : > { %v7611_v28 = vpop.f32.mrf.mxu1 }
 0x500   : > { %v4942_v15 = vadd.f32 %v7611_v28, %v9468_v20 }
 0x501   : > { %v4933_v35 = vpop.f32.mrf.mxu1 }
 0x502   : > { %v4934_v57 = vadd.f32 %v4933_v35, %v9468_v20 }
 0x503   : > { %v7614_v29 = vpop.f32.mrf.mxu1 }
 0x504   : > { %v4955_v53 = vadd.f32 %v7614_v29, %v9468_v20  ;;  %v4886_v29 = vadd.f32 %v9541_v34, %v9468_v20  ;;  %v10350_v34 = vmov 0 }
 0x505   : > { %v4946_v63 = vpop.f32.mrf.mxu1  ;;  %v10351_v34 = vsel %vm9691_vm9, 4294967295, %v10350_v34 }
 0x506   : > { %v4947_v21 = vadd.f32 %v4946_v63, %v9468_v20 }
 0x507   : > { %v7615_v13 = vpop.f32.mrf.mxu1 }
 0x508   : > { %v4958_v59 = vadd.f32 %v7615_v13, %v9468_v20 }
 0x509   : > { %v4949_v11 = vpop.f32.mrf.mxu1 }
 0x50a   : > { %v5104_v37 = vpack.c.bf16 %v4958_v59, %v4955_v53  ;;  %v4950_v12 = vadd.f32 %v4949_v11, %v9468_v20  ;;  %v4883_v11 = vadd.f32 %v9528_v3, %v9468_v20 }
 0x50b   : > { %v7618_v13 = vpop.f32.mrf.mxu1 }
 0x50c   : > { %v5103_v24 = vpack.c.bf16 %v4950_v12, %v4947_v21  ;;  %6861 = vmatprep.subr.bf16.mxu0 %v5104_v37  ;;  %v4939_v12 = vadd.f32 %v7610_v9, %v9468_v20  ;;  %v4878_v21 = vadd.f32 %v9506_v49, %v9468_v20  ;;  %v5095_v37 = vpack.c.bf16 %v4886_v29, %v4883_v11 }
 0x50d   : > { %v4962_v63 = vpop.f32.mrf.mxu1  ;;  %6862 = vmatpush3.bf16.msra.mxu0 %v5096_v56  ;;  %v9697_v56 = vadd.f32 %v7618_v13, %v9468_v20  ;;  %v4875_v9 = vadd.f32 %v9500_v40, %v9468_v20  ;;  %v4931_v49 = vadd.f32 %v4930_v25, %v9468_v20  ;;  %v9714_v13 = vadd.s32 96, %v10319_v47 }
 0x50e   : > { %6863 = vmatprep.subr.bf16.mxu0 %v5103_v24  ;;  %v5102_v28 = vpack.c.bf16 %v4942_v15, %v4939_v12  ;;  %v9706_v59 = vadd.f32 %v4962_v63, %v9468_v20  ;;  %v9717_v24 = vadd.s32 104, %v10319_v47  ;;  %v4870_v25 = vadd.f32 %v9511_v42, %v9468_v20 }
 0x50f   : > { %v7619_v3 = vpop.f32.mrf.mxu1  ;;  %v5094_v40 = vpack.c.bf16 %v4878_v21, %v4875_v9  ;;  %v4926_v11 = vadd.f32 %v9606_v58, %v9468_v20  ;;  %v5101_v12 = vpack.c.bf16 %v4934_v57, %v4931_v49  ;;  %vm1618_vm13 = vcmp.eq.s32.totalorder %v9714_v13, %v9536_v51 }
 0x510   : > { %v9700_v53 = vadd.f32 %v7619_v3, %v9468_v20  ;;  %vm1622_vm15 = vcmp.eq.s32.totalorder %v9717_v24, %v9536_v51  ;;  %v4867_v21 = vadd.f32 %v9504_v43, %v9468_v20  ;;  %v10352_v42 = vmov 0 }
 0x511   : > { %v4965_v29 = vpop.f32.mrf.mxu1  ;;  %6864 = vmatpush3.bf16.msra.mxu0 %v5095_v37  ;;  %vm9731_vm3 = vmpackc.low %vm1622_vm15, %vm1618_vm13  ;;  %vm1617_vm7 = vcmp.eq.s32.totalorder %v9714_v13, %v9539_v41  ;;  %vm1621_vm9 = vcmp.eq.s32.totalorder %v9717_v24, %v9539_v41  ;;  %v4923_v58 = vadd.f32 %v9590_v6, %v9468_v20  ;;  %v10354_v43 = vmov 0 }
 0x512   : > { %v9711_v35 = vadd.f32 %v4965_v29, %v9468_v20  ;;  %6865 = vmatprep.subr.bf16.mxu0 %v5102_v28  ;;  %v10353_v42 = vsel %vm9731_vm3, 4294967295, %v10352_v42  ;;  %v5093_v28 = vpack.c.bf16 %v4870_v25, %v4867_v21  ;;  %vm9741_vm2 = vmpackc.low %vm1621_vm9, %vm1617_vm7  ;;  %v4918_v49 = vadd.f32 %v9612_v0, %v9468_v20 }
 0x513   : > { %v7622_v63 = vpop.f32.mrf.mxu1  ;;  %v10355_v43 = vsel %vm9741_vm2, 4294967295, %v10354_v43  ;;  %v5100_v9 = vpack.c.bf16 %v4926_v11, %v4923_v58  ;;  %v4915_v6 = vadd.f32 %v9596_v2, %v9468_v20  ;;  %v9764_v0 = vadd.s32 112, %v10319_v47 }
 0x514   : > { %v9748_v29 = vadd.f32 %v7622_v63, %v9468_v20  ;;  %v9767_v63 = vadd.s32 120, %v10319_v47  ;;  %v4910_v2 = vadd.f32 %v9576_v27, %v9468_v20  ;;  %v10356_v47 = vpack.c.bf16 %v9490_v62, %v9487_v46 }
 0x515   : > { %v4978_v3 = vpop.f32.mrf.mxu1  ;;  %6866 = vmatpush3.bf16.msra.mxu0 %v5094_v40  ;;  %v5099_v58 = vpack.c.bf16 %v4918_v49, %v4915_v6  ;;  %vm1626_vm9 = vcmp.eq.s32.totalorder %v9764_v0, %v9536_v51  ;;  %v10357_v27 = vmov 0  ;;  %vm1625_vm7 = vcmp.eq.s32.totalorder %v9764_v0, %v9539_v41 }
 0x516   : > { %6867 = vmatprep.subr.bf16.mxu0 %v5101_v12  ;;  %v9756_v25 = vadd.f32 %v4978_v3, %v9468_v20  ;;  %vm1630_vm13 = vcmp.eq.s32.totalorder %v9767_v63, %v9536_v51  ;;  %vm1629_vm2 = vcmp.eq.s32.totalorder %v9767_v63, %v9539_v41  ;;  %v10359_v49 = vmov 0 }
 0x517   : > { %v7623_v57 = vpop.f32.mrf.mxu1  ;;  %vm9784_vm15 = vmpackc.low %vm1630_vm13, %vm1626_vm9  ;;  %v4902_v62 = vadd.f32 %v9582_v19, %v9468_v20  ;;  %v4899_v41 = vadd.f32 %v9566_v61, %v9468_v20  ;;  %vm1580_vm9 = vcmp.eq.s32.totalorder %v9553_v39, %v9515_v31 }
 0x518   : > { %v9751_v40 = vadd.f32 %v7623_v57, %v9468_v20  ;;  %v10358_v27 = vsel %vm9784_vm15, 4294967295, %v10357_v27  ;;  %vm9796_vm3 = vmpackc.low %vm1629_vm2, %vm1625_vm7  ;;  %vm1576_vm2 = vcmp.eq.s32.totalorder %v9550_v44, %v9515_v31  ;;  %vm1575_vm7 = vcmp.eq.s32.totalorder %v9550_v44, %v9518_v50 }
 0x519   : > { %v4981_v12 = vpop.f32.mrf.mxu1  ;;  %6868 = vmatpush3.bf16.msra.mxu0 %v5093_v28  ;;  %v10360_v49 = vsel %vm9796_vm3, 4294967295, %v10359_v49  ;;  %vm6390_vm13 = vmpackc.low %vm1580_vm9, %vm1576_vm2  ;;  %vm1579_vm3 = vcmp.eq.s32.totalorder %v9553_v39, %v9518_v50  ;;  %vm1584_vm2 = vcmp.eq.s32.totalorder %v9585_v48, %v9515_v31  ;;  %vm1588_vm9 = vcmp.eq.s32.totalorder %v9588_v1, %v9515_v31 }
 0x51a   : > { %v9761_v21 = vadd.f32 %v4981_v12, %v9468_v20  ;;  %6869 = vmatprep.subr.bf16.mxu0 %v5100_v9  ;;  %v4907_v9 = vadd.f32 %v9555_v60, %v9468_v20  ;;  %v10361_v12 = vpack.c.bf16 %v9498_v7, %v9493_v55  ;;  %v10363_v7 = vpack.c.bf16 %v9482_v10, %v9477_v52  ;;  %vm6394_vm15 = vmpackc.low %vm1588_vm9, %vm1584_vm2 }
 0x51b   : > { %v9771_v3 = vpop.f32.mrf.mxu1 }
 0x51c   : > { %v5098_v46 = vpack.c.bf16 %v4910_v2, %v4907_v9  ;;  %v10362_v2 = vpack.c.bf16 %v9474_v8, %v9471_v38 }
 0x51d   : > { %v9779_v57 = vpop.f32.mrf.mxu1  ;;  %6870 = vmatpush3.bf16.msra.mxu0 %v10356_v47 }
 0x51e   : > { %6871 = vmatprep.subr.bf16.mxu0 %v5099_v58  ;;  %v5097_v58 = vpack.c.bf16 %v4902_v62, %v4899_v41 }
 0x51f   : > { %v9794_v51 = vpop.f32.mrf.mxu1 }
 0x521   : > { %v9802_v6 = vpop.f32.mrf.mxu1  ;;  %6872 = vmatpush3.bf16.msra.mxu0 %v10361_v12 }
 0x522   : > { %6873 = vmatprep.subr.bf16.mxu0 %v5098_v46 }
 0x523   : > { %v7630_v60 = vpop.f32.mrf.mxu1 }
 0x525   : > { %v9809_v47 = vpop.f32.mrf.mxu1  ;;  %6874 = vmatpush3.bf16.msra.mxu0 %v10362_v2  ;;  %v5019_v2 = vadd.f32 %v7630_v60, %v9468_v20 }
 0x526   : > { %6875 = vmatprep.subr.bf16.mxu0 %v5097_v58  ;;  %v5011_v60 = vadd.f32 %v9809_v47, %v9468_v20 }
 0x527   : > { %v7631_v19 = vpop.f32.mrf.mxu1 }
 0x529   : > { %v5013_v55 = vpop.f32.mrf.mxu1  ;;  %6876 = vmatpush3.bf16.msra.mxu0 %v10363_v7 }
 0x52a   : > { %v5014_v15 = vadd.f32 %v5013_v55, %v9468_v20  ;;  %v5006_v55 = vadd.f32 %v9794_v51, %v9468_v20 }
 0x52b   : > { %v9821_v61 = vpop.f32.mrf.mxu1 }
 0x52c   : > { %6389 = vmatmul.mubr.msk.bf16.vlgmr.msra.gmra.mxu0 %vm9532_vm5, %v10324_v32  ;;  %vm6392_vm5 = vmpackc.low %vm1579_vm3, %vm1575_vm7  ;;  %vm1592_vm3 = vcmp.eq.s32.totalorder %v9615_v26, %v9515_v31  ;;  %vm1596_vm7 = vcmp.eq.s32.totalorder %v9618_v33, %v9515_v31 }
 0x52d   : > { %v9826_v38 = vpop.f32.mrf.mxu1  ;;  %6391 = vmatprep.mubr.msk.bf16.mxu0 %vm6390_vm13, %v10324_v32  ;;  %vm1583_vm13 = vcmp.eq.s32.totalorder %v9585_v48, %v9518_v50  ;;  %vm6398_vm9 = vmpackc.low %vm1596_vm7, %vm1592_vm3  ;;  %vm1599_vm7 = vcmp.eq.s32.totalorder %v9637_v14, %v9518_v50 }
 0x52e   : > { %vm6396_vm2 = vmpackc.low %vm1587_vm10, %vm1583_vm13  ;;  %vm1604_vm10 = vcmp.eq.s32.totalorder %v9640_v22, %v9515_v31 }
 0x52f   : > { %v9833_v8 = vpop.f32.mrf.mxu1  ;;  %vm6402_vm3 = vmpackc.low %vm1604_vm10, %vm1600_vm6  ;;  %vm1612_vm6 = vcmp.eq.s32.totalorder %v9669_v5, %v9515_v31  ;;  %vm1607_vm10 = vcmp.eq.s32.totalorder %v9666_v16, %v9518_v50 }
 0x531   : > { %v9839_v52 = vpop.f32.mrf.mxu1 }
 0x533   : > { %v9841_v10 = vpop.f32.mrf.mxu1 }
 0x534   : > { %6393 = vmatmul.mubr.msk.bf16.gmra.mxu0 %vm6392_vm5, %v10324_v32  ;;  %vm1595_vm5 = vcmp.eq.s32.totalorder %v9618_v33, %v9518_v50 }
 0x535   : > { %v9844_v23 = vpop.f32.mrf.mxu1  ;;  %6395 = vmatprep.mubr.msk.bf16.mxu0 %vm6394_vm15, %v10324_v32  ;;  %vm1591_vm15 = vcmp.eq.s32.totalorder %v9615_v26, %v9518_v50  ;;  %v5022_v26 = vadd.f32 %v7631_v19, %v9468_v20 }
 0x536   : > { %vm6400_vm13 = vmpackc.low %vm1595_vm5, %vm1591_vm15 }
 0x537   : > { %v9851_v44 = vpop.f32.mrf.mxu1  ;;  %v5112_v37 = vpack.c.bf16 %v5022_v26, %v5019_v2 }
 0x538   : > { %v5054_v51 = vadd.f32 %v9851_v44, %v9468_v20 }
 0x539   : > { %v9857_v39 = vpop.f32.mrf.mxu1 }
 0x53a   : > { %v5046_v44 = vadd.f32 %v9857_v39, %v9468_v20  ;;  %v5035_v39 = vadd.f32 %v9821_v61, %v9468_v20 }
 0x53b   : > { %v7642_v9 = vpop.f32.mrf.mxu1 }
 0x53c   : > { %6397 = vmatmul.mubr.msk.bf16.gmra.mxu0 %vm6396_vm2, %v10324_v32  ;;  %vm1603_vm2 = vcmp.eq.s32.totalorder %v9640_v22, %v9518_v50 }
 0x53d   : > { %v5058_v46 = vpop.f32.mrf.mxu1  ;;  %6399 = vmatprep.mubr.msk.bf16.mxu0 %vm6398_vm9, %v10324_v32  ;;  %vm1608_vm9 = vcmp.eq.s32.totalorder %v9666_v16, %v9515_v31  ;;  %vm6404_vm15 = vmpackc.low %vm1603_vm2, %vm1599_vm7  ;;  %vm1620_vm7 = vcmp.eq.s32.totalorder %v9717_v24, %v9515_v31 }
 0x53e   : > { %vm6406_vm5 = vmpackc.low %vm1612_vm6, %vm1608_vm9  ;;  %vm1615_vm6 = vcmp.eq.s32.totalorder %v9714_v13, %v9518_v50 }
 0x53f   : > { %v7643_v48 = vpop.f32.mrf.mxu1 }
 0x540   : > { %v5070_v28 = vadd.f32 %v7643_v48, %v9468_v20  ;;  %v5111_v48 = vpack.c.bf16 %v5014_v15, %v5011_v60  ;;  %v4998_v15 = vadd.f32 %v9802_v6, %v9468_v20 }
 0x541   : > { %v5061_v1 = vpop.f32.mrf.mxu1 }
 0x542   : > { %v5062_v47 = vadd.f32 %v5061_v1, %v9468_v20  ;;  %v5121_v1 = vld [vmem:[#allocation3 + $0x30] sm:$0xff] }
 0x543   : > { %v7646_v62 = vpop.f32.mrf.mxu1 }
 0x544   : > { %6401 = vmatmul.mubr.msk.bf16.gmra.mxu0 %vm6400_vm13, %v10324_v32  ;;  %v5083_v41 = vadd.f32 %v7646_v62, %v9468_v20  ;;  %v5067_v62 = vadd.f32 %v7642_v9, %v9468_v20  ;;  %vm1611_vm13 = vcmp.eq.s32.totalorder %v9669_v5, %v9518_v50  ;;  %v5059_v5 = vadd.f32 %v5058_v46, %v9468_v20 }
 0x545   : > { %v5074_v12 = vpop.f32.mrf.mxu1  ;;  %6403 = vmatprep.mubr.msk.bf16.mxu0 %vm6402_vm3, %v10324_v32  ;;  %vm1616_vm3 = vcmp.eq.s32.totalorder %v9714_v13, %v9515_v31  ;;  %vm6408_vm2 = vmpackc.low %vm1611_vm13, %vm1607_vm10  ;;  %vm1628_vm10 = vcmp.eq.s32.totalorder %v9767_v63, %v9515_v31  ;;  %v5038_v13 = vadd.f32 %v9833_v8, %v9468_v20 }
 0x546   : > { %v5075_v14 = vadd.f32 %v5074_v12, %v9468_v20  ;;  %vm6410_vm9 = vmpackc.low %vm1620_vm7, %vm1616_vm3  ;;  %v5117_v9 = vpack.c.bf16 %v5062_v47, %v5059_v5  ;;  %vm1623_vm7 = vcmp.eq.s32.totalorder %v9764_v0, %v9518_v50  ;;  %v5123_v47 = vld [vmem:[#allocation3 + $0x58] sm:$0xff] }
 0x547   : > { %v7647_v33 = vpop.f32.mrf.mxu1  ;;  %v5114_v8 = vpack.c.bf16 %v5038_v13, %v5035_v39  ;;  %v5125_v39 = vld [vmem:[#allocation3 + $0x50] sm:$0xff] }
 0x548   : > { %v5086_v58 = vadd.f32 %v7647_v33, %v9468_v20 }
 0x549   : > { %v5077_v7 = vpop.f32.mrf.mxu1 }
 0x54a   : > { %v5120_v22 = vpack.c.bf16 %v5086_v58, %v5083_v41  ;;  %v5078_v19 = vadd.f32 %v5077_v7, %v9468_v20 }
 0x54c   : > { %v5119_v11 = vpack.c.bf16 %v5078_v19, %v5075_v14  ;;  %6925 = vmatprep.subr.bf16.mxu1 %v5120_v22  ;;  %6405 = vmatmul.mubr.msk.bf16.gmra.mxu0 %vm6404_vm15, %v10324_v32  ;;  %vm1619_vm15 = vcmp.eq.s32.totalorder %v9717_v24, %v9518_v50  ;;  %v5122_v14 = vld [vmem:[#allocation3] sm:$0xff] }
 0x54d   : > { %6926 = vmatpush3.bf16.msra.mxu1 %v5112_v37  ;;  %6407 = vmatprep.mubr.msk.bf16.mxu0 %vm6406_vm5, %v10324_v32  ;;  %v5118_v37 = vpack.c.bf16 %v5070_v28, %v5067_v62  ;;  %v4995_v28 = vadd.f32 %v9779_v57, %v9468_v20  ;;  %vm1624_vm5 = vcmp.eq.s32.totalorder %v9764_v0, %v9515_v31  ;;  %vm6412_vm13 = vmpackc.low %vm1619_vm15, %vm1615_vm6 }
 0x54e   : > { %6927 = vmatprep.subr.bf16.mxu1 %v5119_v11  ;;  %v5003_v11 = vadd.f32 %v9771_v3, %v9468_v20  ;;  %v5051_v3 = vadd.f32 %v9841_v10, %v9468_v20  ;;  %v5043_v10 = vadd.f32 %v9844_v23, %v9468_v20  ;;  %vm6414_vm3 = vmpackc.low %vm1628_vm10, %vm1624_vm5  ;;  %v10364_v31 = vpack.c.bf16 %v9751_v40, %v9748_v29 }
 0x54f   : > { %v5109_v6 = vpack.c.bf16 %v4998_v15, %v4995_v28  ;;  %v5030_v23 = vadd.f32 %v9839_v52, %v9468_v20  ;;  %v10365_v29 = vpack.c.bf16 %v9761_v21, %v9756_v25  ;;  %v5027_v40 = vadd.f32 %v9826_v38, %v9468_v20  ;;  %v5126_v20 = vld [vmem:[#allocation3 + $0x68] sm:$0xff] }
 0x550   : > { %v5110_v16 = vpack.c.bf16 %v5006_v55, %v5003_v11  ;;  %v5116_v57 = vpack.c.bf16 %v5054_v51, %v5051_v3  ;;  %v5115_v24 = vpack.c.bf16 %v5046_v44, %v5043_v10  ;;  %v10366_v0 = vpack.c.bf16 %v9700_v53, %v9697_v56  ;;  %v5124_v3 = vld [vmem:[#allocation3 + $0x18] sm:$0xff] }
 0x551   : > { %6928 = vmatpush3.bf16.msra.mxu1 %v5111_v48  ;;  %v5113_v61 = vpack.c.bf16 %v5030_v23, %v5027_v40  ;;  %vm10378_vm6 = vnez %v10360_v49 }
 0x552   : > { %6929 = vmatprep.subr.bf16.mxu1 %v5118_v37 }
 0x554   : > { %6409 = vmatmul.mubr.msk.bf16.gmra.mxu0 %vm6408_vm2, %v10324_v32  ;;  %vm1627_vm2 = vcmp.eq.s32.totalorder %v9767_v63, %v9518_v50  ;;  %v10367_v50 = vpack.c.bf16 %v9711_v35, %v9706_v59 }
 0x555   : > { %6930 = vmatpush3.bf16.msra.mxu1 %v5110_v16  ;;  %6411 = vmatprep.mubr.msk.bf16.mxu0 %vm6410_vm9, %v10324_v32  ;;  %vm6416_vm9 = vmpackc.low %vm1627_vm2, %vm1623_vm7 }
 0x556   : > { %6931 = vmatprep.subr.bf16.mxu1 %v5117_v9 }
 0x559   : > { %6932 = vmatpush3.bf16.msra.mxu1 %v5109_v6 }
 0x55a   : > { %6933 = vmatprep.subr.bf16.mxu1 %v5116_v57 }
 0x55c   : > { %6413 = vmatmul.mubr.msk.bf16.gmra.mxu0 %vm6412_vm13, %v10324_v32 }
 0x55d   : > { %6934 = vmatpush3.bf16.msra.mxu1 %v10364_v31  ;;  %6415 = vmatprep.mubr.msk.bf16.mxu0 %vm6414_vm3, %v10324_v32 }
 0x55e   : > { %6935 = vmatprep.subr.bf16.mxu1 %v5115_v24 }
 0x561   : > { %6936 = vmatpush3.bf16.msra.mxu1 %v10365_v29 }
 0x562   : > { %6937 = vmatprep.subr.bf16.mxu1 %v5114_v8 }
 0x564   : > { %6417 = vmatmul.mubr.msk.bf16.gmra.mxu0 %vm6416_vm9, %v10324_v32 }
 0x565   : > { %6938 = vmatpush3.bf16.msra.mxu1 %v10366_v0 }
 0x566   : > { %6939 = vmatprep.subr.bf16.mxu1 %v5113_v61 }
 0x569   : > { %6940 = vmatpush3.bf16.msra.mxu1 %v10367_v50 }
 0x56c   : > { %6421 = vmatmul.mubr.msk.bf16.vlgmr.msra.gmra.mxu1 %vm9558_vm11, %v10324_v32  ;;  %vm10370_vm11 = vnez %v10369_v54 }
 0x56d   : > { %6423 = vmatprep.mubr.msk.bf16.mxu1 %vm9568_vm14, %v10324_v32  ;;  %vm10372_vm14 = vnez %v10371_v4 }
 0x574   : > { %6425 = vmatmul.mubr.msk.bf16.gmra.mxu1 %vm9578_vm1, %v10324_v32  ;;  %vm10373_vm1 = vnez %v10349_v45 }
 0x575   : > { %6427 = vmatprep.mubr.msk.bf16.mxu1 %vm9598_vm4, %v10324_v32  ;;  %vm10374_vm4 = vnez %v10351_v34 }
 0x57c   : > { %6429 = vmatmul.mubr.msk.bf16.gmra.mxu1 %vm9608_vm8, %v10324_v32  ;;  %vm10375_vm8 = vnez %v10353_v42 }
 0x57d   : > { %6431 = vmatprep.mubr.msk.bf16.mxu1 %vm9624_vm12, %v10324_v32  ;;  %vm10376_vm12 = vnez %v10355_v43 }
 0x584   : > { %6433 = vmatmul.mubr.msk.bf16.gmra.mxu1 %vm9632_vm0, %v10324_v32  ;;  %vm10377_vm0 = vnez %v10358_v27 }
 0x585   : > { %6435 = vmatprep.mubr.msk.bf16.mxu1 %vm10370_vm11, %v10324_v32 }
 0x58c   : > { %6437 = vmatmul.mubr.msk.bf16.gmra.mxu1 %vm10372_vm14, %v10324_v32 }
 0x58d   : > { %6439 = vmatprep.mubr.msk.bf16.mxu1 %vm10373_vm1, %v10324_v32 }
 0x594   : > { %6441 = vmatmul.mubr.msk.bf16.gmra.mxu1 %vm10374_vm4, %v10324_v32 }
 0x595   : > { %6443 = vmatprep.mubr.msk.bf16.mxu1 %vm10375_vm8, %v10324_v32 }
 0x59c   : > { %6445 = vmatmul.mubr.msk.bf16.gmra.mxu1 %vm10376_vm12, %v10324_v32 }
 0x59d   : > { %6447 = vmatprep.mubr.msk.bf16.mxu1 %vm10377_vm0, %v10324_v32 }
 0x5a4   : > { %6449 = vmatmul.mubr.msk.bf16.gmra.mxu1 %vm10378_vm6, %v10324_v32 }
 0x5ec   : > { %v6877_v30 = vpop.f32.mrf.mxu0 }
 0x5ee   : > { %v6878_v18 = vpop.f32.mrf.mxu0 }
 0x5ef   : > { %v6879_v52 = vadd.f32 %v6878_v18, %v6877_v30 }
 0x5f0   : > { %v6880_v36 = vpop.f32.mrf.mxu0 }
 0x5f2   : > { %v6881_v17 = vpop.f32.mrf.mxu0 }
 0x5f3   : > { %v6882_v2 = vadd.f32 %v6881_v17, %v6880_v36 }
 0x5f4   : > { %v6883_v45 = vpop.f32.mrf.mxu0 }
 0x5f6   : > { %v6884_v34 = vpop.f32.mrf.mxu0 }
 0x5f7   : > { %v6885_v48 = vadd.f32 %v6884_v34, %v6883_v45  ;;  %v5127_v34 = vld [vmem:[#allocation3 + $0x8] sm:$0xff] }
 0x5f8   : > { %v6886_v56 = vpop.f32.mrf.mxu0 }
 0x5fa   : > { %v6887_v53 = vpop.f32.mrf.mxu0 }
 0x5fb   : > { %v6888_v9 = vadd.f32 %v6887_v53, %v6886_v56 }
 0x5fc   : > { %v6889_v59 = vpop.f32.mrf.mxu0 }
 0x5fe   : > { %v6890_v35 = vpop.f32.mrf.mxu0 }
 0x5ff   : > { %v6891_v24 = vadd.f32 %v6890_v35, %v6889_v59 }
 0x600   : > { %v6892_v42 = vpop.f32.mrf.mxu0 }
 0x602   : > { %v6893_v43 = vpop.f32.mrf.mxu0 }
 0x603   : > { %v6894_v0 = vadd.f32 %v6893_v43, %v6892_v42 }
 0x604   : > { %v6895_v25 = vpop.f32.mrf.mxu0 }
 0x606   : > { %v6896_v21 = vpop.f32.mrf.mxu0 }
 0x607   : > { %v6897_v17 = vadd.f32 %v6896_v21, %v6895_v25 }
 0x608   : > { %v10000_v63 = vpop.f32.mrf.mxu0 }
 0x60a   : > { %v10002_v27 = vpop.f32.mrf.mxu0 }
 0x60b   : > { %v6900_v42 = vadd.f32 %v10002_v27, %v10000_v63 }
 0x60c   : > { %v10004_v32 = vpop.f32.mrf.mxu0 }
 0x60e   : > { %v10006_v26 = vpop.f32.mrf.mxu0 }
 0x60f   : > { %v6903_v25 = vadd.f32 %v10006_v26, %v10004_v32  ;;  %v5131_v26 = vld [vmem:[#allocation3 + $0x10] sm:$0xff] }
 0x610   : > { %v10008_v19 = vpop.f32.mrf.mxu0 }
 0x612   : > { %v6905_v5 = vpop.f32.mrf.mxu0 }
 0x613   : > { %v6906_v63 = vadd.f32 %v6905_v5, %v10008_v19  ;;  %v5132_v19 = vld [vmem:[#allocation3 + $0x38] sm:$0xff] }
 0x614   : > { %v6907_v57 = vpop.f32.mrf.mxu0 }
 0x616   : > { %v6908_v23 = vpop.f32.mrf.mxu0 }
 0x618   : > { %v6910_v4 = vpop.f32.mrf.mxu0 }
 0x61a   : > { %v6911_v53 = vpop.f32.mrf.mxu0 }
 0x62c   : > { %v6941_v49 = vpop.f32.mrf.mxu1 }
 0x62e   : > { %v6942_v38 = vpop.f32.mrf.mxu1 }
 0x62f   : > { %v6943_v46 = vadd.f32 %v6942_v38, %v6941_v49  ;;  %v5128_v38 = vld [vmem:[#allocation3 + $0x48] sm:$0xff] }
 0x630   : > { %v6944_v12 = vpop.f32.mrf.mxu1 }
 0x631   : > { %v5269_v33 = vadd.f32 %v6943_v46, %v6879_v52  ;;  %v6913_v46 = vpop.f32.mrf.mxu0 }
 0x632   : > { %v6945_v41 = vpop.f32.mrf.mxu1 }
 0x633   : > { %v5331_v58 = vadd.f32 %v5269_v33, %v5121_v1  ;;  %v6946_v7 = vadd.f32 %v6945_v41, %v6944_v12  ;;  %v5129_v41 = vld [vmem:[#allocation3 + $0x40] sm:$0xff] }
 0x634   : > { %v6947_v22 = vpop.f32.mrf.mxu1 }
 0x635   : > { %5347 = vst [vmem:[#allocation3 + $0x30] sm:$0xff] %v5331_v58  ;;  %v5272_v60 = vadd.f32 %v6946_v7, %v6882_v2  ;;  %v6914_v2 = vpop.f32.mrf.mxu0 }
 0x636   : > { %v6948_v62 = vpop.f32.mrf.mxu1 }
 0x637   : > { %v5332_v55 = vadd.f32 %v5272_v60, %v5122_v14  ;;  %v6949_v37 = vadd.f32 %v6948_v62, %v6947_v22  ;;  %v5130_v60 = vld [vmem:[#allocation3 + $0x20] sm:$0xff] }
 0x638   : > { %v6950_v11 = vpop.f32.mrf.mxu1 }
 0x639   : > { %5348 = vst [vmem:[#allocation3] sm:$0xff] %v5332_v55  ;;  %v5277_v16 = vadd.f32 %v6949_v37, %v6885_v48  ;;  %v6916_v55 = vpop.f32.mrf.mxu0 }
 0x63a   : > { %v6951_v15 = vpop.f32.mrf.mxu1 }
 0x63b   : > { %v5333_v51 = vadd.f32 %v5277_v16, %v5123_v47  ;;  %v6952_v28 = vadd.f32 %v6951_v15, %v6950_v11  ;;  %v6909_v11 = vadd.f32 %v6908_v23, %v6907_v57  ;;  %v6917_v15 = vpop.f32.mrf.mxu0  ;;  %v5133_v57 = vld [vmem:[#allocation3 + $0x60] sm:$0xff] }
 0x63c   : > { %v6953_v6 = vpop.f32.mrf.mxu1 }
 0x63d   : > { %5349 = vst [vmem:[#allocation3 + $0x58] sm:$0xff] %v5333_v51  ;;  %v5280_v44 = vadd.f32 %v6952_v28, %v6888_v9 }
 0x63e   : > { %v6954_v10 = vpop.f32.mrf.mxu1 }
 0x63f   : > { %v5334_v13 = vadd.f32 %v5280_v44, %v5124_v3  ;;  %v6955_v31 = vadd.f32 %v6954_v10, %v6953_v6  ;;  %v6912_v3 = vadd.f32 %v6911_v53, %v6910_v4  ;;  %v6919_v44 = vpop.f32.mrf.mxu0 }
 0x640   : > { %v6956_v8 = vpop.f32.mrf.mxu1 }
 0x641   : > { %5350 = vst [vmem:[#allocation3 + $0x18] sm:$0xff] %v5334_v13  ;;  %v5285_v29 = vadd.f32 %v6955_v31, %v6891_v24  ;;  %v6915_v31 = vadd.f32 %v6914_v2, %v6913_v46  ;;  %v6920_v23 = vpop.f32.mrf.mxu0 }
 0x642   : > { %v6957_v40 = vpop.f32.mrf.mxu1 }
 0x643   : > { %v5335_v61 = vadd.f32 %v5285_v29, %v5125_v39  ;;  %v6958_v50 = vadd.f32 %v6957_v40, %v6956_v8  ;;  %v6922_v4 = vpop.f32.mrf.mxu0 }
 0x644   : > { %v6959_v54 = vpop.f32.mrf.mxu1 }
 0x645   : > { %5351 = vst [vmem:[#allocation3 + $0x50] sm:$0xff] %v5335_v61  ;;  %v5288_v30 = vadd.f32 %v6958_v50, %v6894_v0  ;;  %v6918_v0 = vadd.f32 %v6917_v15, %v6916_v55  ;;  %v6923_v53 = vpop.f32.mrf.mxu0 }
 0x646   : > { %v6960_v18 = vpop.f32.mrf.mxu1 }
 0x647   : > { %v5336_v36 = vadd.f32 %v5288_v30, %v5126_v20  ;;  %v6961_v45 = vadd.f32 %v6960_v18, %v6959_v54  ;;  %v5134_v20 = vld [vmem:[#allocation3 + $0x70] sm:$0xff] }
 0x648   : > { %v6962_v56 = vpop.f32.mrf.mxu1 }
 0x649   : > { %5352 = vst [vmem:[#allocation3 + $0x68] sm:$0xff] %v5336_v36  ;;  %v5293_v59 = vadd.f32 %v6961_v45, %v6897_v17  ;;  %v6921_v17 = vadd.f32 %v6920_v23, %v6919_v44 }
 0x64a   : > { %v6963_v35 = vpop.f32.mrf.mxu1 }
 0x64b   : > { %v5337_v49 = vadd.f32 %v5293_v59, %v5127_v34  ;;  %v6964_v43 = vadd.f32 %v6963_v35, %v6962_v56  ;;  %v5135_v34 = vld [vmem:[#allocation3 + $0x78] sm:$0xff] }
 0x64c   : > { %v6965_v52 = vpop.f32.mrf.mxu1  ;;  %v5369_v2 = vld [vmem:[#allocation3 + $0x50] sm:$0xff] (%p431_p5) }
 0x64d   : > { %5353 = vst [vmem:[#allocation3 + $0x8] sm:$0xff] %v5337_v49  ;;  %v5296_v1 = vadd.f32 %v6964_v43, %v6900_v42  ;;  %v6924_v42 = vadd.f32 %v6923_v53, %v6922_v4 }
 0x64e   : > { %v6966_v12 = vpop.f32.mrf.mxu1 }
 0x64f   : > { %v5338_v33 = vadd.f32 %v5296_v1, %v5128_v38  ;;  %v6967_v21 = vadd.f32 %v6966_v12, %v6965_v52  ;;  %v5136_v38 = vld [vmem:[#allocation3 + $0x28] sm:$0xff]  ;;  %v5365_v1 = vld [vmem:[#allocation3 + $0x30] sm:$0xff] (%p431_p5)  ;;  %v5366_v12 = vld [vmem:[#allocation3] sm:$0xff] (%p431_p5) }
 0x650   : > { %v6968_v58 = vpop.f32.mrf.mxu1 }
 0x651   : > { %5354 = vst [vmem:[#allocation3 + $0x48] sm:$0xff] %v5338_v33  ;;  %v5301_v7 = vadd.f32 %v6967_v21, %v6903_v25  ;;  %v5367_v33 = vld [vmem:[#allocation3 + $0x58] sm:$0xff] (%p431_p5)  ;;  %v5381_v25 = vmax.f32 (%p431_p5), %v5365_v1, 0.0  ;;  %v5382_v21 = vmax.f32 (%p431_p5), %v5366_v12, 0.0 }
 0x652   : > { %v6969_v14 = vpop.f32.mrf.mxu1 }
 0x653   : > { %v5339_v22 = vadd.f32 %v5301_v7, %v5129_v41  ;;  %v6970_v27 = vadd.f32 %v6969_v14, %v6968_v58  ;;  %v5368_v41 = vld [vmem:[#allocation3 + $0x18] sm:$0xff] (%p431_p5)  ;;  %v5383_v58 = vmax.f32 (%p431_p5), %v5367_v33, 0.0  ;;  %v5370_v7 = vld [vmem:[#allocation3 + $0x68] sm:$0xff] (%p431_p5)  ;;  %v7929_v14 = vmov (%p431_p5), 0.0  }
 0x654   : > { %v6971_v62 = vpop.f32.mrf.mxu1  ;;  %5477 = vst [vmem:[#allocation3 + $0x30] sm:$0xff] (%p431_p5), %v7929_v14  ;;  %5478 = vst [vmem:[#allocation3] sm:$0xff] (%p431_p5), %v7929_v14 }
 0x655   : > { %5355 = vst [vmem:[#allocation3 + $0x40] sm:$0xff] %v5339_v22  ;;  %v5304_v48 = vadd.f32 %v6970_v27, %v6906_v63  ;;  %5479 = vst [vmem:[#allocation3 + $0x58] sm:$0xff] (%p431_p5), %v7929_v14  ;;  %v5384_v22 = vmax.f32 (%p431_p5), %v5368_v41, 0.0  ;;  %v5385_v63 = vmax.f32 (%p431_p5), %v5369_v2, 0.0  ;;  %v5386_v27 = vmax.f32 (%p431_p5), %v5370_v7, 0.0 }
 0x656   : > { %v6972_v37 = vpop.f32.mrf.mxu1  ;;  %5480 = vst [vmem:[#allocation3 + $0x18] sm:$0xff] (%p431_p5), %v7929_v14  ;;  %5481 = vst [vmem:[#allocation3 + $0x50] sm:$0xff] (%p431_p5), %v7929_v14 }
 0x657   : > { %v5340_v47 = vadd.f32 %v5304_v48, %v5130_v60  ;;  %v6973_v32 = vadd.f32 %v6972_v37, %v6971_v62  ;;  %v5371_v60 = vld [vmem:[#allocation3 + $0x8] sm:$0xff] (%p431_p5)  ;;  %5482 = vst [vmem:[#allocation3 + $0x68] sm:$0xff] (%p431_p5), %v7929_v14  ;;  %v6513_v48 = vpack.c.bf16 (%p431_p5), %v5382_v21, %v5381_v25  ;;  %v6518_v15 = vpack.c.bf16 (%p431_p5), %v5384_v22, %v5383_v58 }
 0x658   : > { %v6974_v16 = vpop.f32.mrf.mxu1  ;;  %v5372_v62 = vld [vmem:[#allocation3 + $0x48] sm:$0xff] (%p431_p5)  ;;  %v5387_v37 = vmax.f32 (%p431_p5), %v5371_v60, 0.0  ;;  %5483 = vst [vmem:[#allocation3 + $0x8] sm:$0xff] (%p431_p5), %v7929_v14 }
 0x659   : > { %5356 = vst [vmem:[#allocation3 + $0x20] sm:$0xff] %v5340_v47  ;;  %v5309_v51 = vadd.f32 %v6973_v32, %v6909_v11  ;;  %v5388_v47 = vmax.f32 (%p431_p5), %v5372_v62, 0.0  ;;  %5484 = vst [vmem:[#allocation3 + $0x48] sm:$0xff] (%p431_p5), %v7929_v14 }
 0x65a   : > { %v6975_v9 = vpop.f32.mrf.mxu1  ;;  %6514 = vst [vmem:[#allocation2] sm:$0xff] (%p431_p5), %v6513_v48   ;;  %6550 = vst [vmem:[#allocation2 + $0x8] sm:$0xff] (%p431_p5), %v6518_v15  }
 0x65b   : > { %v5341_v28 = vadd.f32 %v5309_v51, %v5131_v26  ;;  %v6976_v6 = vadd.f32 %v6975_v9, %v6974_v16  ;;  %v6523_v51 = vpack.c.bf16 (%p431_p5), %v5386_v27, %v5385_v63 }
 0x65c   : > { %v6977_v5 = vpop.f32.mrf.mxu1  ;;  %v5373_v55 = vld [vmem:[#allocation3 + $0x40] sm:$0xff] (%p431_p5) }
 0x65d   : > { %5357 = vst [vmem:[#allocation3 + $0x10] sm:$0xff] %v5341_v28  ;;  %v5312_v10 = vadd.f32 %v6976_v6, %v6912_v3  ;;  %v5389_v32 = vmax.f32 (%p431_p5), %v5373_v55, 0.0  ;;  %5485 = vst [vmem:[#allocation3 + $0x40] sm:$0xff] (%p431_p5), %v7929_v14 }
 0x65e   : > { %v6978_v13 = vpop.f32.mrf.mxu1  ;;  %6551 = vst [vmem:[#allocation2 + $0x10] sm:$0xff] (%p431_p5), %v6523_v51  }
 0x65f   : > { %v5342_v24 = vadd.f32 %v5312_v10, %v5132_v19  ;;  %v6979_v39 = vadd.f32 %v6978_v13, %v6977_v5  ;;  %v6528_v5 = vpack.c.bf16 (%p431_p5), %v5388_v47, %v5387_v37 }
 0x660   : > { %v6980_v8 = vpop.f32.mrf.mxu1  ;;  %v5374_v11 = vld [vmem:[#allocation3 + $0x20] sm:$0xff] (%p431_p5) }
 0x661   : > { %5358 = vst [vmem:[#allocation3 + $0x38] sm:$0xff] %v5342_v24  ;;  %v5317_v29 = vadd.f32 %v6979_v39, %v6915_v31  ;;  %v5390_v9 = vmax.f32 (%p431_p5), %v5374_v11, 0.0  ;;  %5486 = vst [vmem:[#allocation3 + $0x20] sm:$0xff] (%p431_p5), %v7929_v14 }
 0x662   : > { %v6981_v40 = vpop.f32.mrf.mxu1  ;;  %6552 = vst [vmem:[#allocation2 + $0x18] sm:$0xff] (%p431_p5), %v6528_v5  }
 0x663   : > { %v5343_v61 = vadd.f32 %v5317_v29, %v5133_v57  ;;  %v6982_v50 = vadd.f32 %v6981_v40, %v6980_v8  ;;  %v6533_v31 = vpack.c.bf16 (%p431_p5), %v5390_v9, %v5389_v32 }
 0x664   : > { %v6983_v54 = vpop.f32.mrf.mxu1  ;;  %v5375_v26 = vld [vmem:[#allocation3 + $0x10] sm:$0xff] (%p431_p5) }
 0x665   : > { %5359 = vst [vmem:[#allocation3 + $0x60] sm:$0xff] %v5343_v61  ;;  %v5320_v30 = vadd.f32 %v6982_v50, %v6918_v0  ;;  %v5391_v28 = vmax.f32 (%p431_p5), %v5375_v26, 0.0  ;;  %5487 = vst [vmem:[#allocation3 + $0x10] sm:$0xff] (%p431_p5), %v7929_v14 }
 0x666   : > { %v6984_v18 = vpop.f32.mrf.mxu1  ;;  %6553 = vst [vmem:[#allocation2 + $0x20] sm:$0xff] (%p431_p5), %v6533_v31  }
 0x667   : > { %v5344_v36 = vadd.f32 %v5320_v30, %v5134_v20  ;;  %v6985_v45 = vadd.f32 %v6984_v18, %v6983_v54 }
 0x668   : > { %v6986_v56 = vpop.f32.mrf.mxu1  ;;  %v5376_v16 = vld [vmem:[#allocation3 + $0x38] sm:$0xff] (%p431_p5) }
 0x669   : > { %5360 = vst [vmem:[#allocation3 + $0x70] sm:$0xff] %v5344_v36  ;;  %v5325_v59 = vadd.f32 %v6985_v45, %v6921_v17  ;;  %5488 = vst [vmem:[#allocation3 + $0x38] sm:$0xff] (%p431_p5), %v7929_v14  ;;  %v5392_v44 = vmax.f32 (%p431_p5), %v5376_v16, 0.0 }
 0x66a   : > { %v6987_v35 = vpop.f32.mrf.mxu1 }
 0x66b   : > { %v5345_v49 = vadd.f32 %v5325_v59, %v5135_v34  ;;  %v6988_v43 = vadd.f32 %v6987_v35, %v6986_v56  ;;  %v6538_v8 = vpack.c.bf16 (%p431_p5), %v5392_v44, %v5391_v28 }
 0x66c   : > { %v5377_v3 = vld [vmem:[#allocation3 + $0x60] sm:$0xff] (%p431_p5) }
 0x66d   : > { %5361 = vst [vmem:[#allocation3 + $0x78] sm:$0xff] %v5345_v49  ;;  %v5328_v52 = vadd.f32 %v6988_v43, %v6924_v42  ;;  %5364 = sbr.rel (!%p431_p5) target bundleno = 1662 (0x67e), region = 64  ;;  %v5393_v10 = vmax.f32 (%p431_p5), %v5377_v3, 0.0  ;;  %5489 = vst [vmem:[#allocation3 + $0x60] sm:$0xff] (%p431_p5), %v7929_v14 }
 0x66e   : > { %6554 = vst [vmem:[#allocation2 + $0x28] sm:$0xff] (%p431_p5), %v6538_v8  }
 0x66f   : > { %v5346_v46 = vadd.f32 %v5328_v52, %v5136_v38 }
 0x670   : > { %v5378_v6 = vld [vmem:[#allocation3 + $0x70] sm:$0xff] (%p431_p5) }
 0x671   : > { %5362 = vst [vmem:[#allocation3 + $0x28] sm:$0xff] %v5346_v46  ;;  %v5394_v13 = vmax.f32 (%p431_p5), %v5378_v6, 0.0  ;;  %5490 = vst [vmem:[#allocation3 + $0x70] sm:$0xff] (%p431_p5), %v7929_v14 }
 0x673   : > { %v6543_v23 = vpack.c.bf16 %v5394_v13, %v5393_v10 }
 0x674   : > { %v5379_v19 = vld [vmem:[#allocation3 + $0x78] sm:$0xff] }
 0x675   : > { %5491 = vst [vmem:[#allocation3 + $0x78] sm:$0xff] %v7929_v14  ;;  %v5395_v39 = vmax.f32 %v5379_v19, 0.0  ;;  %6555 = vst [vmem:[#allocation2 + $0x30] sm:$0xff] %v6543_v23  }
 0x678   : > { %v5380_v24 = vld [vmem:[#allocation3 + $0x28] sm:$0xff] }
 0x679   : > { %v5396_v57 = vmax.f32 %v5380_v24, 0.0  ;;  %5492 = vst [vmem:[#allocation3 + $0x28] sm:$0xff] %v7929_v14 }
 0x67b   : > { %v6548_v29 = vpack.c.bf16 %v5396_v57, %v5395_v39 }
 0x67d   : > { %6556 = vst [vmem:[#allocation2 + $0x38] sm:$0xff] %v6548_v29  }
 0x67e PF: > { %p5493_p7 = scmp.eq.s32.totalorder %s7916_s30, 1 }
 0x67f   : > { %v7930_v50 = vmov (%p5493_p7), 0.0   ;;  %vm7931_vm15 = vmmov (%p5493_p7), 0   ;;  %v5509_v18 = vld [vmem:[#allocation3 + $0x38] sm:$0xff] (%p5493_p7)  ;;  %v5508_v17 = vld [vmem:[#allocation3 + $0x10] sm:$0xff] (%p5493_p7)  ;;  %v5507_v53 = vld [vmem:[#allocation3 + $0x20] sm:$0xff] (%p5493_p7)  ;;  %v7932_v3 = vmov (%p5493_p7), 1.0  }
 0x680   : > { %5497 = sbr.rel (!%p5493_p7) target bundleno = 2290 (0x8f2), region = 68  ;;  %v5512_v61 = vld [vmem:[#allocation3 + $0x78] sm:$0xff] (%p5493_p7)  ;;  %7648 = vmatprep.subr.mxu0 (%p5493_p7), %v7930_v50  ;;  %7680 = vmatprep.mubr.msk.f32.mxu0 (%p5493_p7), %vm7931_vm15, %v7930_v50  ;;  %v5510_v4 = vld [vmem:[#allocation3 + $0x60] sm:$0xff] (%p5493_p7)  ;;  %v5623_v34 = vld [vmem:[%s10211_s7 + $0x70] sm:$0xff] (%p5493_p7)  ;;  %v5525_v56 = vmax.f32 (%p5493_p7), %v5509_v18, 0.0  ;;  %v5524_v35 = vmax.f32 (%p5493_p7), %v5508_v17, 0.0 }
 0x681   : > { %v5528_v54 = vmax.f32 (%p5493_p7), %v5512_v61, 0.0  ;;  %7683 = vmatprep.subr.mxu1 (%p5493_p7), %v7930_v50  ;;  %7715 = vmatprep.mubr.msk.f32.mxu1 (%p5493_p7), %vm7931_vm15, %v7930_v50  ;;  %v5526_v36 = vmax.f32 (%p5493_p7), %v5510_v4, 0.0  ;;  %v5624_v45 = vld [vmem:[%s10211_s7 + $0x78] sm:$0xff] (%p5493_p7)  ;;  %v5622_v59 = vld [vmem:[%s10211_s7 + $0x68] sm:$0xff] (%p5493_p7)  ;;  %v5506_v49 = vld [vmem:[#allocation3 + $0x40] sm:$0xff] (%p5493_p7)  ;;  %v5523_v43 = vmax.f32 (%p5493_p7), %v5507_v53, 0.0 }
 0x682   : > { %7684 = vmatpush3.msra.mxu1 (%p5493_p7), %v5624_v45  ;;  %v5621_v42 = vld [vmem:[%s10211_s7 + $0x60] sm:$0xff] (%p5493_p7)  ;;  %v5505_v38 = vld [vmem:[#allocation3 + $0x48] sm:$0xff] (%p5493_p7)  ;;  %v5620_v52 = vld [vmem:[%s10211_s7 + $0x58] sm:$0xff] (%p5493_p7)  ;;  %v5522_v46 = vmax.f32 (%p5493_p7), %v5506_v49, 0.0 }
 0x683   : > { %7685 = vmatprep.subr.mxu1 (%p5493_p7), %v7930_v50  ;;  %v5504_v1 = vld [vmem:[#allocation3 + $0x8] sm:$0xff] (%p5493_p7)  ;;  %v5619_v12 = vld [vmem:[%s10211_s7 + $0x50] sm:$0xff] (%p5493_p7)  ;;  %v5521_v33 = vmax.f32 (%p5493_p7), %v5505_v38, 0.0  ;;  %v5617_v2 = vld [vmem:[%s10211_s7 + $0x40] sm:$0xff] (%p5493_p7) }
 0x684   : > { %v5513_v40 = vld [vmem:[#allocation3 + $0x28] sm:$0xff] (%p5493_p7)  ;;  %v5511_v0 = vld [vmem:[#allocation3 + $0x70] sm:$0xff] (%p5493_p7)  ;;  %7686 = vmatpush3.msra.mxu1 (%p5493_p7), %v5623_v34  ;;  %v5520_v41 = vmax.f32 (%p5493_p7), %v5504_v1, 0.0  ;;  %v5501_v14 = vld [vmem:[#allocation3 + $0x18] sm:$0xff] (%p5493_p7) }
 0x685   : > { %v5529_v20 = vmax.f32 %v5513_v40, 0.0  ;;  %v5527_v30 = vmax.f32 %v5511_v0, 0.0  ;;  %7687 = vmatprep.subr.mxu1 %v7930_v50  ;;  %v5503_v25 = vld [vmem:[#allocation3 + $0x68] sm:$0xff]  ;;  %v5502_v58 = vld [vmem:[#allocation3 + $0x50] sm:$0xff]  ;;  %v5616_v22 = vld [vmem:[%s10211_s7 + $0x38] sm:$0xff]  ;;  %v5517_v62 = vmax.f32 %v5501_v14, 0.0 }
 0x686   : > { %7688 = vmatpush3.msra.mxu1 %v5622_v59  ;;  %v5618_v21 = vld [vmem:[%s10211_s7 + $0x48] sm:$0xff]  ;;  %v5519_v7 = vmax.f32 %v5503_v25, 0.0  ;;  %v5518_v63 = vmax.f32 %v5502_v58, 0.0  ;;  %v5500_v27 = vld [vmem:[#allocation3 + $0x58] sm:$0xff]  ;;  %v5615_v60 = vld [vmem:[%s10211_s7 + $0x30] sm:$0xff] }
 0x687   : > { %7649 = vmatpush3.msra.mxu0 %v5529_v20  ;;  %7689 = vmatprep.subr.mxu1 %v7930_v50  ;;  %v5499_v55 = vld [vmem:[#allocation3] sm:$0xff]  ;;  %v5614_v48 = vld [vmem:[%s10211_s7 + $0x28] sm:$0xff]  ;;  %v5516_v37 = vmax.f32 %v5500_v27, 0.0  ;;  %v5498_v47 = vld [vmem:[#allocation3 + $0x30] sm:$0xff] }
 0x688   : > { %7650 = vmatprep.subr.mxu0 %v7930_v50  ;;  %7690 = vmatpush3.msra.mxu1 %v5621_v42  ;;  %v5613_v11 = vld [vmem:[%s10211_s7 + $0x20] sm:$0xff]  ;;  %v5515_v32 = vmax.f32 %v5499_v55, 0.0  ;;  %v5612_v16 = vld [vmem:[%s10211_s7 + $0x18] sm:$0xff]  ;;  %v5514_v15 = vmax.f32 %v5498_v47, 0.0  ;;  %v5611_v51 = vld [vmem:[%s10211_s7 + $0x10] sm:$0xff] }
 0x689   : > { %7651 = vmatpush3.msra.mxu0 %v5528_v54  ;;  %7691 = vmatprep.subr.mxu1 %v7930_v50  ;;  %v6467_v26 = vld [vmem:[%s10207_s3] ss:$0 sm:$0xff]  ;;  %v10379_v9 = vld [vmem:[#allocation7_spill] sm:$0xff]  ;;  %v6485_v19 = vld [vmem:[%s10211_s7 + $0xf8] sm:$0xff] }
 0x68a   : > { %7652 = vmatprep.subr.mxu0 %v7930_v50  ;;  %7692 = vmatpush3.msra.mxu1 %v5620_v52  ;;  %vm5535_vm5 = vcmp.eq.s32.totalorder %v10379_v9, %v6467_v26  ;;  %v5610_v28 = vld [vmem:[%s10211_s7 + $0x8] sm:$0xff]  ;;  %v5609_v6 = vld [vmem:[%s10211_s7] sm:$0xff]  ;;  %v6484_v5 = vld [vmem:[%s10211_s7 + $0xf0] sm:$0xff] }
 0x68b   : > { %7653 = vmatpush3.msra.mxu0 %v5527_v30  ;;  %7693 = vmatprep.subr.mxu1 %v7930_v50  ;;  %v6483_v44 = vld [vmem:[%s10211_s7 + $0xe8] sm:$0xff]  ;;  %v6482_v10 = vld [vmem:[%s10211_s7 + $0xe0] sm:$0xff]  ;;  %v6481_v13 = vld [vmem:[%s10211_s7 + $0xd8] sm:$0xff] }
 0x68c   : > { %7654 = vmatprep.subr.mxu0 %v7930_v50  ;;  %7694 = vmatpush3.msra.mxu1 %v5619_v12  ;;  %v6480_v24 = vld [vmem:[%s10211_s7 + $0xd0] sm:$0xff]  ;;  %v6479_v31 = vld [vmem:[%s10211_s7 + $0xc8] sm:$0xff]  ;;  %v6478_v39 = vld [vmem:[%s10211_s7 + $0xc0] sm:$0xff] }
 0x68d   : > { %7655 = vmatpush3.msra.mxu0 %v5526_v36  ;;  %7695 = vmatprep.subr.mxu1 %v7930_v50  ;;  %v6477_v57 = vld [vmem:[%s10211_s7 + $0xb8] sm:$0xff]  ;;  %v6476_v8 = vld [vmem:[%s10211_s7 + $0xb0] sm:$0xff]  ;;  %v6475_v23 = vld [vmem:[%s10211_s7 + $0xa8] sm:$0xff] }
 0x68e   : > { %7656 = vmatprep.subr.mxu0 %v7930_v50  ;;  %7696 = vmatpush3.msra.mxu1 %v5618_v21  ;;  %v6474_v29 = vld [vmem:[%s10211_s7 + $0xa0] sm:$0xff]  ;;  %v6473_v0 = vld [vmem:[%s10211_s7 + $0x98] sm:$0xff]  ;;  %v6472_v20 = vld [vmem:[%s10211_s7 + $0x90] sm:$0xff] }
 0x68f   : > { %7657 = vmatpush3.msra.mxu0 %v5525_v56  ;;  %7697 = vmatprep.subr.mxu1 %v7930_v50  ;;  %v6471_v54 = vld [vmem:[%s10211_s7 + $0x88] sm:$0xff]  ;;  %v6470_v4 = vld [vmem:[%s10211_s7 + $0x80] sm:$0xff] }
 0x690   : > { %7658 = vmatprep.subr.mxu0 %v7930_v50  ;;  %7698 = vmatpush3.msra.mxu1 %v5617_v2  ;;  %v5608_v30 = vld [vmem:[%s10212_s8] sm:$0x7]  ;;  %v10380_v18 = vld [vmem:[#allocation8_spill] sm:$0xff] }
 0x691   : > { %7659 = vmatpush3.msra.mxu0 %v5524_v35  ;;  %7699 = vmatprep.subr.mxu1 %v7930_v50  ;;  %v5698_v36 = vrot.slane %v5608_v30, %v10380_v18  ;;  %v10381_v17 = vld [vmem:[#allocation52_spill] sm:$0xff] }
 0x692   : > { %7660 = vmatprep.subr.mxu0 %v7930_v50  ;;  %7700 = vmatpush3.msra.mxu1 %v5616_v22  ;;  %v5703_v45 = vrot.slane %v5608_v30, %v10381_v17 }
 0x693   : > { %7661 = vmatpush3.msra.mxu0 %v5523_v43  ;;  %7701 = vmatprep.subr.mxu1 %v7930_v50 }
 0x694   : > { %7662 = vmatprep.subr.mxu0 %v7930_v50  ;;  %7702 = vmatpush3.msra.mxu1 %v5615_v60 }
 0x695   : > { %7663 = vmatpush3.msra.mxu0 %v5522_v46  ;;  %7703 = vmatprep.subr.mxu1 %v7930_v50 }
 0x696   : > { %7664 = vmatprep.subr.mxu0 %v7930_v50  ;;  %7704 = vmatpush3.msra.mxu1 %v5614_v48 }
 0x697   : > { %7665 = vmatpush3.msra.mxu0 %v5521_v33  ;;  %7705 = vmatprep.subr.mxu1 %v7930_v50 }
 0x698   : > { %7666 = vmatprep.subr.mxu0 %v7930_v50  ;;  %7706 = vmatpush3.msra.mxu1 %v5613_v11 }
 0x699   : > { %7667 = vmatpush3.msra.mxu0 %v5520_v41  ;;  %7707 = vmatprep.subr.mxu1 %v7930_v50 }
 0x69a   : > { %7668 = vmatprep.subr.mxu0 %v7930_v50  ;;  %7708 = vmatpush3.msra.mxu1 %v5612_v16 }
 0x69b   : > { %7669 = vmatpush3.msra.mxu0 %v5519_v7  ;;  %7709 = vmatprep.subr.mxu1 %v7930_v50 }
 0x69c   : > { %7670 = vmatprep.subr.mxu0 %v7930_v50  ;;  %7710 = vmatpush3.msra.mxu1 %v5611_v51 }
 0x69d   : > { %7671 = vmatpush3.msra.mxu0 %v5518_v63  ;;  %7711 = vmatprep.subr.mxu1 %v7930_v50 }
 0x69e   : > { %7672 = vmatprep.subr.mxu0 %v7930_v50  ;;  %7712 = vmatpush3.msra.mxu1 %v5610_v28 }
 0x69f   : > { %7673 = vmatpush3.msra.mxu0 %v5517_v62  ;;  %7713 = vmatprep.subr.mxu1 %v7930_v50 }
 0x6a0   : > { %7674 = vmatprep.subr.mxu0 %v7930_v50  ;;  %7714 = vmatpush3.msra.mxu1 %v5609_v6 }
 0x6a1   : > { %7675 = vmatpush3.msra.mxu0 %v5516_v37 }
 0x6a2   : > { %7676 = vmatprep.subr.mxu0 %v7930_v50 }
 0x6a3   : > { %7677 = vmatpush3.msra.mxu0 %v5515_v32 }
 0x6a4   : > { %7678 = vmatprep.subr.mxu0 %v7930_v50 }
 0x6a5   : > { %7679 = vmatpush3.msra.mxu0 %v5514_v15 }
 0x6a6   : > { %7681 = vmatmul.mubr.msk.f32.vlgmr.msra.gmra.mxu0 %vm5535_vm5, %v7932_v3  ;;  %7718 = vmatprep.subr.mxu0 %v7930_v50 }
 0x6a7   : > { %7750 = vmatprep.mubr.msk.f32.mxu0 %vm7931_vm15, %v7930_v50  ;;  %7719 = vmatpush3.msra.mxu0 %v6485_v19 }
 0x6a8   : > { %7720 = vmatprep.subr.mxu0 %v7930_v50 }
 0x6a9   : > { %7721 = vmatpush3.msra.mxu0 %v6484_v5 }
 0x6aa   : > { %7722 = vmatprep.subr.mxu0 %v7930_v50 }
 0x6ab   : > { %7723 = vmatpush3.msra.mxu0 %v6483_v44 }
 0x6ac   : > { %7724 = vmatprep.subr.mxu0 %v7930_v50 }
 0x6ad   : > { %7725 = vmatpush3.msra.mxu0 %v6482_v10 }
 0x6ae   : > { %7726 = vmatprep.subr.mxu0 %v7930_v50 }
 0x6af   : > { %7727 = vmatpush3.msra.mxu0 %v6481_v13 }
 0x6b0   : > { %7728 = vmatprep.subr.mxu0 %v7930_v50 }
 0x6b1   : > { %7729 = vmatpush3.msra.mxu0 %v6480_v24 }
 0x6b2   : > { %7730 = vmatprep.subr.mxu0 %v7930_v50 }
 0x6b3   : > { %7731 = vmatpush3.msra.mxu0 %v6479_v31 }
 0x6b4   : > { %7732 = vmatprep.subr.mxu0 %v7930_v50 }
 0x6b5   : > { %7733 = vmatpush3.msra.mxu0 %v6478_v39 }
 0x6b6   : > { %7734 = vmatprep.subr.mxu0 %v7930_v50 }
 0x6b7   : > { %7735 = vmatpush3.msra.mxu0 %v6477_v57 }
 0x6b8   : > { %7736 = vmatprep.subr.mxu0 %v7930_v50 }
 0x6b9   : > { %7737 = vmatpush3.msra.mxu0 %v6476_v8 }
 0x6ba   : > { %7738 = vmatprep.subr.mxu0 %v7930_v50 }
 0x6bb   : > { %7739 = vmatpush3.msra.mxu0 %v6475_v23 }
 0x6bc   : > { %7740 = vmatprep.subr.mxu0 %v7930_v50 }
 0x6bd   : > { %7741 = vmatpush3.msra.mxu0 %v6474_v29 }
 0x6be   : > { %7742 = vmatprep.subr.mxu0 %v7930_v50 }
 0x6bf   : > { %7743 = vmatpush3.msra.mxu0 %v6473_v0 }
 0x6c0   : > { %7744 = vmatprep.subr.mxu0 %v7930_v50 }
 0x6c1   : > { %7745 = vmatpush3.msra.mxu0 %v6472_v20 }
 0x6c2   : > { %7746 = vmatprep.subr.mxu0 %v7930_v50 }
 0x6c3   : > { %7747 = vmatpush3.msra.mxu0 %v6471_v54 }
 0x6c4   : > { %7748 = vmatprep.subr.mxu0 %v7930_v50  ;;  %v10382_v50 = vld [vmem:[#allocation9_spill] sm:$0xff] }
 0x6c5   : > { %7749 = vmatpush3.msra.mxu0 %v6470_v4  ;;  %v5726_v49 = vrot.slane %v5608_v30, %v10382_v50 }
 0x766   : > { %v5604_v40 = vpop.f32.mrf.mxu0 }
 0x767   : > { %7716 = vmatmul.mubr.f32.vlgmr.msra.gmra.mxu1 %v5604_v40 }
 0x768   : > { %v7682_v61 = vpop.f32.mrf.mxu0 }
 0x827   : > { %v5691_v34 = vpop.f32.mrf.mxu1 }
 0x828   : > { %v5699_v56 = vmul.f32 %v5698_v36, %v5691_v34 }
 0x829   : > { %v7717_v53 = vpop.f32.mrf.mxu1 }
 0x82a   : > { %v5704_v59 = vadd.f32 %v5703_v45, %v5699_v56 }
 0x82c   : > { %v5705_v35 = vmax.f32 %v5704_v59, 0.0 }
 0x82e   : > { %7751 = vmatmul.mubr.f32.vlgmr.msra.gmra.mxu0 %v5705_v35 }
 0x8ee   : > { %v5793_v42 = vpop.f32.mrf.mxu0 }
 0x8ef   : > { %v5794_v43 = vadd.f32 %v5793_v42, %v5726_v49 }
 0x8f0   : > { %v7752_v38 = vpop.f32.mrf.mxu0 }
 0x8f1   : > { %5797 = vst [vmem:[#allocation4] sm:$0x3] %v5794_v43 }
 0x8f2 PF: > { %p10180_p8 = scmp.eq.s32.totalorder %s5910_s12, 1  ;;  %s7933_s27 = smov [#allocation4]  }
 0x8f3   : > { %s5805_s26 = sshll.u32 %s7933_s27, 4  ;;  %s5806_s26 = int_to_ptr.vmem [resolvable:$true] %s5805_s26 }
 0x8f4   : > { %s7874_s28 = scalar_lea.vmem %s5806_s26, 32  ;;  %p7881_p12 = scmp.lt.s32.totalorder %s5806_s26, %s5806_s26 }
 0x8f5   : > { %p7875_p9 = scmp.ne.s32.totalorder %s5806_s26, %s7874_s28  ;;  %p7882_p13 = scmp.lt.s32.totalorder %s7874_s28, %s7874_s28 }
 0x8f7   : > { %p7876_p10 = pnand %p7875_p9, %p10180_p8  ;;  %p7883_p0 = por %p7882_p13, %p7881_p12 }
 0x8f9   : > { %p7877_p11 = pneg %p7876_p10 }
 0x8fb   : > { %p7884_p1 = pnand %p7883_p0, %p7877_p11 }
 0x8fd   : > { %7887 = shalt.err (!%p7884_p1)
}
 0x8fe   : > { %7754 = dma.vmem_to_hbm [thread:$0]  (%p10180_p8), %s5806_s26, 32, %s10213_s9, [#allocation5]  }
 0x8ff   : > { %7911 = dma.done.wait (%p10180_p8), [#allocation5], 32  }
 0x900   : > { %7913 = vsyncadd (%p10180_p8), [#allocation5], 4294967264 }
 0x901 PF: > { %s20_s11 = sadd.s32 1, %s7924_s11   ;;  %s10384_s30 = smov %s7920_s10 }
 0x902   : > { %p17_p2 = scmp.ge.s32.totalorder %s20_s11, 4   ;;  %s10385_s10 = smov %s10387_s13 }
 0x904   :  { %19 = sbr.rel (!%p17_p2) target bundleno = 2 (0x2), region = 112 }
 0x909   :  { %5818 = vsyncpa [#allocation5], 1 }
 0x90a   :  { %5820 = vsyncpa [#allocation5 + $0x1], 1 }

</bundles_post_ra>
